<compile_context>
chip_gen: v7x
topology: tpu7x:2x2x1
jax: 0.10.0
libtpu: 0.0.40
codegen_flags: <defaults>
</compile_context>

<pallas_src>
import jax
import jax.numpy as jnp
from jax import lax
from jax.experimental import pallas as pl
from jax.experimental.pallas import tpu as pltpu


# ----------------------------- Pallas kernel -------------------------------------------

def _upsample_conv1x1_kernel(x_ref, w_ref, b_ref, o_ref):
    """Fused: 1x1 conv (+folded BN) + ReLU on the source tile, then nearest upsample.

    x_ref : (1, Cin, h_t, W)   VMEM  source-resolution activation tile (NCHW)
    w_ref : (Cout, Cin)        SMEM  BN-folded 1x1 conv weights (scalars)
    b_ref : (Cout,)            SMEM  BN-folded bias (scalars)
    o_ref : (1, Cout, th, Wo)  VMEM  upsampled output tile (NCHW), th = h_t*s, Wo = W*s
    """
    cout, cin = w_ref.shape
    _, _, h_t, W = x_ref.shape
    _, _, th, Wo = o_ref.shape
    s = th // h_t                                    # static upsample factor

    # Exact one-hot replication operators, built in-register from 2-D iotas
    # (no HBM inputs, no DMAs). R[w, wo] = (wo // s == w); E[t, r] = (t // s == r),
    # written as two comparisons to avoid vector integer division.
    wo_i = lax.broadcasted_iota(jnp.int32, (W, Wo), 1)
    wbase = lax.broadcasted_iota(jnp.int32, (W, Wo), 0) * s
    R = jnp.logical_and(wo_i >= wbase, wo_i < wbase + s).astype(jnp.float32)   # (W, Wo)
    t_i = lax.broadcasted_iota(jnp.int32, (th, h_t), 0)
    rbase = lax.broadcasted_iota(jnp.int32, (th, h_t), 1) * s
    E = jnp.logical_and(t_i >= rbase, t_i < rbase + s).astype(jnp.float32)     # (th, h_t)

    # Static choice: expand along whichever axis yields the fewer total MACs first.
    #   W-first cost ~ h_t*Wo*(W + th);  H-first cost ~ th*W*(h_t + Wo)
    w_first = (W + th) <= (h_t + Wo)

    for co in range(cout):
        # 1x1 conv + folded BN on the VPU: K=Cin is tiny, so scalar-broadcast MACs
        # (spatial on sublane/lane) instead of a degenerate MXU matmul.
        acc = x_ref[0, 0] * w_ref[co, 0]
        for ci in range(1, cin):
            acc = acc + x_ref[0, ci] * w_ref[co, ci]
        v = jnp.maximum(acc + b_ref[co], 0.0)        # (h_t, W), f32, ReLU epilogue

        # Nearest-neighbour upsample fused in-kernel as exact one-hot matmuls.
        # HIGHEST precision keeps the f32 values exact through the MXU (each output
        # element is a single-term selection sum).
        if w_first:
            yw = jnp.dot(v, R,
                         preferred_element_type=jnp.float32,
                         precision=lax.Precision.HIGHEST)            # (h_t, Wo)
            out = jnp.dot(E, yw,
                          preferred_element_type=jnp.float32,
                          precision=lax.Precision.HIGHEST)           # (th, Wo)
        else:
            yh = jnp.dot(E, v,
                         preferred_element_type=jnp.float32,
                         precision=lax.Precision.HIGHEST)            # (th, W)
            out = jnp.dot(yh, R,
                          preferred_element_type=jnp.float32,
                          precision=lax.Precision.HIGHEST)           # (th, Wo)
        o_ref[0, co] = out.astype(o_ref.dtype)


def _pick_h_tile(H, s, cin, cout, W, vmem_budget_bytes=6 << 20):
    """Largest source-row tile h_t (divisor of H, tiling-legal) whose double-buffered
    input+output tiles fit the VMEM budget (conservative for v7x's smaller VMEM)."""
    Wo = W * s
    smallest_valid = None
    for h_t in range(H, 0, -1):
        if H % h_t:
            continue
        th = h_t * s
        if not ((h_t % 8 == 0) or (h_t == H)):
            continue
        if not ((th % 8 == 0) or (th == H * s)):
            continue
        smallest_valid = h_t                         # loop is descending
        need = 2 * 4 * (cin * h_t * W + cout * th * Wo)   # 2 buffers, f32
        if need <= vmem_budget_bytes:
            return h_t
    return smallest_valid if smallest_valid is not None else H


def upsample_conv1x1_pallas(x_nchw, w_eff, b_eff, n):
    """x_nchw: (N, Cin, H, W) f32.  Returns (N, Cout, H*s, W*s) f32, s = 2**(n+2)."""
    s = 2 ** (n + 2)
    N, Cin, H, W = x_nchw.shape
    Cout = w_eff.shape[0]
    Ho, Wo = H * s, W * s

    h_t = _pick_h_tile(H, s, Cin, Cout, W)
    th = h_t * s
    grid = (N, H // h_t)

    # Advisory cost hint for XLA scheduling around the custom call.
    conv_flops = 2 * N * Cout * Cin * H * W
    repw_flops = 2 * N * Cout * H * W * Wo
    reph_flops = 2 * N * Cout * Ho * h_t * Wo
    bytes_accessed = 4 * (N * Cin * H * W + N * Cout * Ho * Wo + Cout * Cin + Cout)
    cost = pl.CostEstimate(flops=int(conv_flops + repw_flops + reph_flops),
                           transcendentals=0,
                           bytes_accessed=int(bytes_accessed))

    return pl.pallas_call(
        _upsample_conv1x1_kernel,
        out_shape=jax.ShapeDtypeStruct((N, Cout, Ho, Wo), x_nchw.dtype),
        grid_spec=pltpu.PrefetchScalarGridSpec(
            num_scalar_prefetch=0,
            grid=grid,
            in_specs=[
                # Source activation tile: only the pre-upsample rows feeding this block.
                pl.BlockSpec((1, Cin, h_t, W), lambda nb, hb: (nb, 0, hb, 0)),
                # Folded conv weights / bias as SMEM scalars.
                pl.BlockSpec(memory_space=pltpu.MemorySpace.SMEM),
                pl.BlockSpec(memory_space=pltpu.MemorySpace.SMEM),
            ],
            out_specs=pl.BlockSpec((1, Cout, th, Wo), lambda nb, hb: (nb, 0, hb, 0)),
        ),
        compiler_params=pltpu.CompilerParams(
            dimension_semantics=("parallel", "parallel"),
        ),
        cost_estimate=cost,
    )(x_nchw, w_eff, b_eff)


# ----------------------------- Module wrapper -------------------------------------------

def init_upsampling_block_params(key, ni, nout):
    """Deterministic synthetic parameters; BN(eval) folded into the 1x1 conv."""
    k1, k2 = jax.random.split(key)
    conv_w = jax.random.normal(k1, (nout, ni, 1, 1), jnp.float32) * 0.1
    conv_b = jax.random.normal(k2, (nout,), jnp.float32) * 0.1
    gamma = jnp.linspace(0.9, 1.1, nout).astype(jnp.float32)
    beta = jnp.linspace(-0.1, 0.1, nout).astype(jnp.float32)
    running_mean = jnp.linspace(-0.05, 0.05, nout).astype(jnp.float32)
    running_var = jnp.linspace(0.8, 1.2, nout).astype(jnp.float32)
    eps = 1e-5

    scale = gamma / jnp.sqrt(running_var + eps)                  # (nout,)
    w_eff = conv_w[:, :, 0, 0] * scale[:, None]                  # (nout, ni)
    b_eff = (conv_b - running_mean) * scale + beta               # (nout,)
    return {"w_eff": w_eff, "b_eff": b_eff}


def upsampling_block_forward(x_nchw, params, n):
    """Forward pass of UpsamplingBlock. Input/Output are NCHW (PyTorch convention).

    Uses conv(upsample(x)) == upsample(conv(x)) for a 1x1 conv + nearest upsample,
    with both the conv and the upsample fused in a single Pallas kernel. No layout
    transposes, no HBM intermediate at the upsampled resolution.
    """
    return upsample_conv1x1_pallas(x_nchw, params["w_eff"], params["b_eff"], n)


# ----------------------------- Pure-JAX reference ---------------------------------------

def upsampling_block_reference(x_nchw, params, n):
    """Mirrors the PyTorch op order exactly: upsample first, then 1x1 conv + ReLU."""
    s = 2 ** (n + 2)
    xu = jnp.repeat(jnp.repeat(x_nchw, s, axis=2), s, axis=3)
    w, b = params["w_eff"], params["b_eff"]                      # (Cout, Cin), (Cout,)
    y = jnp.einsum("nchw,oc->nohw", xu, w) + b[None, :, None, None]
    return jnp.maximum(y, 0.0)


# ----------------------------- Main ------------------------------------------------------

if __name__ == "__main__":
    key = jax.random.PRNGKey(0)
    kx, kp = jax.random.split(key)

    # Small shapes consistent with the module: batch=2, ni=4, nout=8, spatial=16, n=0.
    N, ni, nout, H, W, n = 2, 4, 8, 16, 16, 0        # upsample factor = 2**(n+2) = 4
    x = jax.random.normal(kx, (N, ni, H, W), jnp.float32)
    params = init_upsampling_block_params(kp, ni, nout)

    out = jax.block_until_ready(upsampling_block_forward(x, params, n))

    s = 2 ** (n + 2)
    assert out.shape == (N, nout, H * s, W * s), out.shape
    ref = jax.block_until_ready(upsampling_block_reference(x, params, n))
    assert jnp.allclose(out, ref, atol=1e-5, rtol=1e-5), float(jnp.max(jnp.abs(out - ref)))

    print("KERNEL_OK")
</pallas_src>

<mosaic_0001>
module attributes {stable_mosaic.version = 11 : i64} {
  func.func @_upsample_conv1x1_kernel(%arg0: i32, %arg1: i32, %arg2: memref<1x4x16x16xf32, #tpu.memory_space<vmem>>, %arg3: memref<8x4xf32, #tpu.memory_space<smem>>, %arg4: memref<8xf32, #tpu.memory_space<smem>>, %arg5: memref<1x8x64x64xf32, #tpu.memory_space<vmem>>) attributes {dimension_semantics = [#tpu.dimension_semantics<parallel>, #tpu.dimension_semantics<parallel>], iteration_bounds = array<i64: 2, 1>, scalar_prefetch = 0 : i64, scratch_operands = 0 : i64, tpu.core_type = #tpu.core_type<tc>, window_params = [{transform_indices = @transform_0, window_bounds = array<i64: 1, 4, 16, 16>}, {transform_indices = @transform_1, window_bounds = array<i64: 8, 4>}, {transform_indices = @transform_2, window_bounds = array<i64: 8>}, {transform_indices = @transform_3, window_bounds = array<i64: 1, 8, 64, 64>}]} {
    %0 = tpu.iota {dimensions = array<i32: 1>} : vector<16x64xi32>
    %1 = tpu.iota {dimensions = array<i32: 0>} : vector<16x64xi32>
    %c4_i32 = arith.constant 4 : i32
    %2 = vector.broadcast %c4_i32 : i32 to vector<16x64xi32>
    %3 = arith.muli %1, %2 : vector<16x64xi32>
    %4 = arith.cmpi sge, %0, %3 : vector<16x64xi32>
    %c4_i32_0 = arith.constant 4 : i32
    %5 = vector.broadcast %c4_i32_0 : i32 to vector<16x64xi32>
    %6 = arith.addi %3, %5 : vector<16x64xi32>
    %7 = arith.cmpi slt, %0, %6 : vector<16x64xi32>
    %8 = arith.andi %4, %7 : vector<16x64xi1>
    %9 = arith.extui %8 : vector<16x64xi1> to vector<16x64xi32>
    %10 = arith.sitofp %9 : vector<16x64xi32> to vector<16x64xf32>
    %11 = tpu.iota {dimensions = array<i32: 0>} : vector<64x16xi32>
    %12 = tpu.iota {dimensions = array<i32: 1>} : vector<64x16xi32>
    %c4_i32_1 = arith.constant 4 : i32
    %13 = vector.broadcast %c4_i32_1 : i32 to vector<64x16xi32>
    %14 = arith.muli %12, %13 : vector<64x16xi32>
    %15 = arith.cmpi sge, %11, %14 : vector<64x16xi32>
    %c4_i32_2 = arith.constant 4 : i32
    %16 = vector.broadcast %c4_i32_2 : i32 to vector<64x16xi32>
    %17 = arith.addi %14, %16 : vector<64x16xi32>
    %18 = arith.cmpi slt, %11, %17 : vector<64x16xi32>
    %19 = arith.andi %15, %18 : vector<64x16xi1>
    %20 = arith.extui %19 : vector<64x16xi1> to vector<64x16xi32>
    %21 = arith.sitofp %20 : vector<64x16xi32> to vector<64x16xf32>
    %c0 = arith.constant 0 : index
    %c0_3 = arith.constant 0 : index
    %c0_4 = arith.constant 0 : index
    %c0_5 = arith.constant 0 : index
    %22 = vector.load %arg2[%c0, %c0_3, %c0_4, %c0_5] : memref<1x4x16x16xf32, #tpu.memory_space<vmem>>, vector<1x1x16x16xf32>
    %23 = vector.shape_cast %22 : vector<1x1x16x16xf32> to vector<16x16xf32>
    %c0_6 = arith.constant 0 : index
    %c0_7 = arith.constant 0 : index
    %24 = memref.load %arg3[%c0_6, %c0_7] : memref<8x4xf32, #tpu.memory_space<smem>>
    %25 = vector.broadcast %24 : f32 to vector<16x16xf32>
    %26 = arith.mulf %23, %25 : vector<16x16xf32>
    %c0_8 = arith.constant 0 : index
    %c1 = arith.constant 1 : index
    %c0_9 = arith.constant 0 : index
    %c0_10 = arith.constant 0 : index
    %27 = vector.load %arg2[%c0_8, %c1, %c0_9, %c0_10] : memref<1x4x16x16xf32, #tpu.memory_space<vmem>>, vector<1x1x16x16xf32>
    %28 = vector.shape_cast %27 : vector<1x1x16x16xf32> to vector<16x16xf32>
    %c0_11 = arith.constant 0 : index
    %c1_12 = arith.constant 1 : index
    %29 = memref.load %arg3[%c0_11, %c1_12] : memref<8x4xf32, #tpu.memory_space<smem>>
    %30 = vector.broadcast %29 : f32 to vector<16x16xf32>
    %31 = arith.mulf %28, %30 : vector<16x16xf32>
    %32 = arith.addf %26, %31 : vector<16x16xf32>
    %c0_13 = arith.constant 0 : index
    %c2 = arith.constant 2 : index
    %c0_14 = arith.constant 0 : index
    %c0_15 = arith.constant 0 : index
    %33 = vector.load %arg2[%c0_13, %c2, %c0_14, %c0_15] : memref<1x4x16x16xf32, #tpu.memory_space<vmem>>, vector<1x1x16x16xf32>
    %34 = vector.shape_cast %33 : vector<1x1x16x16xf32> to vector<16x16xf32>
    %c0_16 = arith.constant 0 : index
    %c2_17 = arith.constant 2 : index
    %35 = memref.load %arg3[%c0_16, %c2_17] : memref<8x4xf32, #tpu.memory_space<smem>>
    %36 = vector.broadcast %35 : f32 to vector<16x16xf32>
    %37 = arith.mulf %34, %36 : vector<16x16xf32>
    %38 = arith.addf %32, %37 : vector<16x16xf32>
    %c0_18 = arith.constant 0 : index
    %c3 = arith.constant 3 : index
    %c0_19 = arith.constant 0 : index
    %c0_20 = arith.constant 0 : index
    %39 = vector.load %arg2[%c0_18, %c3, %c0_19, %c0_20] : memref<1x4x16x16xf32, #tpu.memory_space<vmem>>, vector<1x1x16x16xf32>
    %40 = vector.shape_cast %39 : vector<1x1x16x16xf32> to vector<16x16xf32>
    %c0_21 = arith.constant 0 : index
    %c3_22 = arith.constant 3 : index
    %41 = memref.load %arg3[%c0_21, %c3_22] : memref<8x4xf32, #tpu.memory_space<smem>>
    %42 = vector.broadcast %41 : f32 to vector<16x16xf32>
    %43 = arith.mulf %40, %42 : vector<16x16xf32>
    %44 = arith.addf %38, %43 : vector<16x16xf32>
    %c0_23 = arith.constant 0 : index
    %45 = memref.load %arg4[%c0_23] : memref<8xf32, #tpu.memory_space<smem>>
    %46 = vector.broadcast %45 : f32 to vector<16x16xf32>
    %47 = arith.addf %44, %46 : vector<16x16xf32>
    %cst = arith.constant 0.000000e+00 : f32
    %48 = vector.broadcast %cst : f32 to vector<16x16xf32>
    %49 = arith.maximumf %47, %48 : vector<16x16xf32>
    %cst_24 = arith.constant dense<0.000000e+00> : vector<16x64xf32>
    %50 = tpu.matmul %49, %10, %cst_24 {dimension_numbers = #tpu.dot_dimension_numbers<[1], [0], [0], [1], [0, 0, 1, 1], [], []>, precision = #tpu.contract_precision<fp32>} : vector<16x16xf32>, vector<16x64xf32>, vector<16x64xf32> -> vector<16x64xf32>
    %cst_25 = arith.constant dense<0.000000e+00> : vector<64x64xf32>
    %51 = tpu.matmul %21, %50, %cst_25 {dimension_numbers = #tpu.dot_dimension_numbers<[1], [0], [0], [1], [0, 0, 1, 1], [], []>, precision = #tpu.contract_precision<fp32>} : vector<64x16xf32>, vector<16x64xf32>, vector<64x64xf32> -> vector<64x64xf32>
    %c0_26 = arith.constant 0 : index
    %c0_27 = arith.constant 0 : index
    %c0_28 = arith.constant 0 : index
    %c0_29 = arith.constant 0 : index
    %52 = vector.load %arg5[%c0_26, %c0_27, %c0_28, %c0_29] : memref<1x8x64x64xf32, #tpu.memory_space<vmem>>, vector<1x1x64x64xf32>
    %53 = vector.shape_cast %52 : vector<1x1x64x64xf32> to vector<64x64xf32>
    %54 = vector.shape_cast %51 : vector<64x64xf32> to vector<1x1x64x64xf32>
    tpu.vector_store %arg5[%c0_26, %c0_27, %c0_28, %c0_29], %54 {strides = array<i32>} : memref<1x8x64x64xf32, #tpu.memory_space<vmem>>, vector<1x1x64x64xf32>,
    %c0_30 = arith.constant 0 : index
    %c0_31 = arith.constant 0 : index
    %c0_32 = arith.constant 0 : index
    %c0_33 = arith.constant 0 : index
    %55 = vector.load %arg2[%c0_30, %c0_31, %c0_32, %c0_33] : memref<1x4x16x16xf32, #tpu.memory_space<vmem>>, vector<1x1x16x16xf32>
    %56 = vector.shape_cast %55 : vector<1x1x16x16xf32> to vector<16x16xf32>
    %c1_34 = arith.constant 1 : index
    %c0_35 = arith.constant 0 : index
    %57 = memref.load %arg3[%c1_34, %c0_35] : memref<8x4xf32, #tpu.memory_space<smem>>
    %58 = vector.broadcast %57 : f32 to vector<16x16xf32>
    %59 = arith.mulf %56, %58 : vector<16x16xf32>
    %c0_36 = arith.constant 0 : index
    %c1_37 = arith.constant 1 : index
    %c0_38 = arith.constant 0 : index
    %c0_39 = arith.constant 0 : index
    %60 = vector.load %arg2[%c0_36, %c1_37, %c0_38, %c0_39] : memref<1x4x16x16xf32, #tpu.memory_space<vmem>>, vector<1x1x16x16xf32>
    %61 = vector.shape_cast %60 : vector<1x1x16x16xf32> to vector<16x16xf32>
    %c1_40 = arith.constant 1 : index
    %c1_41 = arith.constant 1 : index
    %62 = memref.load %arg3[%c1_40, %c1_41] : memref<8x4xf32, #tpu.memory_space<smem>>
    %63 = vector.broadcast %62 : f32 to vector<16x16xf32>
    %64 = arith.mulf %61, %63 : vector<16x16xf32>
    %65 = arith.addf %59, %64 : vector<16x16xf32>
    %c0_42 = arith.constant 0 : index
    %c2_43 = arith.constant 2 : index
    %c0_44 = arith.constant 0 : index
    %c0_45 = arith.constant 0 : index
    %66 = vector.load %arg2[%c0_42, %c2_43, %c0_44, %c0_45] : memref<1x4x16x16xf32, #tpu.memory_space<vmem>>, vector<1x1x16x16xf32>
    %67 = vector.shape_cast %66 : vector<1x1x16x16xf32> to vector<16x16xf32>
    %c1_46 = arith.constant 1 : index
    %c2_47 = arith.constant 2 : index
    %68 = memref.load %arg3[%c1_46, %c2_47] : memref<8x4xf32, #tpu.memory_space<smem>>
    %69 = vector.broadcast %68 : f32 to vector<16x16xf32>
    %70 = arith.mulf %67, %69 : vector<16x16xf32>
    %71 = arith.addf %65, %70 : vector<16x16xf32>
    %c0_48 = arith.constant 0 : index
    %c3_49 = arith.constant 3 : index
    %c0_50 = arith.constant 0 : index
    %c0_51 = arith.constant 0 : index
    %72 = vector.load %arg2[%c0_48, %c3_49, %c0_50, %c0_51] : memref<1x4x16x16xf32, #tpu.memory_space<vmem>>, vector<1x1x16x16xf32>
    %73 = vector.shape_cast %72 : vector<1x1x16x16xf32> to vector<16x16xf32>
    %c1_52 = arith.constant 1 : index
    %c3_53 = arith.constant 3 : index
    %74 = memref.load %arg3[%c1_52, %c3_53] : memref<8x4xf32, #tpu.memory_space<smem>>
    %75 = vector.broadcast %74 : f32 to vector<16x16xf32>
    %76 = arith.mulf %73, %75 : vector<16x16xf32>
    %77 = arith.addf %71, %76 : vector<16x16xf32>
    %c1_54 = arith.constant 1 : index
    %78 = memref.load %arg4[%c1_54] : memref<8xf32, #tpu.memory_space<smem>>
    %79 = vector.broadcast %78 : f32 to vector<16x16xf32>
    %80 = arith.addf %77, %79 : vector<16x16xf32>
    %cst_55 = arith.constant 0.000000e+00 : f32
    %81 = vector.broadcast %cst_55 : f32 to vector<16x16xf32>
    %82 = arith.maximumf %80, %81 : vector<16x16xf32>
    %cst_56 = arith.constant dense<0.000000e+00> : vector<16x64xf32>
    %83 = tpu.matmul %82, %10, %cst_56 {dimension_numbers = #tpu.dot_dimension_numbers<[1], [0], [0], [1], [0, 0, 1, 1], [], []>, precision = #tpu.contract_precision<fp32>} : vector<16x16xf32>, vector<16x64xf32>, vector<16x64xf32> -> vector<16x64xf32>
    %cst_57 = arith.constant dense<0.000000e+00> : vector<64x64xf32>
    %84 = tpu.matmul %21, %83, %cst_57 {dimension_numbers = #tpu.dot_dimension_numbers<[1], [0], [0], [1], [0, 0, 1, 1], [], []>, precision = #tpu.contract_precision<fp32>} : vector<64x16xf32>, vector<16x64xf32>, vector<64x64xf32> -> vector<64x64xf32>
    %c0_58 = arith.constant 0 : index
    %c1_59 = arith.constant 1 : index
    %c0_60 = arith.constant 0 : index
    %c0_61 = arith.constant 0 : index
    %85 = vector.load %arg5[%c0_58, %c1_59, %c0_60, %c0_61] : memref<1x8x64x64xf32, #tpu.memory_space<vmem>>, vector<1x1x64x64xf32>
    %86 = vector.shape_cast %85 : vector<1x1x64x64xf32> to vector<64x64xf32>
    %87 = vector.shape_cast %84 : vector<64x64xf32> to vector<1x1x64x64xf32>
    tpu.vector_store %arg5[%c0_58, %c1_59, %c0_60, %c0_61], %87 {strides = array<i32>} : memref<1x8x64x64xf32, #tpu.memory_space<vmem>>, vector<1x1x64x64xf32>,
    %c0_62 = arith.constant 0 : index
    %c0_63 = arith.constant 0 : index
    %c0_64 = arith.constant 0 : index
    %c0_65 = arith.constant 0 : index
    %88 = vector.load %arg2[%c0_62, %c0_63, %c0_64, %c0_65] : memref<1x4x16x16xf32, #tpu.memory_space<vmem>>, vector<1x1x16x16xf32>
    %89 = vector.shape_cast %88 : vector<1x1x16x16xf32> to vector<16x16xf32>
    %c2_66 = arith.constant 2 : index
    %c0_67 = arith.constant 0 : index
    %90 = memref.load %arg3[%c2_66, %c0_67] : memref<8x4xf32, #tpu.memory_space<smem>>
    %91 = vector.broadcast %90 : f32 to vector<16x16xf32>
    %92 = arith.mulf %89, %91 : vector<16x16xf32>
    %c0_68 = arith.constant 0 : index
    %c1_69 = arith.constant 1 : index
    %c0_70 = arith.constant 0 : index
    %c0_71 = arith.constant 0 : index
    %93 = vector.load %arg2[%c0_68, %c1_69, %c0_70, %c0_71] : memref<1x4x16x16xf32, #tpu.memory_space<vmem>>, vector<1x1x16x16xf32>
    %94 = vector.shape_cast %93 : vector<1x1x16x16xf32> to vector<16x16xf32>
    %c2_72 = arith.constant 2 : index
    %c1_73 = arith.constant 1 : index
    %95 = memref.load %arg3[%c2_72, %c1_73] : memref<8x4xf32, #tpu.memory_space<smem>>
    %96 = vector.broadcast %95 : f32 to vector<16x16xf32>
    %97 = arith.mulf %94, %96 : vector<16x16xf32>
    %98 = arith.addf %92, %97 : vector<16x16xf32>
    %c0_74 = arith.constant 0 : index
    %c2_75 = arith.constant 2 : index
    %c0_76 = arith.constant 0 : index
    %c0_77 = arith.constant 0 : index
    %99 = vector.load %arg2[%c0_74, %c2_75, %c0_76, %c0_77] : memref<1x4x16x16xf32, #tpu.memory_space<vmem>>, vector<1x1x16x16xf32>
    %100 = vector.shape_cast %99 : vector<1x1x16x16xf32> to vector<16x16xf32>
    %c2_78 = arith.constant 2 : index
    %c2_79 = arith.constant 2 : index
    %101 = memref.load %arg3[%c2_78, %c2_79] : memref<8x4xf32, #tpu.memory_space<smem>>
    %102 = vector.broadcast %101 : f32 to vector<16x16xf32>
    %103 = arith.mulf %100, %102 : vector<16x16xf32>
    %104 = arith.addf %98, %103 : vector<16x16xf32>
    %c0_80 = arith.constant 0 : index
    %c3_81 = arith.constant 3 : index
    %c0_82 = arith.constant 0 : index
    %c0_83 = arith.constant 0 : index
    %105 = vector.load %arg2[%c0_80, %c3_81, %c0_82, %c0_83] : memref<1x4x16x16xf32, #tpu.memory_space<vmem>>, vector<1x1x16x16xf32>
    %106 = vector.shape_cast %105 : vector<1x1x16x16xf32> to vector<16x16xf32>
    %c2_84 = arith.constant 2 : index
    %c3_85 = arith.constant 3 : index
    %107 = memref.load %arg3[%c2_84, %c3_85] : memref<8x4xf32, #tpu.memory_space<smem>>
    %108 = vector.broadcast %107 : f32 to vector<16x16xf32>
    %109 = arith.mulf %106, %108 : vector<16x16xf32>
    %110 = arith.addf %104, %109 : vector<16x16xf32>
    %c2_86 = arith.constant 2 : index
    %111 = memref.load %arg4[%c2_86] : memref<8xf32, #tpu.memory_space<smem>>
    %112 = vector.broadcast %111 : f32 to vector<16x16xf32>
    %113 = arith.addf %110, %112 : vector<16x16xf32>
    %cst_87 = arith.constant 0.000000e+00 : f32
    %114 = vector.broadcast %cst_87 : f32 to vector<16x16xf32>
    %115 = arith.maximumf %113, %114 : vector<16x16xf32>
    %cst_88 = arith.constant dense<0.000000e+00> : vector<16x64xf32>
    %116 = tpu.matmul %115, %10, %cst_88 {dimension_numbers = #tpu.dot_dimension_numbers<[1], [0], [0], [1], [0, 0, 1, 1], [], []>, precision = #tpu.contract_precision<fp32>} : vector<16x16xf32>, vector<16x64xf32>, vector<16x64xf32> -> vector<16x64xf32>
    %cst_89 = arith.constant dense<0.000000e+00> : vector<64x64xf32>
    %117 = tpu.matmul %21, %116, %cst_89 {dimension_numbers = #tpu.dot_dimension_numbers<[1], [0], [0], [1], [0, 0, 1, 1], [], []>, precision = #tpu.contract_precision<fp32>} : vector<64x16xf32>, vector<16x64xf32>, vector<64x64xf32> -> vector<64x64xf32>
    %c0_90 = arith.constant 0 : index
    %c2_91 = arith.constant 2 : index
    %c0_92 = arith.constant 0 : index
    %c0_93 = arith.constant 0 : index
    %118 = vector.load %arg5[%c0_90, %c2_91, %c0_92, %c0_93] : memref<1x8x64x64xf32, #tpu.memory_space<vmem>>, vector<1x1x64x64xf32>
    %119 = vector.shape_cast %118 : vector<1x1x64x64xf32> to vector<64x64xf32>
    %120 = vector.shape_cast %117 : vector<64x64xf32> to vector<1x1x64x64xf32>
    tpu.vector_store %arg5[%c0_90, %c2_91, %c0_92, %c0_93], %120 {strides = array<i32>} : memref<1x8x64x64xf32, #tpu.memory_space<vmem>>, vector<1x1x64x64xf32>,
    %c0_94 = arith.constant 0 : index
    %c0_95 = arith.constant 0 : index
    %c0_96 = arith.constant 0 : index
    %c0_97 = arith.constant 0 : index
    %121 = vector.load %arg2[%c0_94, %c0_95, %c0_96, %c0_97] : memref<1x4x16x16xf32, #tpu.memory_space<vmem>>, vector<1x1x16x16xf32>
    %122 = vector.shape_cast %121 : vector<1x1x16x16xf32> to vector<16x16xf32>
    %c3_98 = arith.constant 3 : index
    %c0_99 = arith.constant 0 : index
    %123 = memref.load %arg3[%c3_98, %c0_99] : memref<8x4xf32, #tpu.memory_space<smem>>
    %124 = vector.broadcast %123 : f32 to vector<16x16xf32>
    %125 = arith.mulf %122, %124 : vector<16x16xf32>
    %c0_100 = arith.constant 0 : index
    %c1_101 = arith.constant 1 : index
    %c0_102 = arith.constant 0 : index
    %c0_103 = arith.constant 0 : index
    %126 = vector.load %arg2[%c0_100, %c1_101, %c0_102, %c0_103] : memref<1x4x16x16xf32, #tpu.memory_space<vmem>>, vector<1x1x16x16xf32>
    %127 = vector.shape_cast %126 : vector<1x1x16x16xf32> to vector<16x16xf32>
    %c3_104 = arith.constant 3 : index
    %c1_105 = arith.constant 1 : index
    %128 = memref.load %arg3[%c3_104, %c1_105] : memref<8x4xf32, #tpu.memory_space<smem>>
    %129 = vector.broadcast %128 : f32 to vector<16x16xf32>
    %130 = arith.mulf %127, %129 : vector<16x16xf32>
    %131 = arith.addf %125, %130 : vector<16x16xf32>
    %c0_106 = arith.constant 0 : index
    %c2_107 = arith.constant 2 : index
    %c0_108 = arith.constant 0 : index
    %c0_109 = arith.constant 0 : index
    %132 = vector.load %arg2[%c0_106, %c2_107, %c0_108, %c0_109] : memref<1x4x16x16xf32, #tpu.memory_space<vmem>>, vector<1x1x16x16xf32>
    %133 = vector.shape_cast %132 : vector<1x1x16x16xf32> to vector<16x16xf32>
    %c3_110 = arith.constant 3 : index
    %c2_111 = arith.constant 2 : index
    %134 = memref.load %arg3[%c3_110, %c2_111] : memref<8x4xf32, #tpu.memory_space<smem>>
    %135 = vector.broadcast %134 : f32 to vector<16x16xf32>
    %136 = arith.mulf %133, %135 : vector<16x16xf32>
    %137 = arith.addf %131, %136 : vector<16x16xf32>
    %c0_112 = arith.constant 0 : index
    %c3_113 = arith.constant 3 : index
    %c0_114 = arith.constant 0 : index
    %c0_115 = arith.constant 0 : index
    %138 = vector.load %arg2[%c0_112, %c3_113, %c0_114, %c0_115] : memref<1x4x16x16xf32, #tpu.memory_space<vmem>>, vector<1x1x16x16xf32>
    %139 = vector.shape_cast %138 : vector<1x1x16x16xf32> to vector<16x16xf32>
    %c3_116 = arith.constant 3 : index
    %c3_117 = arith.constant 3 : index
    %140 = memref.load %arg3[%c3_116, %c3_117] : memref<8x4xf32, #tpu.memory_space<smem>>
    %141 = vector.broadcast %140 : f32 to vector<16x16xf32>
    %142 = arith.mulf %139, %141 : vector<16x16xf32>
    %143 = arith.addf %137, %142 : vector<16x16xf32>
    %c3_118 = arith.constant 3 : index
    %144 = memref.load %arg4[%c3_118] : memref<8xf32, #tpu.memory_space<smem>>
    %145 = vector.broadcast %144 : f32 to vector<16x16xf32>
    %146 = arith.addf %143, %145 : vector<16x16xf32>
    %cst_119 = arith.constant 0.000000e+00 : f32
    %147 = vector.broadcast %cst_119 : f32 to vector<16x16xf32>
    %148 = arith.maximumf %146, %147 : vector<16x16xf32>
    %cst_120 = arith.constant dense<0.000000e+00> : vector<16x64xf32>
    %149 = tpu.matmul %148, %10, %cst_120 {dimension_numbers = #tpu.dot_dimension_numbers<[1], [0], [0], [1], [0, 0, 1, 1], [], []>, precision = #tpu.contract_precision<fp32>} : vector<16x16xf32>, vector<16x64xf32>, vector<16x64xf32> -> vector<16x64xf32>
    %cst_121 = arith.constant dense<0.000000e+00> : vector<64x64xf32>
    %150 = tpu.matmul %21, %149, %cst_121 {dimension_numbers = #tpu.dot_dimension_numbers<[1], [0], [0], [1], [0, 0, 1, 1], [], []>, precision = #tpu.contract_precision<fp32>} : vector<64x16xf32>, vector<16x64xf32>, vector<64x64xf32> -> vector<64x64xf32>
    %c0_122 = arith.constant 0 : index
    %c3_123 = arith.constant 3 : index
    %c0_124 = arith.constant 0 : index
    %c0_125 = arith.constant 0 : index
    %151 = vector.load %arg5[%c0_122, %c3_123, %c0_124, %c0_125] : memref<1x8x64x64xf32, #tpu.memory_space<vmem>>, vector<1x1x64x64xf32>
    %152 = vector.shape_cast %151 : vector<1x1x64x64xf32> to vector<64x64xf32>
    %153 = vector.shape_cast %150 : vector<64x64xf32> to vector<1x1x64x64xf32>
    tpu.vector_store %arg5[%c0_122, %c3_123, %c0_124, %c0_125], %153 {strides = array<i32>} : memref<1x8x64x64xf32, #tpu.memory_space<vmem>>, vector<1x1x64x64xf32>,
    %c0_126 = arith.constant 0 : index
    %c0_127 = arith.constant 0 : index
    %c0_128 = arith.constant 0 : index
    %c0_129 = arith.constant 0 : index
    %154 = vector.load %arg2[%c0_126, %c0_127, %c0_128, %c0_129] : memref<1x4x16x16xf32, #tpu.memory_space<vmem>>, vector<1x1x16x16xf32>
    %155 = vector.shape_cast %154 : vector<1x1x16x16xf32> to vector<16x16xf32>
    %c4 = arith.constant 4 : index
    %c0_130 = arith.constant 0 : index
    %156 = memref.load %arg3[%c4, %c0_130] : memref<8x4xf32, #tpu.memory_space<smem>>
    %157 = vector.broadcast %156 : f32 to vector<16x16xf32>
    %158 = arith.mulf %155, %157 : vector<16x16xf32>
    %c0_131 = arith.constant 0 : index
    %c1_132 = arith.constant 1 : index
    %c0_133 = arith.constant 0 : index
    %c0_134 = arith.constant 0 : index
    %159 = vector.load %arg2[%c0_131, %c1_132, %c0_133, %c0_134] : memref<1x4x16x16xf32, #tpu.memory_space<vmem>>, vector<1x1x16x16xf32>
    %160 = vector.shape_cast %159 : vector<1x1x16x16xf32> to vector<16x16xf32>
    %c4_135 = arith.constant 4 : index
    %c1_136 = arith.constant 1 : index
    %161 = memref.load %arg3[%c4_135, %c1_136] : memref<8x4xf32, #tpu.memory_space<smem>>
    %162 = vector.broadcast %161 : f32 to vector<16x16xf32>
    %163 = arith.mulf %160, %162 : vector<16x16xf32>
    %164 = arith.addf %158, %163 : vector<16x16xf32>
    %c0_137 = arith.constant 0 : index
    %c2_138 = arith.constant 2 : index
    %c0_139 = arith.constant 0 : index
    %c0_140 = arith.constant 0 : index
    %165 = vector.load %arg2[%c0_137, %c2_138, %c0_139, %c0_140] : memref<1x4x16x16xf32, #tpu.memory_space<vmem>>, vector<1x1x16x16xf32>
    %166 = vector.shape_cast %165 : vector<1x1x16x16xf32> to vector<16x16xf32>
    %c4_141 = arith.constant 4 : index
    %c2_142 = arith.constant 2 : index
    %167 = memref.load %arg3[%c4_141, %c2_142] : memref<8x4xf32, #tpu.memory_space<smem>>
    %168 = vector.broadcast %167 : f32 to vector<16x16xf32>
    %169 = arith.mulf %166, %168 : vector<16x16xf32>
    %170 = arith.addf %164, %169 : vector<16x16xf32>
    %c0_143 = arith.constant 0 : index
    %c3_144 = arith.constant 3 : index
    %c0_145 = arith.constant 0 : index
    %c0_146 = arith.constant 0 : index
    %171 = vector.load %arg2[%c0_143, %c3_144, %c0_145, %c0_146] : memref<1x4x16x16xf32, #tpu.memory_space<vmem>>, vector<1x1x16x16xf32>
    %172 = vector.shape_cast %171 : vector<1x1x16x16xf32> to vector<16x16xf32>
    %c4_147 = arith.constant 4 : index
    %c3_148 = arith.constant 3 : index
    %173 = memref.load %arg3[%c4_147, %c3_148] : memref<8x4xf32, #tpu.memory_space<smem>>
    %174 = vector.broadcast %173 : f32 to vector<16x16xf32>
    %175 = arith.mulf %172, %174 : vector<16x16xf32>
    %176 = arith.addf %170, %175 : vector<16x16xf32>
    %c4_149 = arith.constant 4 : index
    %177 = memref.load %arg4[%c4_149] : memref<8xf32, #tpu.memory_space<smem>>
    %178 = vector.broadcast %177 : f32 to vector<16x16xf32>
    %179 = arith.addf %176, %178 : vector<16x16xf32>
    %cst_150 = arith.constant 0.000000e+00 : f32
    %180 = vector.broadcast %cst_150 : f32 to vector<16x16xf32>
    %181 = arith.maximumf %179, %180 : vector<16x16xf32>
    %cst_151 = arith.constant dense<0.000000e+00> : vector<16x64xf32>
    %182 = tpu.matmul %181, %10, %cst_151 {dimension_numbers = #tpu.dot_dimension_numbers<[1], [0], [0], [1], [0, 0, 1, 1], [], []>, precision = #tpu.contract_precision<fp32>} : vector<16x16xf32>, vector<16x64xf32>, vector<16x64xf32> -> vector<16x64xf32>
    %cst_152 = arith.constant dense<0.000000e+00> : vector<64x64xf32>
    %183 = tpu.matmul %21, %182, %cst_152 {dimension_numbers = #tpu.dot_dimension_numbers<[1], [0], [0], [1], [0, 0, 1, 1], [], []>, precision = #tpu.contract_precision<fp32>} : vector<64x16xf32>, vector<16x64xf32>, vector<64x64xf32> -> vector<64x64xf32>
    %c0_153 = arith.constant 0 : index
    %c4_154 = arith.constant 4 : index
    %c0_155 = arith.constant 0 : index
    %c0_156 = arith.constant 0 : index
    %184 = vector.load %arg5[%c0_153, %c4_154, %c0_155, %c0_156] : memref<1x8x64x64xf32, #tpu.memory_space<vmem>>, vector<1x1x64x64xf32>
    %185 = vector.shape_cast %184 : vector<1x1x64x64xf32> to vector<64x64xf32>
    %186 = vector.shape_cast %183 : vector<64x64xf32> to vector<1x1x64x64xf32>
    tpu.vector_store %arg5[%c0_153, %c4_154, %c0_155, %c0_156], %186 {strides = array<i32>} : memref<1x8x64x64xf32, #tpu.memory_space<vmem>>, vector<1x1x64x64xf32>,
    %c0_157 = arith.constant 0 : index
    %c0_158 = arith.constant 0 : index
    %c0_159 = arith.constant 0 : index
    %c0_160 = arith.constant 0 : index
    %187 = vector.load %arg2[%c0_157, %c0_158, %c0_159, %c0_160] : memref<1x4x16x16xf32, #tpu.memory_space<vmem>>, vector<1x1x16x16xf32>
    %188 = vector.shape_cast %187 : vector<1x1x16x16xf32> to vector<16x16xf32>
    %c5 = arith.constant 5 : index
    %c0_161 = arith.constant 0 : index
    %189 = memref.load %arg3[%c5, %c0_161] : memref<8x4xf32, #tpu.memory_space<smem>>
    %190 = vector.broadcast %189 : f32 to vector<16x16xf32>
    %191 = arith.mulf %188, %190 : vector<16x16xf32>
    %c0_162 = arith.constant 0 : index
    %c1_163 = arith.constant 1 : index
    %c0_164 = arith.constant 0 : index
    %c0_165 = arith.constant 0 : index
    %192 = vector.load %arg2[%c0_162, %c1_163, %c0_164, %c0_165] : memref<1x4x16x16xf32, #tpu.memory_space<vmem>>, vector<1x1x16x16xf32>
    %193 = vector.shape_cast %192 : vector<1x1x16x16xf32> to vector<16x16xf32>
    %c5_166 = arith.constant 5 : index
    %c1_167 = arith.constant 1 : index
    %194 = memref.load %arg3[%c5_166, %c1_167] : memref<8x4xf32, #tpu.memory_space<smem>>
    %195 = vector.broadcast %194 : f32 to vector<16x16xf32>
    %196 = arith.mulf %193, %195 : vector<16x16xf32>
    %197 = arith.addf %191, %196 : vector<16x16xf32>
    %c0_168 = arith.constant 0 : index
    %c2_169 = arith.constant 2 : index
    %c0_170 = arith.constant 0 : index
    %c0_171 = arith.constant 0 : index
    %198 = vector.load %arg2[%c0_168, %c2_169, %c0_170, %c0_171] : memref<1x4x16x16xf32, #tpu.memory_space<vmem>>, vector<1x1x16x16xf32>
    %199 = vector.shape_cast %198 : vector<1x1x16x16xf32> to vector<16x16xf32>
    %c5_172 = arith.constant 5 : index
    %c2_173 = arith.constant 2 : index
    %200 = memref.load %arg3[%c5_172, %c2_173] : memref<8x4xf32, #tpu.memory_space<smem>>
    %201 = vector.broadcast %200 : f32 to vector<16x16xf32>
    %202 = arith.mulf %199, %201 : vector<16x16xf32>
    %203 = arith.addf %197, %202 : vector<16x16xf32>
    %c0_174 = arith.constant 0 : index
    %c3_175 = arith.constant 3 : index
    %c0_176 = arith.constant 0 : index
    %c0_177 = arith.constant 0 : index
    %204 = vector.load %arg2[%c0_174, %c3_175, %c0_176, %c0_177] : memref<1x4x16x16xf32, #tpu.memory_space<vmem>>, vector<1x1x16x16xf32>
    %205 = vector.shape_cast %204 : vector<1x1x16x16xf32> to vector<16x16xf32>
    %c5_178 = arith.constant 5 : index
    %c3_179 = arith.constant 3 : index
    %206 = memref.load %arg3[%c5_178, %c3_179] : memref<8x4xf32, #tpu.memory_space<smem>>
    %207 = vector.broadcast %206 : f32 to vector<16x16xf32>
    %208 = arith.mulf %205, %207 : vector<16x16xf32>
    %209 = arith.addf %203, %208 : vector<16x16xf32>
    %c5_180 = arith.constant 5 : index
    %210 = memref.load %arg4[%c5_180] : memref<8xf32, #tpu.memory_space<smem>>
    %211 = vector.broadcast %210 : f32 to vector<16x16xf32>
    %212 = arith.addf %209, %211 : vector<16x16xf32>
    %cst_181 = arith.constant 0.000000e+00 : f32
    %213 = vector.broadcast %cst_181 : f32 to vector<16x16xf32>
    %214 = arith.maximumf %212, %213 : vector<16x16xf32>
    %cst_182 = arith.constant dense<0.000000e+00> : vector<16x64xf32>
    %215 = tpu.matmul %214, %10, %cst_182 {dimension_numbers = #tpu.dot_dimension_numbers<[1], [0], [0], [1], [0, 0, 1, 1], [], []>, precision = #tpu.contract_precision<fp32>} : vector<16x16xf32>, vector<16x64xf32>, vector<16x64xf32> -> vector<16x64xf32>
    %cst_183 = arith.constant dense<0.000000e+00> : vector<64x64xf32>
    %216 = tpu.matmul %21, %215, %cst_183 {dimension_numbers = #tpu.dot_dimension_numbers<[1], [0], [0], [1], [0, 0, 1, 1], [], []>, precision = #tpu.contract_precision<fp32>} : vector<64x16xf32>, vector<16x64xf32>, vector<64x64xf32> -> vector<64x64xf32>
    %c0_184 = arith.constant 0 : index
    %c5_185 = arith.constant 5 : index
    %c0_186 = arith.constant 0 : index
    %c0_187 = arith.constant 0 : index
    %217 = vector.load %arg5[%c0_184, %c5_185, %c0_186, %c0_187] : memref<1x8x64x64xf32, #tpu.memory_space<vmem>>, vector<1x1x64x64xf32>
    %218 = vector.shape_cast %217 : vector<1x1x64x64xf32> to vector<64x64xf32>
    %219 = vector.shape_cast %216 : vector<64x64xf32> to vector<1x1x64x64xf32>
    tpu.vector_store %arg5[%c0_184, %c5_185, %c0_186, %c0_187], %219 {strides = array<i32>} : memref<1x8x64x64xf32, #tpu.memory_space<vmem>>, vector<1x1x64x64xf32>,
    %c0_188 = arith.constant 0 : index
    %c0_189 = arith.constant 0 : index
    %c0_190 = arith.constant 0 : index
    %c0_191 = arith.constant 0 : index
    %220 = vector.load %arg2[%c0_188, %c0_189, %c0_190, %c0_191] : memref<1x4x16x16xf32, #tpu.memory_space<vmem>>, vector<1x1x16x16xf32>
    %221 = vector.shape_cast %220 : vector<1x1x16x16xf32> to vector<16x16xf32>
    %c6 = arith.constant 6 : index
    %c0_192 = arith.constant 0 : index
    %222 = memref.load %arg3[%c6, %c0_192] : memref<8x4xf32, #tpu.memory_space<smem>>
    %223 = vector.broadcast %222 : f32 to vector<16x16xf32>
    %224 = arith.mulf %221, %223 : vector<16x16xf32>
    %c0_193 = arith.constant 0 : index
    %c1_194 = arith.constant 1 : index
    %c0_195 = arith.constant 0 : index
    %c0_196 = arith.constant 0 : index
    %225 = vector.load %arg2[%c0_193, %c1_194, %c0_195, %c0_196] : memref<1x4x16x16xf32, #tpu.memory_space<vmem>>, vector<1x1x16x16xf32>
    %226 = vector.shape_cast %225 : vector<1x1x16x16xf32> to vector<16x16xf32>
    %c6_197 = arith.constant 6 : index
    %c1_198 = arith.constant 1 : index
    %227 = memref.load %arg3[%c6_197, %c1_198] : memref<8x4xf32, #tpu.memory_space<smem>>
    %228 = vector.broadcast %227 : f32 to vector<16x16xf32>
    %229 = arith.mulf %226, %228 : vector<16x16xf32>
    %230 = arith.addf %224, %229 : vector<16x16xf32>
    %c0_199 = arith.constant 0 : index
    %c2_200 = arith.constant 2 : index
    %c0_201 = arith.constant 0 : index
    %c0_202 = arith.constant 0 : index
    %231 = vector.load %arg2[%c0_199, %c2_200, %c0_201, %c0_202] : memref<1x4x16x16xf32, #tpu.memory_space<vmem>>, vector<1x1x16x16xf32>
    %232 = vector.shape_cast %231 : vector<1x1x16x16xf32> to vector<16x16xf32>
    %c6_203 = arith.constant 6 : index
    %c2_204 = arith.constant 2 : index
    %233 = memref.load %arg3[%c6_203, %c2_204] : memref<8x4xf32, #tpu.memory_space<smem>>
    %234 = vector.broadcast %233 : f32 to vector<16x16xf32>
    %235 = arith.mulf %232, %234 : vector<16x16xf32>
    %236 = arith.addf %230, %235 : vector<16x16xf32>
    %c0_205 = arith.constant 0 : index
    %c3_206 = arith.constant 3 : index
    %c0_207 = arith.constant 0 : index
    %c0_208 = arith.constant 0 : index
    %237 = vector.load %arg2[%c0_205, %c3_206, %c0_207, %c0_208] : memref<1x4x16x16xf32, #tpu.memory_space<vmem>>, vector<1x1x16x16xf32>
    %238 = vector.shape_cast %237 : vector<1x1x16x16xf32> to vector<16x16xf32>
    %c6_209 = arith.constant 6 : index
    %c3_210 = arith.constant 3 : index
    %239 = memref.load %arg3[%c6_209, %c3_210] : memref<8x4xf32, #tpu.memory_space<smem>>
    %240 = vector.broadcast %239 : f32 to vector<16x16xf32>
    %241 = arith.mulf %238, %240 : vector<16x16xf32>
    %242 = arith.addf %236, %241 : vector<16x16xf32>
    %c6_211 = arith.constant 6 : index
    %243 = memref.load %arg4[%c6_211] : memref<8xf32, #tpu.memory_space<smem>>
    %244 = vector.broadcast %243 : f32 to vector<16x16xf32>
    %245 = arith.addf %242, %244 : vector<16x16xf32>
    %cst_212 = arith.constant 0.000000e+00 : f32
    %246 = vector.broadcast %cst_212 : f32 to vector<16x16xf32>
    %247 = arith.maximumf %245, %246 : vector<16x16xf32>
    %cst_213 = arith.constant dense<0.000000e+00> : vector<16x64xf32>
    %248 = tpu.matmul %247, %10, %cst_213 {dimension_numbers = #tpu.dot_dimension_numbers<[1], [0], [0], [1], [0, 0, 1, 1], [], []>, precision = #tpu.contract_precision<fp32>} : vector<16x16xf32>, vector<16x64xf32>, vector<16x64xf32> -> vector<16x64xf32>
    %cst_214 = arith.constant dense<0.000000e+00> : vector<64x64xf32>
    %249 = tpu.matmul %21, %248, %cst_214 {dimension_numbers = #tpu.dot_dimension_numbers<[1], [0], [0], [1], [0, 0, 1, 1], [], []>, precision = #tpu.contract_precision<fp32>} : vector<64x16xf32>, vector<16x64xf32>, vector<64x64xf32> -> vector<64x64xf32>
    %c0_215 = arith.constant 0 : index
    %c6_216 = arith.constant 6 : index
    %c0_217 = arith.constant 0 : index
    %c0_218 = arith.constant 0 : index
    %250 = vector.load %arg5[%c0_215, %c6_216, %c0_217, %c0_218] : memref<1x8x64x64xf32, #tpu.memory_space<vmem>>, vector<1x1x64x64xf32>
    %251 = vector.shape_cast %250 : vector<1x1x64x64xf32> to vector<64x64xf32>
    %252 = vector.shape_cast %249 : vector<64x64xf32> to vector<1x1x64x64xf32>
    tpu.vector_store %arg5[%c0_215, %c6_216, %c0_217, %c0_218], %252 {strides = array<i32>} : memref<1x8x64x64xf32, #tpu.memory_space<vmem>>, vector<1x1x64x64xf32>,
    %c0_219 = arith.constant 0 : index
    %c0_220 = arith.constant 0 : index
    %c0_221 = arith.constant 0 : index
    %c0_222 = arith.constant 0 : index
    %253 = vector.load %arg2[%c0_219, %c0_220, %c0_221, %c0_222] : memref<1x4x16x16xf32, #tpu.memory_space<vmem>>, vector<1x1x16x16xf32>
    %254 = vector.shape_cast %253 : vector<1x1x16x16xf32> to vector<16x16xf32>
    %c7 = arith.constant 7 : index
    %c0_223 = arith.constant 0 : index
    %255 = memref.load %arg3[%c7, %c0_223] : memref<8x4xf32, #tpu.memory_space<smem>>
    %256 = vector.broadcast %255 : f32 to vector<16x16xf32>
    %257 = arith.mulf %254, %256 : vector<16x16xf32>
    %c0_224 = arith.constant 0 : index
    %c1_225 = arith.constant 1 : index
    %c0_226 = arith.constant 0 : index
    %c0_227 = arith.constant 0 : index
    %258 = vector.load %arg2[%c0_224, %c1_225, %c0_226, %c0_227] : memref<1x4x16x16xf32, #tpu.memory_space<vmem>>, vector<1x1x16x16xf32>
    %259 = vector.shape_cast %258 : vector<1x1x16x16xf32> to vector<16x16xf32>
    %c7_228 = arith.constant 7 : index
    %c1_229 = arith.constant 1 : index
    %260 = memref.load %arg3[%c7_228, %c1_229] : memref<8x4xf32, #tpu.memory_space<smem>>
    %261 = vector.broadcast %260 : f32 to vector<16x16xf32>
    %262 = arith.mulf %259, %261 : vector<16x16xf32>
    %263 = arith.addf %257, %262 : vector<16x16xf32>
    %c0_230 = arith.constant 0 : index
    %c2_231 = arith.constant 2 : index
    %c0_232 = arith.constant 0 : index
    %c0_233 = arith.constant 0 : index
    %264 = vector.load %arg2[%c0_230, %c2_231, %c0_232, %c0_233] : memref<1x4x16x16xf32, #tpu.memory_space<vmem>>, vector<1x1x16x16xf32>
    %265 = vector.shape_cast %264 : vector<1x1x16x16xf32> to vector<16x16xf32>
    %c7_234 = arith.constant 7 : index
    %c2_235 = arith.constant 2 : index
    %266 = memref.load %arg3[%c7_234, %c2_235] : memref<8x4xf32, #tpu.memory_space<smem>>
    %267 = vector.broadcast %266 : f32 to vector<16x16xf32>
    %268 = arith.mulf %265, %267 : vector<16x16xf32>
    %269 = arith.addf %263, %268 : vector<16x16xf32>
    %c0_236 = arith.constant 0 : index
    %c3_237 = arith.constant 3 : index
    %c0_238 = arith.constant 0 : index
    %c0_239 = arith.constant 0 : index
    %270 = vector.load %arg2[%c0_236, %c3_237, %c0_238, %c0_239] : memref<1x4x16x16xf32, #tpu.memory_space<vmem>>, vector<1x1x16x16xf32>
    %271 = vector.shape_cast %270 : vector<1x1x16x16xf32> to vector<16x16xf32>
    %c7_240 = arith.constant 7 : index
    %c3_241 = arith.constant 3 : index
    %272 = memref.load %arg3[%c7_240, %c3_241] : memref<8x4xf32, #tpu.memory_space<smem>>
    %273 = vector.broadcast %272 : f32 to vector<16x16xf32>
    %274 = arith.mulf %271, %273 : vector<16x16xf32>
    %275 = arith.addf %269, %274 : vector<16x16xf32>
    %c7_242 = arith.constant 7 : index
    %276 = memref.load %arg4[%c7_242] : memref<8xf32, #tpu.memory_space<smem>>
    %277 = vector.broadcast %276 : f32 to vector<16x16xf32>
    %278 = arith.addf %275, %277 : vector<16x16xf32>
    %cst_243 = arith.constant 0.000000e+00 : f32
    %279 = vector.broadcast %cst_243 : f32 to vector<16x16xf32>
    %280 = arith.maximumf %278, %279 : vector<16x16xf32>
    %cst_244 = arith.constant dense<0.000000e+00> : vector<16x64xf32>
    %281 = tpu.matmul %280, %10, %cst_244 {dimension_numbers = #tpu.dot_dimension_numbers<[1], [0], [0], [1], [0, 0, 1, 1], [], []>, precision = #tpu.contract_precision<fp32>} : vector<16x16xf32>, vector<16x64xf32>, vector<16x64xf32> -> vector<16x64xf32>
    %cst_245 = arith.constant dense<0.000000e+00> : vector<64x64xf32>
    %282 = tpu.matmul %21, %281, %cst_245 {dimension_numbers = #tpu.dot_dimension_numbers<[1], [0], [0], [1], [0, 0, 1, 1], [], []>, precision = #tpu.contract_precision<fp32>} : vector<64x16xf32>, vector<16x64xf32>, vector<64x64xf32> -> vector<64x64xf32>
    %c0_246 = arith.constant 0 : index
    %c7_247 = arith.constant 7 : index
    %c0_248 = arith.constant 0 : index
    %c0_249 = arith.constant 0 : index
    %283 = vector.load %arg5[%c0_246, %c7_247, %c0_248, %c0_249] : memref<1x8x64x64xf32, #tpu.memory_space<vmem>>, vector<1x1x64x64xf32>
    %284 = vector.shape_cast %283 : vector<1x1x64x64xf32> to vector<64x64xf32>
    %285 = vector.shape_cast %282 : vector<64x64xf32> to vector<1x1x64x64xf32>
    tpu.vector_store %arg5[%c0_246, %c7_247, %c0_248, %c0_249], %285 {strides = array<i32>} : memref<1x8x64x64xf32, #tpu.memory_space<vmem>>, vector<1x1x64x64xf32>,
    return
  }
  func.func @transform_0(%arg0: i32, %arg1: i32) -> (i32, i32, i32, i32) {
    %c0_i32 = arith.constant 0 : i32
    %c0_i32_0 = arith.constant 0 : i32
    %c0_i32_1 = arith.constant 0 : i32
    return %arg0, %c0_i32, %arg1, %c0_i32_0 : i32, i32, i32, i32
  }
  func.func @transform_1(%arg0: i32, %arg1: i32) -> (i32, i32) {
    %c0_i32 = arith.constant 0 : i32
    %c0_i32_0 = arith.constant 0 : i32
    %c0_i32_1 = arith.constant 0 : i32
    return %c0_i32, %c0_i32_0 : i32, i32
  }
  func.func @transform_2(%arg0: i32, %arg1: i32) -> i32 {
    %c0_i32 = arith.constant 0 : i32
    %c0_i32_0 = arith.constant 0 : i32
    return %c0_i32 : i32
  }
  func.func @transform_3(%arg0: i32, %arg1: i32) -> (i32, i32, i32, i32) {
    %c0_i32 = arith.constant 0 : i32
    %c0_i32_0 = arith.constant 0 : i32
    %c0_i32_1 = arith.constant 0 : i32
    return %arg0, %c0_i32, %arg1, %c0_i32_0 : i32, i32, i32, i32
  }
}

</mosaic_0001>

<bundles_post_ra>
// kernel: tpu_custom_call.1
= control target key start
LH: loop header
LB: loop body
LE: loop exit
PB: predicated region body
PF: predicated region fallthrough
CT: control target
= control target key end

     0   :  { %8 = vsyncpa [#allocation3], 0  ;;  %s15988_s0 = inlined_call_operand.hbm [shape: f32[2,4,16,16], index: 0, kind: input, shape index: {}]   ;;  %s15989_s1 = inlined_call_operand.vmem [shape: f32[8,4], index: 1, kind: input, shape index: {}]   ;;  %s15990_s2 = inlined_call_operand.vmem [shape: f32[8], index: 2, kind: input, shape index: {}]   ;;  %s15991_s3 = inlined_call_operand.hbm [shape: f32[2,8,64,64], index: 3, kind: output, shape index: {}]  }
   0x1   :  { %10 = vsyncpa [#allocation3 + $0x1], 0 }
   0x2   :  { %11 = vsyncpa [#allocation5], 0 }
   0x3   :  { %12 = vsyncpa [#allocation8], 0 }
   0x4   :  { %13 = vsyncpa [#allocation4], 0 }
   0x5   :  { %15 = vsyncpa [#allocation4 + $0x1], 0  ;;  %s14206_s12 = smov 0   ;;  %s14208_s13 = smov 0  }
   0x6   :  { %s14210_s14 = smov 0   ;;  %s14212_s15 = smov 0  }
   0x7   :  { %s14214_s16 = smov 0   ;;  %s14216_s17 = smov 0  }
   0x8 LB: > { %s10960_s18 = sadd.s32 4294967295, %s14174_s17   ;;  %s10961_s19 = sadd.s32 4294967294, %s14174_s17   ;;  %s14174_s17 = sphi %s14216_s17, %s21_s17   ;;  %s14170_s16 = sphi %s14214_s16, %s16040_s16   ;;  %s14166_s15 = sphi %s14212_s15, %s16039_s15   ;;  %s14162_s14 = sphi %s14210_s14, %s16038_s14   ;;  %s14158_s13 = sphi %s14208_s13, %s16037_s13   ;;  %s14154_s12 = sphi %s14206_s12, %s16036_s12  }
   0x9   : > { %s42_s20 = sadd.s32 1, %s14162_s14  ;;  %p49_p0 = scmp.ne.s32.totalorder %s14162_s14, %s14158_s13 }
   0xa   : > { %p50_p1 = scmp.eq.s32.totalorder %s14174_s17, 0  ;;  %p55_p2 = scmp.ne.s32.totalorder %s14158_s13, %s14154_s12 }
   0xb   : > { %p14244_p3 = scmp.eq.s32.totalorder %s10960_s18, 0  ;;  %p123_p4 = scmp.eq.s32.totalorder %s10960_s18, 1 }
   0xc   : > { %p14248_p5 = por %p50_p1, %p49_p0  ;;  %p129_p6 = scmp.eq.s32.totalorder %s10961_s19, 1 }
   0xd   : > { %s16004_s21 = scalar_select %p14244_p3, 1, 0 }
   0xe   : > { %p14254_p7 = por %p14244_p3, %p55_p2  ;;  %p14258_p8 = por %p123_p4, %p49_p0 }
   0xf   : > { %p14262_p9 = por %p129_p6, %p55_p2  ;;  %p10962_p10 = scmp.ge.s32.totalorder %s14174_s17, 1 }
  0x10   : > { %s16006_s23 = scalar_select %p14254_p7, 1, 0 }
  0x11   : > { %s16007_s24 = scalar_select %p14258_p8, 1, 0 }
  0x12   : > { %s16008_s25 = scalar_select %p14262_p9, 1, 0 }
  0x13   : > { %p136_p11 = scmp.lt.s32.totalorder %s14174_s17, 3  ;;  %s149_s28 = sshll.u32 %s15989_s1, 4  ;;  %s150_s28 = int_to_ptr.vmem [resolvable:$true] %s149_s28 }
  0x14   : > { %p13964_p0 = scmp.lt.s32.totalorder %s14174_s17, 2  ;;  %s160_s5 = sshll.u32 %s15990_s2, 4  ;;  %s161_s5 = int_to_ptr.vmem [resolvable:$true] %s160_s5 }
  0x15   : > { %p14271_p12 = pnand %p10962_p10, %p136_p11  ;;  %s14024_s8 = scalar_lea.vmem %s150_s28, 128 }
  0x16   : > { %p14284_p2 = pnand %p13964_p0, %p14248_p5  ;;  %p14025_p6 = scmp.ne.s32.totalorder %s150_s28, %s14024_s8 }
  0x17   : > { %s16009_s29 = scalar_select %p14271_p12, 1, 0 }
  0x18   : > { %p13947_p1 = pneg %p14271_p12  ;;  %p14032_p9 = scmp.lt.s32.totalorder %s150_s28, %s150_s28 }
  0x19   : > { %s16010_s6 = scalar_select %p14284_p2, 1, 0 }
  0x1a   : > { %p14290_p4 = pnand %p13947_p1, %p14244_p3  ;;  %p14033_p8 = scmp.lt.s32.totalorder %s14024_s8, %s14024_s8 }
  0x1c   : > { %p14026_p10 = pneg %p14290_p4  ;;  %p14034_p7 = por %p14033_p8, %p14032_p9 }
  0x1e   : > { %p14027_p11 = pnand %p14026_p10, %p14025_p6 }
  0x20   : > { %p14028_p13 = pneg %p14027_p11 }
  0x22   : > { %p14035_p5 = pnand %p14034_p7, %p14028_p13 }
  0x24   : > { %14038 = shalt.err (!%p14035_p5)
}
  0x25   : > { %s14176_s9 = smov [#allocation6]   ;;  %s14039_s10 = scalar_lea.vmem %s161_s5, 16 }
  0x26   : > { %13950 = dma.vmem_to_smem (!%p14290_p4), %s150_s28, 128, %s14176_s9, [#allocation5]  }
  0x27   : > { %p14040_p0 = scmp.ne.s32.totalorder %s161_s5, %s14039_s10  ;;  %p14047_p12 = scmp.lt.s32.totalorder %s161_s5, %s161_s5 }
  0x28   : > { %p14048_p2 = scmp.lt.s32.totalorder %s14039_s10, %s14039_s10 }
  0x29   : > { %p14042_p1 = pnand %p14040_p0, %p14026_p10 }
  0x2a   : > { %p14049_p6 = por %p14048_p2, %p14047_p12 }
  0x2b   : > { %p14043_p3 = pneg %p14042_p1 }
  0x2d   : > { %p14050_p11 = pnand %p14049_p6, %p14043_p3 }
  0x2f   : > { %14053 = shalt.err (!%p14050_p11)
}
  0x30   : > { %s14177_s11 = smov [#allocation7]   ;;  %s33_s18 = sadd.s32 1, %s14170_s16 }
  0x31   : > { %13953 = dma.vmem_to_smem (!%p14290_p4), %s161_s5, 16, %s14177_s11, [#allocation8]  }
  0x32   : > { %s171_s19 = sand.u32 1, %s14162_s14   ;;  %p35_p7 = scmp.ge.s32.totalorder %s33_s18, 2 }
  0x33   : > { %s10966_s22 = sshll.u32 %s171_s19, 6  ;;  %s11371_s26 = sshll.u32 %s14170_s16, 10 }
  0x34   : > { %s16042_s18 = smov (%p35_p7, %s33_s18), 0  ;;  %s14308_s30 = scalar_lea.hbm %s15988_s0, %s11371_s26 }
  0x35   : > { %s37_s4 = ssub.s32 %s14170_s16, %s16042_s18  ;;  %s175_s5 = scalar_lea.vmem [#allocation2], %s10966_s22 }
  0x36   : > { %s184_s7 = sshll.u32 %s175_s5, 4  ;;  %p40_p3 = scmp.eq.s32.totalorder %s37_s4, 0  ;;  %s14312_s7 = int_to_ptr.vmem [resolvable:$true] %s184_s7 }
  0x37   : > { %s14319_s9 = scalar_lea.sflag [#allocation3], %s171_s19  ;;  %s14054_s10 = scalar_lea.hbm %s14308_s30, 1024 }
  0x38   : > { %s14317_s8 = scalar_select %p40_p3, %s14162_s14, %s42_s20  }
  0x39   : > { %p14055_p8 = scmp.ne.s32.totalorder %s14308_s30, %s14054_s10  ;;  %p16012_p9 = scmp.ne.s32.totalorder %s16010_s6, 0 }
  0x3a   : > { %s14059_s22 = scalar_lea.hbm %s15988_s0, 2048  ;;  %p14060_p4 = scmp.lt.u32.totalorder %s14308_s30, %s15988_s0 }
  0x3b   : > { %p14056_p12 = pneg %p16012_p9  ;;  %p14061_p10 = scmp.lt.u32.totalorder %s14059_s22, %s14054_s10 }
  0x3c   : > { %p14063_p0 = scmp.lt.u32.totalorder %s14054_s10, %s14308_s30 }
  0x3d   : > { %p14057_p13 = pnand %p14056_p12, %p14055_p8  ;;  %p14062_p5 = por %p14061_p10, %p14060_p4 }
  0x3f   : > { %p14058_p2 = pneg %p14057_p13  ;;  %p14064_p1 = por %p14063_p0, %p14062_p5 }
  0x41   : > { %p14065_p6 = pnand %p14064_p1, %p14058_p2 }
  0x43   : > { %14068 = shalt.err (!%p14065_p6)
}
  0x44   : > { %s14069_s20 = scalar_lea.vmem %s14312_s7, 1024  ;;  %s14178_s19 = smov [#allocation2]  }
  0x45   : > { %p14070_p11 = scmp.ne.s32.totalorder %s14312_s7, %s14069_s20  ;;  %s14074_s4 = sshll.u32 %s14178_s19, 4  ;;  %s14075_s4 = int_to_ptr.vmem [resolvable:$false] %s14074_s4 }
  0x46   : > { %s14076_s5 = scalar_lea.vmem %s14075_s4, 2048  ;;  %p14077_p8 = scmp.lt.s32.totalorder %s14312_s7, %s14075_s4 }
  0x47   : > { %p14072_p7 = pnand %p14070_p11, %p14056_p12  ;;  %p14078_p13 = scmp.lt.s32.totalorder %s14076_s5, %s14069_s20 }
  0x49   : > { %p14073_p3 = pneg %p14072_p7  ;;  %p14079_p4 = por %p14078_p13, %p14077_p8 }
  0x4b   : > { %p14080_p10 = pnand %p14079_p4, %p14073_p3 }
  0x4d   : > { %14083 = shalt.err (!%p14080_p10)
}
  0x4e   : > { %s14179_s10 = smov 128   ;;  %s14180_s11 = smov 8  }
  0x4f   : > { %13957 = dma.hbm_to_vmem [thread:$0]  (!%p16012_p9), %s14308_s30, 1024, %s14312_s7, %s14319_s9, %s14179_s10, %s14179_s10, %s14180_s11  }
  0x50   : > { %p16013_p12 = scmp.ne.s32.totalorder %s16009_s29, 0 }
  0x52   : > { %196 = sbr.rel (%p16013_p12) target bundleno = 1813 (0x715), region = 32 }
  0x59   : > { %s14350_s26 = sand.u32 1, %s14158_s13   ;;  %p16014_p2 = scmp.ne.s32.totalorder %s16006_s23, 0 }
  0x5a   : > { %s10970_s22 = sshll.u32 %s14350_s26, 6  ;;  %s199_s27 = scalar_lea.sflag [#allocation3], %s14350_s26 }
  0x5b   : > { %s14354_s28 = scalar_lea.vmem [#allocation2], %s10970_s22 }
  0x5c   : > { %14137 = dma.done.wait (%p16014_p2), %s199_s27, 1024  }
  0x5d   : > { %14139 = vsyncadd (%p16014_p2), %s199_s27, 4294966272  ;;  %p16015_p9 = scmp.ne.s32.totalorder %s16004_s21, 0 }
  0x5f   : > { %14141 = dma.done.wait (%p16015_p9), [#allocation5], 128  }
  0x60   : > { %14143 = vsyncadd (%p16015_p9), [#allocation5], 4294967168 }
  0x61   : > { %14145 = dma.done.wait (%p16015_p9), [#allocation8], 16  }
  0x62   : > { %14147 = vsyncadd (%p16015_p9), [#allocation8], 4294967280 }
  0x63   : > { %215 = sfence }
  0x64   : > { %v236_v0 = vlaneseq  ;;  %s305_s29 = sld [smem:[#allocation6]]  ;;  %s14368_s23 = sld [smem:[#allocation6 + $0x1]]  ;;  %v14383_v5 = vld [vmem:[%s14354_s28] sm:$0xff]  ;;  %v14386_v6 = vld [vmem:[%s14354_s28 + $0x8] sm:$0xff]  ;;  %v14395_v9 = vld [vmem:[%s14354_s28 + $0x10] sm:$0xff]  ;;  %v14181_v41 = vmov 0.0  }
  0x65   : > { %s14372_s6 = sld [smem:[#allocation6 + $0x2]]  ;;  %s14374_s30 = sld [smem:[#allocation6 + $0x3]]  ;;  %v14415_v18 = vld [vmem:[%s14354_s28 + $0x18] sm:$0xff]  ;;  %v14421_v22 = vld [vmem:[%s14354_s28 + $0x20] sm:$0xff]  ;;  %v14424_v23 = vld [vmem:[%s14354_s28 + $0x28] sm:$0xff]  ;;  %vm342_vm15 = vcmask 130048  }
  0x66   : > { %v237_v1 = vand.u32 127, %v236_v0  ;;  %v14370_v2 = vshrl.u32 %v236_v0, 7  ;;  %s14376_s7 = sld [smem:[#allocation7]]  ;;  %v14434_v28 = vld [vmem:[%s14354_s28 + $0x30] sm:$0xff]  ;;  %v14437_v29 = vld [vmem:[%s14354_s28 + $0x38] sm:$0xff]  ;;  %s14490_s9 = sld [smem:[#allocation6 + $0x81]] }
  0x67   : > { %v15998_v46 = vmov 1.0|1.0   ;;  %s14478_s21 = sld [smem:[#allocation6 + $0x80]]  ;;  %s14513_s20 = sld [smem:[#allocation6 + $0x82]] }
  0x68   : > { %v14379_v3 = vadd.s32 8, %v14370_v2  ;;  %v241_v4 = vmul.u32 4, %v14370_v2  ;;  %v14389_v7 = vadd.s32 16, %v14370_v2  ;;  %v14392_v8 = vadd.s32 24, %v14370_v2  ;;  %s14560_s19 = sld [smem:[#allocation6 + $0x83]]  ;;  %s11033_s4 = sld [smem:[#allocation7 + $0x1]] }
  0x69   : > { %v14398_v10 = vadd.s32 32, %v14370_v2  ;;  %v14401_v11 = vadd.s32 40, %v14370_v2  ;;  %v14404_v12 = vadd.s32 48, %v14370_v2  ;;  %v14407_v13 = vadd.s32 56, %v14370_v2  ;;  %s14804_s5 = sld [smem:[#allocation6 + $0x100]]  ;;  %s14806_s10 = sld [smem:[#allocation6 + $0x101]] }
  0x6a   : > { %v242_v14 = vmul.u32 4, %v14379_v3  ;;  %vm14410_vm0 = vcmp.ge.s32.totalorder %v237_v1, %v241_v4  ;;  %v245_v16 = vadd.s32 4, %v241_v4  ;;  %v306_v17 = vstv %s305_s29  ;;  %s14815_s11 = sld [smem:[#allocation6 + $0x102]]  ;;  %s14817_s22 = sld [smem:[#allocation6 + $0x180]] }
  0x6b   : > { %v307_v19 = vmul.f32 %v306_v17, %v14383_v5  ;;  %v308_v20 = vmul.f32 %v306_v17, %v14386_v6  ;;  %v313_v21 = vstv %s14368_s23  ;;  %v14426_v24 = vmul.u32 4, %v237_v1  ;;  %s14819_s27 = sld [smem:[#allocation6 + $0x181]]  ;;  %s14831_s29 = sld [smem:[#allocation6 + $0x103]] }
  0x6c   : > { %vm14428_vm1 = vcmp.ge.s32.totalorder %v237_v1, %v242_v14  ;;  %v246_v26 = vadd.s32 4, %v242_v14  ;;  %vm247_vm2 = vcmp.lt.s32.totalorder %v237_v1, %v245_v16  ;;  %v314_v27 = vmul.f32 %v14395_v9, %v313_v21  ;;  %s14833_s23 = sld [smem:[#allocation6 + $0x182]]  ;;  %p16033_p0 = scmp.ne.s32.totalorder %s16007_s24, 0 }
  0x6d   : > { %vm14441_vm3 = vmand %vm14410_vm0, %vm247_vm2  ;;  %v315_v31 = vmul.f32 %v14415_v18, %v313_v21  ;;  %v322_v32 = vstv %s14372_s6  ;;  %v331_v33 = vstv %s14374_s30  ;;  %v337_v34 = vstv %s14376_s7  ;;  %s14846_s6 = sld [smem:[#allocation6 + $0x183]]  ;;  %s14860_s30 = sld [smem:[#allocation7 + $0x2]] }
  0x6e   : > { %vm248_vm4 = vcmp.lt.s32.totalorder %v237_v1, %v246_v26  ;;  %v316_v35 = vadd.f32 %v314_v27, %v307_v19  ;;  %v323_v36 = vmul.f32 %v14421_v22, %v322_v32  ;;  %v324_v37 = vmul.f32 %v14424_v23, %v322_v32  ;;  %s14877_s7 = sld [smem:[#allocation7 + $0x3]] }
  0x6f   : > { %vm250_vm5 = vmand %vm14428_vm1, %vm248_vm4  ;;  %v317_v38 = vadd.f32 %v315_v31, %v308_v20  ;;  %v332_v39 = vmul.f32 %v14434_v28, %v331_v33  ;;  %v333_v40 = vmul.f32 %v14437_v29, %v331_v33  ;;  %v10974_v42 = vsel %vm14441_vm3, 1.0, %v14181_v41 }
  0x70   : > { %vm14460_vm6 = vmpackc.low %vm250_vm5, %vm14441_vm3  ;;  %v325_v44 = vadd.f32 %v323_v36, %v316_v35  ;;  %v10975_v45 = vsel %vm250_vm5, 1.0, %v14181_v41  ;;  %vm262_vm7 = vcmp.ge.s32.totalorder %v14370_v2, %v14426_v24  ;;  %vm263_vm8 = vcmp.ge.s32.totalorder %v14379_v3, %v14426_v24 }
  0x71   : > { %13150 = vmatprep.subr.msk.bf16.mxu0 %vm14460_vm6, %v15998_v46  ;;  %v326_v47 = vadd.f32 %v324_v37, %v317_v38  ;;  %vm264_vm9 = vcmp.ge.s32.totalorder %v14389_v7, %v14426_v24  ;;  %vm265_vm10 = vcmp.ge.s32.totalorder %v14392_v8, %v14426_v24  ;;  %v270_v50 = vadd.s32 4, %v14426_v24 }
  0x72   : > { %13152 = vmatpush3.bf16.msk.msra.mxu0 %vm14460_vm6, %v15998_v46  ;;  %v334_v48 = vadd.f32 %v332_v39, %v325_v44  ;;  %v14492_v52 = vsub.f32 %v10974_v42, %v10974_v42  ;;  %v14494_v53 = vsub.f32 %v10975_v45, %v10975_v45  ;;  %v1647_v1 = vstv %s14478_s21  ;;  %s10973_s21 = sshll.u32 %s14350_s26, 9 }
  0x73   : > { %v335_v49 = vadd.f32 %v333_v40, %v326_v47  ;;  %vm271_vm0 = vcmp.lt.s32.totalorder %v14370_v2, %v270_v50  ;;  %vm272_vm1 = vcmp.lt.s32.totalorder %v14379_v3, %v270_v50  ;;  %vm273_vm2 = vcmp.lt.s32.totalorder %v14389_v7, %v270_v50 }
  0x74   : > { %v338_v51 = vadd.f32 %v337_v34, %v334_v48  ;;  %vm274_vm3 = vcmp.lt.s32.totalorder %v14392_v8, %v270_v50  ;;  %vm275_vm4 = vcmp.lt.s32.totalorder %v14398_v10, %v270_v50  ;;  %vm276_vm5 = vcmp.lt.s32.totalorder %v14401_v11, %v270_v50  ;;  %vm279_vm14 = vmand %vm262_vm7, %vm271_vm0 }
  0x75   : > { %v339_v54 = vadd.f32 %v337_v34, %v335_v49  ;;  %vm277_vm13 = vcmp.lt.s32.totalorder %v14404_v12, %v270_v50  ;;  %vm278_vm12 = vcmp.lt.s32.totalorder %v14407_v13, %v270_v50  ;;  %vm280_vm11 = vmand %vm263_vm8, %vm272_vm1  ;;  %v14511_v57 = vsel %vm279_vm14, 1.0, %v14181_v41 }
  0x76   : > { %v340_v55 = vmax.f32 %v338_v51, 0.0  ;;  %vm281_vm7 = vmand %vm264_vm9, %vm273_vm2  ;;  %v14520_v59 = vsel %vm280_vm11, 1.0, %v14181_v41  ;;  %v439_v60 = vand.u32 4294901760, %v14492_v52  ;;  %v446_v61 = vand.u32 4294901760, %v14494_v53 }
  0x77   : > { %v341_v56 = vmax.f32 %v339_v54, 0.0  ;;  %vm282_vm8 = vmand %vm265_vm10, %vm274_vm3  ;;  %v14533_v0 = vsel %vm281_vm7, 1.0, %v14181_v41  ;;  %vm16024_vm9 = vcmp.ge.s32.totalorder %v14398_v10, %v14426_v24  ;;  %vm16025_vm10 = vcmp.ge.s32.totalorder %v14401_v11, %v14426_v24 }
  0x78   : > { %v344_v58 = vsel %vm342_vm15, %v340_v55, 0  ;;  %vm283_vm11 = vmand %vm16024_vm9, %vm275_vm4  ;;  %v14544_v3 = vsel %vm282_vm8, 1.0, %v14181_v41  ;;  %v440_v4 = vsub.f32 %v14492_v52, %v439_v60  ;;  %v447_v7 = vsub.f32 %v14494_v53, %v446_v61 }
  0x79   : > { %v14524_v62 = vand.u32 4294901760, %v344_v58  ;;  %v347_v63 = vsel %vm342_vm15, %v341_v56, 0  ;;  %vm284_vm14 = vmand %vm16025_vm10, %vm276_vm5  ;;  %v14557_v10 = vsel %vm283_vm11, 1.0, %v14181_v41  ;;  %v1653_v14 = vstv %s14490_s9  ;;  %s15035_s9 = scalar_lea.vmem [#allocation9], %s10973_s21  ;;  %s15494_s21 = sld [smem:[#allocation6 + $0x381]] }
  0x7a   : > { %v14536_v2 = vand.u32 4294901760, %v347_v63  ;;  %vm16026_vm0 = vcmp.ge.s32.totalorder %v14404_v12, %v14426_v24  ;;  %v14569_v16 = vsel %vm284_vm14, 1.0, %v14181_v41  ;;  %v441_v11 = vand.u32 4294901760, %v440_v4 }
  0x7b   : > { %v417_v8 = vsub.f32 %v344_v58, %v14524_v62  ;;  %vm285_vm1 = vmand %vm16026_vm0, %vm277_vm13  ;;  %v448_v17 = vand.u32 4294901760, %v447_v7  ;;  %vm16027_vm2 = vcmp.ge.s32.totalorder %v14407_v13, %v14426_v24  ;;  %v1648_v21 = vmul.f32 %v1647_v1, %v14383_v5 }
  0x7c   : > { %v427_v15 = vsub.f32 %v347_v63, %v14536_v2  ;;  %vm286_vm3 = vmand %vm16027_vm2, %vm278_vm12  ;;  %v14577_v20 = vsel %vm285_vm1, 1.0, %v14181_v41  ;;  %v1654_v27 = vmul.f32 %v14395_v9, %v1653_v14  ;;  %v1661_v31 = vstv %s14513_s20  ;;  %s15134_s20 = sld [smem:[#allocation6 + $0x200]] }
  0x7d   : > { %v418_v19 = vand.u32 4294901760, %v417_v8  ;;  %v14581_v12 = vsel %vm286_vm3, 1.0, %v14181_v41  ;;  %v14583_v26 = vpack.c.bf16 %v448_v17, %v441_v11  ;;  %v1649_v24 = vmul.f32 %v1647_v1, %v14386_v6 }
  0x7e   : > { %v428_v25 = vand.u32 4294901760, %v427_v15  ;;  %v1655_v33 = vmul.f32 %v14415_v18, %v1653_v14  ;;  %v14592_v35 = vpack.c.bf16 %v14494_v53, %v14492_v52  ;;  %v1656_v36 = vadd.f32 %v1654_v27, %v1648_v21 }
  0x7f   : > { %v419_v30 = vsub.f32 %v417_v8, %v418_v19  ;;  %13154 = vmatprep.subr.bf16.mxu0 %v14583_v26  ;;  %v1662_v37 = vmul.f32 %v14421_v22, %v1661_v31  ;;  %v1669_v38 = vstv %s14560_s19  ;;  %v1663_v40 = vmul.f32 %v14424_v23, %v1661_v31  ;;  %s15136_s19 = sld [smem:[#allocation6 + $0x201]] }
  0x80   : > { %v429_v32 = vsub.f32 %v427_v15, %v428_v25  ;;  %v1657_v39 = vadd.f32 %v1655_v33, %v1649_v24  ;;  %v1670_v42 = vmul.f32 %v14434_v28, %v1669_v38  ;;  %v1671_v45 = vmul.f32 %v14437_v29, %v1669_v38 }
  0x81   : > { %v420_v13 = vand.u32 4294901760, %v419_v30  ;;  %v1664_v41 = vadd.f32 %v1662_v37, %v1656_v36  ;;  %v1675_v48 = vstv %s11033_s4  ;;  %v14609_v53 = vpack.c.bf16 %v446_v61, %v439_v60  ;;  %s15144_s4 = sld [smem:[#allocation6 + $0x202]] }
  0x82   : > { %v430_v34 = vand.u32 4294901760, %v429_v32  ;;  %v1665_v44 = vadd.f32 %v1663_v40, %v1657_v39  ;;  %v855_v21 = vsel %vm342_vm15, %v14520_v59, 0  ;;  %v861_v31 = vsel %vm342_vm15, %v14544_v3, 0 }
  0x83   : > { %12049 = vmatprep.mubr.f32.mxu0 %v420_v13  ;;  %v1672_v47 = vadd.f32 %v1670_v42, %v1664_v41  ;;  %v14670_v27 = vsub.f32 %v855_v21, %v855_v21  ;;  %v864_v32 = vsel %vm342_vm15, %v14557_v10, 0  ;;  %v14681_v24 = vsub.f32 %v861_v31, %v861_v31 }
  0x84   : > { %12050 = vmatmul.mubr.f32.vlgmr.msra.gmra.mrb[0].mxu0 %v430_v34  ;;  %v1673_v49 = vadd.f32 %v1671_v45, %v1665_v44  ;;  %v14686_v34 = vsub.f32 %v864_v32, %v864_v32  ;;  %v867_v36 = vsel %vm342_vm15, %v14569_v16, 0  ;;  %v870_v38 = vsel %vm342_vm15, %v14577_v20, 0 }
  0x85   : > { %13156 = vmatpush3.bf16.msra.mxu0 %v14583_v26  ;;  %12056 = vmatprep.mubr.f32.mxu0 %v14524_v62  ;;  %v1676_v50 = vadd.f32 %v1675_v48, %v1672_v47  ;;  %v14679_v13 = vand.u32 4294901760, %v14670_v27  ;;  %v14695_v42 = vand.u32 4294901760, %v14681_v24  ;;  %v14699_v47 = vsub.f32 %v867_v36, %v867_v36 }
  0x86   : > { %13158 = vmatprep.subr.bf16.mxu0 %v14592_v35  ;;  %v1677_v51 = vadd.f32 %v1675_v48, %v1673_v49  ;;  %v14702_v49 = vand.u32 4294901760, %v14686_v34  ;;  %vm1635_vm12 = vcmask 523264  }
  0x87   : > { %v1678_v54 = vmax.f32 %v1676_v50, 0.0  ;;  %16029 = vst [vmem:[#allocation15_spill] sm:$0xff] %v14679_v13  ;;  %v955_v41 = vsub.f32 %v14670_v27, %v14679_v13  ;;  %v14704_v50 = vsub.f32 %v870_v38, %v870_v38 }
  0x88   : > { %v1679_v55 = vmax.f32 %v1677_v51, 0.0  ;;  %v873_v51 = vsel %vm342_vm15, %v14581_v12, 0 }
  0x89   : > { %v1681_v56 = vsel %vm342_vm15, %v1678_v54, 0 }
  0x8a   : > { %v1753_v58 = vand.u32 4294901760, %v1681_v56  ;;  %v1684_v63 = vsel %vm342_vm15, %v1679_v55, 0 }
  0x8b   : > { %v1763_v1 = vand.u32 4294901760, %v1684_v63 }
  0x8c   : > { %12057 = vmatmul.mubr.f32.vlgmr.msra.gmra.mrb[0].mxu0 %v14536_v2  ;;  %v1754_v52 = vsub.f32 %v1681_v56, %v1753_v58 }
  0x8d   : > { %13160 = vmatpush3.bf16.msra.mxu0 %v14592_v35  ;;  %12063 = vmatprep.mubr.f32.mxu0 %v417_v8  ;;  %v1764_v60 = vsub.f32 %v1684_v63, %v1763_v1  ;;  %v975_v63 = vsub.f32 %v14681_v24, %v14695_v42 }
  0x8e   : > { %13162 = vmatprep.subr.msk.bf16.mxu0 %vm14460_vm6, %v15998_v46  ;;  %v1755_v61 = vand.u32 4294901760, %v1754_v52 }
  0x8f   : > { %v1765_v4 = vand.u32 4294901760, %v1764_v60  ;;  %v14729_v21 = vand.u32 4294901760, %v975_v63 }
  0x90   : > { %v1756_v7 = vsub.f32 %v1754_v52, %v1755_v61 }
  0x91   : > { %v1766_v8 = vsub.f32 %v1764_v60, %v1765_v4 }
  0x92   : > { %v1757_v14 = vand.u32 4294901760, %v1756_v7 }
  0x94   : > { %12064 = vmatmul.mubr.f32.vlgmr.msra.gmra.mrb[0].mxu0 %v427_v15  ;;  %v1767_v15 = vand.u32 4294901760, %v1766_v8  ;;  %v985_v8 = vsub.f32 %v14686_v34, %v14702_v49 }
  0x95   : > { %13164 = vmatpush3.bf16.msk.msra.mxu0 %vm14460_vm6, %v15998_v46  ;;  %12070 = vmatprep.mubr.f32.mxu0 %v418_v19 }
  0x96   : > { %13166 = vmatprep.subr.bf16.mxu0 %v14609_v53  ;;  %v14737_v36 = vand.u32 4294901760, %v985_v8 }
  0x9c   : > { %12071 = vmatmul.mubr.f32.vlgmr.msra.gmra.mrb[0].mxu0 %v428_v25  ;;  %v858_v25 = vsel %vm342_vm15, %v14533_v0, 0 }
  0x9d   : > { %13168 = vmatpush3.bf16.msra.mxu0 %v14609_v53  ;;  %12077 = vmatprep.mubr.f32.mxu0 %v14524_v62  ;;  %v14672_v30 = vsub.f32 %v858_v25, %v858_v25 }
  0x9e   : > { %13170 = vmatprep.subr.msk.bf16.mxu0 %vm14460_vm6, %v15998_v46 }
  0x9f   : > { %v14684_v33 = vand.u32 4294901760, %v14672_v30 }
  0xa1   : > { %v965_v45 = vsub.f32 %v14672_v30, %v14684_v33 }
  0xa3   : > { %v14721_v7 = vand.u32 4294901760, %v965_v45 }
  0xa4   : > { %12078 = vmatmul.mubr.f32.vlgmr.msra.gmra.mrb[0].mxu0 %v14536_v2 }
  0xa5   : > { %13172 = vmatpush3.bf16.msk.msra.mxu0 %vm14460_vm6, %v15998_v46  ;;  %12084 = vmatprep.mubr.f32.mxu0 %v14524_v62  ;;  %v852_v62 = vsel %vm342_vm15, %v14511_v57, 0 }
  0xa6   : > { %13198 = vmatprep.subr.msk.bf16.mxu0 %vm14460_vm6, %v15998_v46 }
  0xac   : > { %12085 = vmatmul.mubr.f32.vlgmr.msra.gmra.mrb[0].mxu0 %v14536_v2  ;;  %v14656_v2 = vsub.f32 %v852_v62, %v852_v62 }
  0xad   : > { %13200 = vmatpush3.bf16.msk.msra.mxu0 %vm14460_vm6, %v15998_v46  ;;  %12187 = vmatprep.mubr.f32.mxu0 %v1757_v14  ;;  %v14726_v14 = vand.u32 4294901760, %v14704_v50 }
  0xae   : > { %13202 = vmatprep.subr.bf16.mxu0 %v14583_v26  ;;  %v14659_v11 = vand.u32 4294901760, %v14656_v2 }
  0xb0   : > { %12188 = vmatmul.mubr.f32.vlgmr.msra.gmra.mrb[2].mxu0 %v1767_v15  ;;  %v945_v17 = vsub.f32 %v14656_v2, %v14659_v11 }
  0xb1   : > { %13204 = vmatpush3.bf16.msra.mxu0 %v14583_v26  ;;  %12194 = vmatprep.mubr.f32.mxu0 %v1753_v58 }
  0xb2   : > { %13206 = vmatprep.subr.bf16.mxu0 %v14592_v35  ;;  %v14663_v19 = vand.u32 4294901760, %v945_v17 }
  0xb4   : > { %16028 = vst [vmem:[#allocation14_spill] sm:$0xff] %v14663_v19  ;;  %12091 = vmatprep.mubr.f32.mxu1 %v14663_v19 }
  0xb8   : > { %12195 = vmatmul.mubr.f32.vlgmr.msra.gmra.mrb[2].mxu0 %v1763_v1 }
  0xb9   : > { %13208 = vmatpush3.bf16.msra.mxu0 %v14592_v35  ;;  %12201 = vmatprep.mubr.f32.mxu0 %v1754_v52 }
  0xba   : > { %13210 = vmatprep.subr.msk.bf16.mxu0 %vm14460_vm6, %v15998_v46 }
  0xc0   : > { %12202 = vmatmul.mubr.f32.vlgmr.msra.gmra.mrb[2].mxu0 %v1764_v60  ;;  %v14716_v60 = vand.u32 4294901760, %v14699_v47 }
  0xc1   : > { %13212 = vmatpush3.bf16.msk.msra.mxu0 %vm14460_vm6, %v15998_v46  ;;  %12208 = vmatprep.mubr.f32.mxu0 %v1755_v61  ;;  %v14718_v61 = vsub.f32 %v873_v51, %v873_v51 }
  0xc2   : > { %13214 = vmatprep.subr.bf16.mxu0 %v14609_v53  ;;  %v995_v31 = vsub.f32 %v14699_v47, %v14716_v60 }
  0xc3   : > { %v14734_v32 = vand.u32 4294901760, %v14718_v61 }
  0xc8   : > { %12209 = vmatmul.mubr.f32.vlgmr.msra.gmra.mrb[2].mxu0 %v1765_v4 }
  0xc9   : > { %13216 = vmatpush3.bf16.msra.mxu0 %v14609_v53  ;;  %12215 = vmatprep.mubr.f32.mxu0 %v1753_v58 }
  0xca   : > { %13218 = vmatprep.subr.msk.bf16.mxu0 %vm14460_vm6, %v15998_v46 }
  0xd0   : > { %12216 = vmatmul.mubr.f32.vlgmr.msra.gmra.mrb[2].mxu0 %v1763_v1 }
  0xd1   : > { %13220 = vmatpush3.bf16.msk.msra.mxu0 %vm14460_vm6, %v15998_v46  ;;  %12222 = vmatprep.mubr.f32.mxu0 %v1753_v58  ;;  %v14710_v58 = vand.u32 4294901760, %v955_v41 }
  0xd8   : > { %12223 = vmatmul.mubr.f32.vlgmr.msra.gmra.mrb[2].mxu0 %v1763_v1 }
  0xd9   : > { %12245 = vmatprep.mubr.msk.f32.mxu0 %vm342_vm15, %v14511_v57 }
 0x17f   : > { %v12086_v37 = vpop.f32.mrb[0].mxu0 }
 0x180   : > { %v879_v39 = vand.u32 4294901760, %v12086_v37  ;;  %v841_v40 = vpop.f32.mrb[1].mxu0 }
 0x181   : > { %v876_v44 = vand.u32 4294901760, %v841_v40 }
 0x182   : > { %v1031_v48 = vsub.f32 %v12086_v37, %v879_v39  ;;  %v1005_v37 = vsub.f32 %v14704_v50, %v14726_v14 }
 0x183   : > { %v14708_v54 = vpack.c.bf16 %v879_v39, %v876_v44  ;;  %v1024_v55 = vsub.f32 %v841_v40, %v876_v44  ;;  %v14742_v39 = vand.u32 4294901760, %v995_v31  ;;  %v1015_v40 = vsub.f32 %v14718_v61, %v14734_v32 }
 0x184   : > { %v1032_v56 = vand.u32 4294901760, %v1031_v48  ;;  %v14747_v41 = vand.u32 4294901760, %v1005_v37 }
 0x185   : > { %v1025_v1 = vand.u32 4294901760, %v1024_v55  ;;  %13174 = vmatprep.subr.bf16.mxu1 %v14708_v54  ;;  %v13181_v52 = vpack.c.bf16 %v1031_v48, %v1024_v55  ;;  %v14750_v44 = vand.u32 4294901760, %v1015_v40  ;;  %v2966_v40 = vstv %s14806_s10  ;;  %s15150_s10 = sld [smem:[#allocation6 + $0x281]] }
 0x186   : > { %v1033_v4 = vsub.f32 %v1031_v48, %v1032_v56  ;;  %13176 = vmatpush3.bf16.msra.mxu1 %v14708_v54 }
 0x187   : > { %v1026_v15 = vsub.f32 %v1024_v55, %v1025_v1  ;;  %v13189_v62 = vpack.c.bf16 %v1032_v56, %v1025_v1 }
 0x188   : > { %v1034_v17 = vand.u32 4294901760, %v1033_v4 }
 0x189   : > { %12092 = vmatmul.mubr.f32.vlgmr.msra.gmra.mrb[0].mxu1 %v14710_v58  ;;  %v1027_v25 = vand.u32 4294901760, %v1026_v15 }
 0x18a   : > { %12094 = vmatprep.mubr.f32.mxu1 %v14721_v7 }
 0x18b   : > { %v13177_v38 = vpack.c.bf16 %v1034_v17, %v1027_v25 }
 0x18d   : > { %12095 = vmatmul.mubr.f32.gmra.mrb[2].mxu1 %v14729_v21  ;;  %13178 = vmatprep.subr.bf16.mxu1 %v13177_v38 }
 0x18e   : > { %13180 = vmatpush3.bf16.msra.mxu1 %v13177_v38  ;;  %12097 = vmatprep.mubr.f32.mxu1 %v14737_v36 }
 0x18f   : > { %13182 = vmatprep.subr.bf16.mxu1 %v13181_v52 }
 0x191   : > { %12098 = vmatmul.mubr.f32.gmra.mrb[4].mxu1 %v14742_v39 }
 0x192   : > { %12100 = vmatprep.mubr.f32.mxu1 %v14747_v41 }
 0x195   : > { %12101 = vmatmul.mubr.f32.gmra.mrb[6].mxu1 %v14750_v44 }
 0x196   : > { %12107 = vmatprep.mubr.msk.f32.mxu1 %vm342_vm15, %v14511_v57 }
 0x199   : > { %12108 = vmatmul.mubr.msk.f32.vlgmr.msra.gmra.mrb[0].mxu1 %vm342_vm15, %v14520_v59 }
 0x19a   : > { %13184 = vmatpush3.bf16.msra.mxu1 %v13181_v52  ;;  %12110 = vmatprep.mubr.msk.f32.mxu1 %vm342_vm15, %v14533_v0 }
 0x19b   : > { %13186 = vmatprep.subr.bf16.mxu1 %v14708_v54 }
 0x19d   : > { %12111 = vmatmul.mubr.msk.f32.gmra.mrb[2].mxu1 %vm342_vm15, %v14544_v3 }
 0x19e   : > { %12113 = vmatprep.mubr.msk.f32.mxu1 %vm342_vm15, %v14557_v10 }
 0x1a1   : > { %12114 = vmatmul.mubr.msk.f32.gmra.mrb[4].mxu1 %vm342_vm15, %v14569_v16 }
 0x1a2   : > { %12116 = vmatprep.mubr.msk.f32.mxu1 %vm342_vm15, %v14577_v20 }
 0x1a5   : > { %12117 = vmatmul.mubr.msk.f32.gmra.mrb[6].mxu1 %vm342_vm15, %v14581_v12 }
 0x1a6   : > { %12123 = vmatprep.mubr.f32.mxu1 %v14656_v2 }
 0x1a9   : > { %12124 = vmatmul.mubr.f32.vlgmr.msra.gmra.mrb[0].mxu1 %v14670_v27 }
 0x1aa   : > { %13188 = vmatpush3.bf16.msra.mxu1 %v14708_v54  ;;  %12126 = vmatprep.mubr.f32.mxu1 %v14672_v30 }
 0x1ab   : > { %13190 = vmatprep.subr.bf16.mxu1 %v13189_v62  ;;  %v12224_v45 = vpop.f32.mrb[2].mxu0 }
 0x1ac   : > { %v2192_v48 = vand.u32 4294901760, %v12224_v45  ;;  %v2178_v51 = vpop.f32.mrb[3].mxu0 }
 0x1ad   : > { %v2189_v55 = vand.u32 4294901760, %v2178_v51  ;;  %12127 = vmatmul.mubr.f32.gmra.mrb[2].mxu1 %v14681_v24 }
 0x1ae   : > { %v2344_v56 = vsub.f32 %v12224_v45, %v2192_v48  ;;  %12129 = vmatprep.mubr.f32.mxu1 %v14686_v34  ;;  %v2967_v45 = vmul.f32 %v14395_v9, %v2966_v40 }
 0x1af   : > { %v14777_v63 = vpack.c.bf16 %v2192_v48, %v2189_v55  ;;  %v2337_v1 = vsub.f32 %v2178_v51, %v2189_v55  ;;  %v2974_v48 = vstv %s14815_s11  ;;  %v4273_v51 = vstv %s14817_s22  ;;  %s15163_s11 = sld [smem:[#allocation6 + $0x203]]  ;;  %s15166_s22 = sld [smem:[#allocation6 + $0x282]] }
 0x1b0   : > { %v2345_v52 = vand.u32 4294901760, %v2344_v56  ;;  %v4279_v55 = vstv %s14819_s27  ;;  %s15187_s27 = sld [smem:[#allocation6 + $0x283]] }
 0x1b1   : > { %v2338_v4 = vand.u32 4294901760, %v2337_v1  ;;  %12130 = vmatmul.mubr.f32.gmra.mrb[4].mxu1 %v14699_v47  ;;  %v13229_v8 = vpack.c.bf16 %v2344_v56, %v2337_v1 }
 0x1b2   : > { %v2346_v15 = vsub.f32 %v2344_v56, %v2345_v52  ;;  %12132 = vmatprep.mubr.f32.mxu1 %v14704_v50 }
 0x1b3   : > { %v2339_v17 = vsub.f32 %v2337_v1, %v2338_v4  ;;  %v14781_v25 = vpack.c.bf16 %v2345_v52, %v2338_v4  ;;  %v2968_v1 = vmul.f32 %v14415_v18, %v2966_v40  ;;  %v2975_v4 = vmul.f32 %v14421_v22, %v2974_v48 }
 0x1b4   : > { %v2347_v31 = vand.u32 4294901760, %v2346_v15  ;;  %v4280_v15 = vmul.f32 %v14395_v9, %v4279_v55  ;;  %v4275_v9 = vmul.f32 %v4273_v51, %v14386_v6  ;;  %v4281_v40 = vmul.f32 %v14415_v18, %v4279_v55 }
 0x1b5   : > { %v2340_v37 = vand.u32 4294901760, %v2339_v17  ;;  %12133 = vmatmul.mubr.f32.gmra.mrb[6].mxu1 %v14718_v61  ;;  %v2982_v17 = vstv %s14831_s29  ;;  %s15203_s29 = sld [smem:[#allocation7 + $0x4]] }
 0x1b6   : > { %12139 = vmatprep.mubr.f32.mxu1 %v14659_v11  ;;  %v2984_v18 = vmul.f32 %v14437_v29, %v2982_v17 }
 0x1b7   : > { %v14785_v38 = vpack.c.bf16 %v2347_v31, %v2340_v37  ;;  %v4287_v31 = vstv %s14833_s23  ;;  %s15224_s23 = sld [smem:[#allocation7 + $0x5]] }
 0x1b9   : > { %12140 = vmatmul.mubr.f32.vlgmr.msra.gmra.mrb[0].mxu1 %v14679_v13  ;;  %13226 = vmatprep.subr.bf16.mxu0 %v14785_v38 }
 0x1ba   : > { %13192 = vmatpush3.bf16.msra.mxu1 %v13189_v62  ;;  %13228 = vmatpush3.bf16.msra.mxu0 %v14785_v38  ;;  %v2960_v62 = vstv %s14804_s5  ;;  %s15148_s5 = sld [smem:[#allocation6 + $0x280]] }
 0x1bb   : > { %13194 = vmatprep.subr.bf16.mxu1 %v14708_v54  ;;  %13230 = vmatprep.subr.bf16.mxu0 %v13229_v8  ;;  %v2962_v56 = vmul.f32 %v2960_v62, %v14386_v6 }
 0x1bc   : > { %12142 = vmatprep.mubr.f32.mxu1 %v14684_v33 }
 0x1bd   : > { %12143 = vmatmul.mubr.f32.gmra.mrb[2].mxu1 %v14695_v42  ;;  %12246 = vmatmul.mubr.msk.f32.vlgmr.msra.gmra.mrb[4].mxu0 %vm342_vm15, %v14520_v59  ;;  %v2970_v37 = vadd.f32 %v2968_v1, %v2962_v56  ;;  %v4288_v56 = vmul.f32 %v14421_v22, %v4287_v31  ;;  %v4289_v22 = vmul.f32 %v14424_v23, %v4287_v31  ;;  %v4301_v31 = vstv %s14877_s7  ;;  %s15492_s7 = sld [smem:[#allocation6 + $0x380]] }
 0x1be   : > { %13232 = vmatpush3.bf16.msra.mxu0 %v13229_v8  ;;  %12145 = vmatprep.mubr.f32.mxu1 %v14702_v49  ;;  %v4274_v8 = vmul.f32 %v4273_v51, %v14383_v5 }
 0x1bf   : > { %13234 = vmatprep.subr.bf16.mxu0 %v14777_v63  ;;  %12248 = vmatprep.mubr.msk.f32.mxu0 %vm342_vm15, %v14533_v0 }
 0x1c1   : > { %12146 = vmatmul.mubr.f32.gmra.mrb[4].mxu1 %v14716_v60  ;;  %12249 = vmatmul.mubr.msk.f32.gmra.mrb[6].mxu0 %vm342_vm15, %v14544_v3 }
 0x1c2   : > { %12148 = vmatprep.mubr.f32.mxu1 %v14726_v14  ;;  %12261 = vmatprep.mubr.f32.mxu0 %v14656_v2 }
 0x1c5   : > { %12149 = vmatmul.mubr.f32.gmra.mrb[6].mxu1 %v14734_v32  ;;  %12262 = vmatmul.mubr.f32.vlgmr.msra.gmra.mrb[4].mxu0 %v14670_v27 }
 0x1c6   : > { %13236 = vmatpush3.bf16.msra.mxu0 %v14777_v63  ;;  %12155 = vmatprep.mubr.msk.f32.mxu1 %vm342_vm15, %v14511_v57 }
 0x1c7   : > { %13238 = vmatprep.subr.bf16.mxu0 %v14781_v25  ;;  %12264 = vmatprep.mubr.f32.mxu0 %v14672_v30 }
 0x1c9   : > { %12156 = vmatmul.mubr.msk.f32.vlgmr.msra.gmra.mrb[0].mxu1 %vm342_vm15, %v14520_v59  ;;  %12265 = vmatmul.mubr.f32.gmra.mrb[6].mxu0 %v14681_v24 }
 0x1ca   : > { %13196 = vmatpush3.bf16.msra.mxu1 %v14708_v54  ;;  %12158 = vmatprep.mubr.msk.f32.mxu1 %vm342_vm15, %v14533_v0  ;;  %v2961_v54 = vmul.f32 %v2960_v62, %v14383_v5  ;;  %v2976_v62 = vmul.f32 %v14424_v23, %v2974_v48  ;;  %v4295_v48 = vstv %s14846_s6  ;;  %s15480_s6 = sld [smem:[#allocation6 + $0x301]] }
 0x1cb   : > { %13222 = vmatprep.subr.bf16.mxu1 %v14777_v63  ;;  %12267 = vmatprep.mubr.f32.mxu0 %v14686_v34  ;;  %v4296_v1 = vmul.f32 %v14434_v28, %v4295_v48 }
 0x1cc   : > { %v2969_v52 = vadd.f32 %v2967_v45, %v2961_v54  ;;  %v2983_v54 = vmul.f32 %v14434_v28, %v2982_v17  ;;  %v4282_v45 = vadd.f32 %v4280_v15, %v4274_v8  ;;  %v2978_v6 = vadd.f32 %v2976_v62, %v2970_v37 }
 0x1cd   : > { %12159 = vmatmul.mubr.msk.f32.gmra.mrb[2].mxu1 %vm342_vm15, %v14544_v3  ;;  %12268 = vmatmul.mubr.f32.gmra.mrb[8].mxu0 %v14699_v47  ;;  %v4297_v8 = vmul.f32 %v14437_v29, %v4295_v48 }
 0x1ce   : > { %12161 = vmatprep.mubr.msk.f32.mxu1 %vm342_vm15, %v14557_v10  ;;  %12270 = vmatprep.mubr.f32.mxu0 %v14704_v50  ;;  %v2977_v5 = vadd.f32 %v2975_v4, %v2969_v52  ;;  %v4290_v55 = vadd.f32 %v4288_v56, %v4282_v45  ;;  %v2988_v52 = vstv %s14860_s30  ;;  %v2986_v23 = vadd.f32 %v2984_v18, %v2978_v6  ;;  %s15488_s30 = sld [smem:[#allocation6 + $0x302]] }
 0x1d0   : > { %v2985_v51 = vadd.f32 %v2983_v54, %v2977_v5  ;;  %v4298_v17 = vadd.f32 %v4296_v1, %v4290_v55  ;;  %v2990_v28 = vadd.f32 %v2988_v52, %v2986_v23 }
 0x1d1   : > { %12162 = vmatmul.mubr.msk.f32.gmra.mrb[4].mxu1 %vm342_vm15, %v14569_v16  ;;  %12271 = vmatmul.mubr.f32.gmra.mrb[10].mxu0 %v14718_v61 }
 0x1d2   : > { %12164 = vmatprep.mubr.msk.f32.mxu1 %vm342_vm15, %v14577_v20  ;;  %12277 = vmatprep.mubr.f32.mxu0 %v14659_v11  ;;  %v2989_v15 = vadd.f32 %v2988_v52, %v2985_v51  ;;  %v4302_v5 = vadd.f32 %v4301_v31, %v4298_v17  ;;  %v2992_v29 = vmax.f32 %v2990_v28, 0.0 }
 0x1d4   : > { %v2991_v62 = vmax.f32 %v2989_v15, 0.0  ;;  %v4304_v54 = vmax.f32 %v4302_v5, 0.0 }
 0x1d5   : > { %12165 = vmatmul.mubr.msk.f32.gmra.mrb[6].mxu1 %vm342_vm15, %v14581_v12  ;;  %12278 = vmatmul.mubr.f32.vlgmr.msra.gmra.mrb[4].mxu0 %v14679_v13 }
 0x1d6   : > { %13240 = vmatpush3.bf16.msra.mxu0 %v14781_v25  ;;  %12171 = vmatprep.mubr.msk.f32.mxu1 %vm342_vm15, %v14511_v57  ;;  %v4283_v25 = vadd.f32 %v4281_v40, %v4275_v9  ;;  %v2994_v40 = vsel %vm342_vm15, %v2991_v62, 0  ;;  %v4307_v48 = vsel %vm342_vm15, %v4304_v54, 0 }
 0x1d7   : > { %13242 = vmatprep.subr.bf16.mxu0 %v14777_v63  ;;  %12280 = vmatprep.mubr.f32.mxu0 %v14684_v33  ;;  %v14924_v45 = vand.u32 4294901760, %v2994_v40 }
 0x1d8   : > { %v4291_v4 = vadd.f32 %v4289_v22, %v4283_v25  ;;  %v14942_v25 = vand.u32 4294901760, %v4307_v48 }
 0x1d9   : > { %12172 = vmatmul.mubr.msk.f32.vlgmr.msra.gmra.mrb[0].mxu1 %vm342_vm15, %v14520_v59  ;;  %12281 = vmatmul.mubr.f32.gmra.mrb[6].mxu0 %v14695_v42  ;;  %v3067_v6 = vsub.f32 %v2994_v40, %v14924_v45 }
 0x1da   : > { %13224 = vmatpush3.bf16.msra.mxu1 %v14777_v63  ;;  %12174 = vmatprep.mubr.msk.f32.mxu1 %vm342_vm15, %v14533_v0  ;;  %v4299_v37 = vadd.f32 %v4297_v8, %v4291_v4  ;;  %v4380_v1 = vsub.f32 %v4307_v48, %v14942_v25 }
 0x1db   : > { %13533 = vmatprep.subr.bf16.mxu1 %v14785_v38  ;;  %12283 = vmatprep.mubr.f32.mxu0 %v14702_v49  ;;  %v3068_v55 = vand.u32 4294901760, %v3067_v6 }
 0x1dc   : > { %v4303_v9 = vadd.f32 %v4301_v31, %v4299_v37  ;;  %v4381_v8 = vand.u32 4294901760, %v4380_v1 }
 0x1dd   : > { %12175 = vmatmul.mubr.msk.f32.gmra.mrb[2].mxu1 %vm342_vm15, %v14544_v3  ;;  %12284 = vmatmul.mubr.f32.gmra.mrb[8].mxu0 %v14716_v60  ;;  %v3069_v4 = vsub.f32 %v3067_v6, %v3068_v55 }
 0x1de   : > { %12177 = vmatprep.mubr.msk.f32.mxu1 %vm342_vm15, %v14557_v10  ;;  %12286 = vmatprep.mubr.f32.mxu0 %v14726_v14  ;;  %v4305_v56 = vmax.f32 %v4303_v9, 0.0  ;;  %v4382_v28 = vsub.f32 %v4380_v1, %v4381_v8 }
 0x1df   : > { %v3070_v31 = vand.u32 4294901760, %v3069_v4 }
 0x1e0   : > { %v4310_v18 = vsel %vm342_vm15, %v4305_v56, 0  ;;  %v4383_v5 = vand.u32 4294901760, %v4382_v28 }
 0x1e1   : > { %12178 = vmatmul.mubr.msk.f32.gmra.mrb[4].mxu1 %vm342_vm15, %v14569_v16  ;;  %12287 = vmatmul.mubr.f32.gmra.mrb[10].mxu0 %v14734_v32  ;;  %v14948_v51 = vand.u32 4294901760, %v4310_v18 }
 0x1e2   : > { %12180 = vmatprep.mubr.msk.f32.mxu1 %vm342_vm15, %v14577_v20  ;;  %12293 = vmatprep.mubr.msk.f32.mxu0 %vm342_vm15, %v14511_v57 }
 0x1e3   : > { %v4390_v23 = vsub.f32 %v4310_v18, %v14948_v51 }
 0x1e5   : > { %12181 = vmatmul.mubr.msk.f32.gmra.mrb[6].mxu1 %vm342_vm15, %v14581_v12  ;;  %12294 = vmatmul.mubr.msk.f32.vlgmr.msra.gmra.mrb[4].mxu0 %vm342_vm15, %v14520_v59  ;;  %v4391_v17 = vand.u32 4294901760, %v4390_v23 }
 0x1e6   : > { %13244 = vmatpush3.bf16.msra.mxu0 %v14777_v63  ;;  %12229 = vmatprep.mubr.f32.mxu1 %v14663_v19  ;;  %v2997_v63 = vsel %vm342_vm15, %v2992_v29, 0 }
 0x1e7   : > { %12296 = vmatprep.mubr.msk.f32.mxu0 %vm342_vm15, %v14533_v0  ;;  %13294 = vmatprep.subr.msk.bf16.mxu0 %vm14460_vm6, %v15998_v46  ;;  %v4392_v62 = vsub.f32 %v4390_v23, %v4391_v17 }
 0x1e9   : > { %12230 = vmatmul.mubr.f32.vlgmr.msra.gmra.mrb[8].mxu1 %v14710_v58  ;;  %12297 = vmatmul.mubr.msk.f32.gmra.mrb[6].mxu0 %vm342_vm15, %v14544_v3  ;;  %v4393_v29 = vand.u32 4294901760, %v4392_v62 }
 0x1ea   : > { %13534 = vmatpush3.bf16.msra.mxu1 %v14785_v38  ;;  %12232 = vmatprep.mubr.f32.mxu1 %v14721_v7  ;;  %v14935_v38 = vand.u32 4294901760, %v2997_v63 }
 0x1eb   : > { %12299 = vmatprep.mubr.msk.f32.mxu0 %vm342_vm15, %v14557_v10  ;;  %13246 = vmatprep.subr.msk.bf16.mxu1 %vm14460_vm6, %v15998_v46 }
 0x1ec   : > { %v3077_v22 = vsub.f32 %v2997_v63, %v14935_v38 }
 0x1ed   : > { %12233 = vmatmul.mubr.f32.gmra.mrb[10].mxu1 %v14729_v21  ;;  %12300 = vmatmul.mubr.msk.f32.gmra.mrb[8].mxu0 %vm342_vm15, %v14569_v16 }
 0x1ee   : > { %12235 = vmatprep.mubr.f32.mxu1 %v14737_v36  ;;  %12302 = vmatprep.mubr.msk.f32.mxu0 %vm342_vm15, %v14577_v20  ;;  %v3078_v52 = vand.u32 4294901760, %v3077_v22 }
 0x1f0   : > { %v3079_v15 = vsub.f32 %v3077_v22, %v3078_v52 }
 0x1f1   : > { %12236 = vmatmul.mubr.f32.gmra.mrb[12].mxu1 %v14742_v39  ;;  %12303 = vmatmul.mubr.msk.f32.gmra.mrb[10].mxu0 %vm342_vm15, %v14581_v12 }
 0x1f2   : > { %12238 = vmatprep.mubr.f32.mxu1 %v14747_v41  ;;  %12309 = vmatprep.mubr.msk.f32.mxu0 %vm342_vm15, %v14511_v57  ;;  %v3080_v37 = vand.u32 4294901760, %v3079_v15 }
 0x1f5   : > { %12239 = vmatmul.mubr.f32.gmra.mrb[14].mxu1 %v14750_v44  ;;  %12310 = vmatmul.mubr.msk.f32.vlgmr.msra.gmra.mrb[4].mxu0 %vm342_vm15, %v14520_v59 }
 0x1f6   : > { %12251 = vmatprep.mubr.msk.f32.mxu1 %vm342_vm15, %v14557_v10  ;;  %12312 = vmatprep.mubr.msk.f32.mxu0 %vm342_vm15, %v14533_v0 }
 0x1f7   : > { %13296 = vmatpush3.bf16.msk.msra.mxu0 %vm14460_vm6, %v15998_v46 }
 0x1f8   : > { %13298 = vmatprep.subr.bf16.mxu0 %v14583_v26 }
 0x1f9   : > { %12252 = vmatmul.mubr.msk.f32.vlgmr.msra.gmra.mrb[12].mxu1 %vm342_vm15, %v14569_v16  ;;  %12313 = vmatmul.mubr.msk.f32.gmra.mrb[6].mxu0 %vm342_vm15, %v14544_v3 }
 0x1fa   : > { %12254 = vmatprep.mubr.msk.f32.mxu1 %vm342_vm15, %v14577_v20  ;;  %12315 = vmatprep.mubr.msk.f32.mxu0 %vm342_vm15, %v14557_v10 }
 0x1fb   : > { %13248 = vmatpush3.bf16.msk.msra.mxu1 %vm14460_vm6, %v15998_v46 }
 0x1fc   : > { %13250 = vmatprep.subr.bf16.mxu1 %v14583_v26 }
 0x1fd   : > { %12255 = vmatmul.mubr.msk.f32.gmra.mrb[14].mxu1 %vm342_vm15, %v14581_v12  ;;  %12316 = vmatmul.mubr.msk.f32.gmra.mrb[8].mxu0 %vm342_vm15, %v14569_v16 }
 0x1fe   : > { %12318 = vmatprep.mubr.msk.f32.mxu0 %vm342_vm15, %v14577_v20  ;;  %12325 = vmatprep.mubr.f32.mxu1 %v3070_v31 }
 0x201   : > { %12319 = vmatmul.mubr.msk.f32.gmra.mrb[10].mxu0 %vm342_vm15, %v14581_v12  ;;  %12326 = vmatmul.mubr.f32.vlgmr.msra.gmra.mrb[16].mxu1 %v3080_v37 }
 0x202   : > { %12463 = vmatprep.mubr.f32.mxu0 %v4383_v5  ;;  %13252 = vmatpush3.bf16.msra.mxu1 %v14583_v26 }
 0x203   : > { %12332 = vmatprep.mubr.f32.mxu1 %v14924_v45  ;;  %13254 = vmatprep.subr.bf16.mxu1 %v14592_v35 }
 0x205   : > { %12464 = vmatmul.mubr.f32.vlgmr.msra.gmra.mrb[12].mxu0 %v4393_v29 }
 0x206   : > { %13300 = vmatpush3.bf16.msra.mxu0 %v14583_v26  ;;  %12470 = vmatprep.mubr.f32.mxu0 %v14942_v25 }
 0x207   : > { %13302 = vmatprep.subr.bf16.mxu0 %v14592_v35 }
 0x209   : > { %12333 = vmatmul.mubr.f32.vlgmr.msra.gmra.mrb[16].mxu1 %v14935_v38 }
 0x20a   : > { %13256 = vmatpush3.bf16.msra.mxu1 %v14592_v35  ;;  %12339 = vmatprep.mubr.f32.mxu1 %v3067_v6 }
 0x20b   : > { %13258 = vmatprep.subr.msk.bf16.mxu1 %vm14460_vm6, %v15998_v46 }
 0x20d   : > { %12471 = vmatmul.mubr.f32.vlgmr.msra.gmra.mrb[12].mxu0 %v14948_v51 }
 0x20e   : > { %13304 = vmatpush3.bf16.msra.mxu0 %v14592_v35  ;;  %12477 = vmatprep.mubr.f32.mxu0 %v4380_v1 }
 0x20f   : > { %13306 = vmatprep.subr.msk.bf16.mxu0 %vm14460_vm6, %v15998_v46 }
 0x211   : > { %12340 = vmatmul.mubr.f32.vlgmr.msra.gmra.mrb[16].mxu1 %v3077_v22 }
 0x212   : > { %13260 = vmatpush3.bf16.msk.msra.mxu1 %vm14460_vm6, %v15998_v46  ;;  %12346 = vmatprep.mubr.f32.mxu1 %v3068_v55 }
 0x213   : > { %13262 = vmatprep.subr.bf16.mxu1 %v14609_v53 }
 0x215   : > { %12478 = vmatmul.mubr.f32.vlgmr.msra.gmra.mrb[12].mxu0 %v4390_v23 }
 0x216   : > { %13308 = vmatpush3.bf16.msk.msra.mxu0 %vm14460_vm6, %v15998_v46  ;;  %12484 = vmatprep.mubr.f32.mxu0 %v4381_v8 }
 0x217   : > { %13310 = vmatprep.subr.bf16.mxu0 %v14609_v53 }
 0x219   : > { %12347 = vmatmul.mubr.f32.vlgmr.msra.gmra.mrb[16].mxu1 %v3078_v52 }
 0x21a   : > { %13264 = vmatpush3.bf16.msra.mxu1 %v14609_v53  ;;  %12353 = vmatprep.mubr.f32.mxu1 %v14924_v45 }
 0x21b   : > { %13266 = vmatprep.subr.msk.bf16.mxu1 %vm14460_vm6, %v15998_v46 }
 0x21d   : > { %12485 = vmatmul.mubr.f32.vlgmr.msra.gmra.mrb[12].mxu0 %v4391_v17 }
 0x21e   : > { %13312 = vmatpush3.bf16.msra.mxu0 %v14609_v53  ;;  %12491 = vmatprep.mubr.f32.mxu0 %v14942_v25 }
 0x21f   : > { %13314 = vmatprep.subr.msk.bf16.mxu0 %vm14460_vm6, %v15998_v46 }
 0x221   : > { %12354 = vmatmul.mubr.f32.vlgmr.msra.gmra.mrb[16].mxu1 %v14935_v38 }
 0x222   : > { %13268 = vmatpush3.bf16.msk.msra.mxu1 %vm14460_vm6, %v15998_v46  ;;  %12360 = vmatprep.mubr.f32.mxu1 %v14924_v45 }
 0x225   : > { %12492 = vmatmul.mubr.f32.vlgmr.msra.gmra.mrb[12].mxu0 %v14948_v51 }
 0x226   : > { %13316 = vmatpush3.bf16.msk.msra.mxu0 %vm14460_vm6, %v15998_v46  ;;  %12498 = vmatprep.mubr.f32.mxu0 %v14942_v25 }
 0x229   : > { %12361 = vmatmul.mubr.f32.vlgmr.msra.gmra.mrb[16].mxu1 %v14935_v38 }
 0x22a   : > { %12367 = vmatprep.mubr.f32.mxu1 %v14663_v19 }
 0x22d   : > { %12499 = vmatmul.mubr.f32.vlgmr.msra.gmra.mrb[12].mxu0 %v14948_v51 }
 0x22e   : > { %12505 = vmatprep.mubr.f32.mxu0 %v14663_v19 }
 0x2ac   : > { %v12173_v9 = vpop.f32.mrb[0].mxu1 }
 0x2ad   : > { %1637 = vst.msk [vmem:[%s15035_s9 + $0x8] sm:$0xff] %vm1635_vm12, %v12173_v9  ;;  %v1589_v40 = vpop.f32.mrb[1].mxu1 }
 0x2ae   : > { %1636 = vst.msk [vmem:[%s15035_s9] sm:$0xff] %vm1635_vm12, %v1589_v40 }
 0x2b0   : > { %v12176_v54 = vpop.f32.mrb[2].mxu1 }
 0x2b1   : > { %1639 = vst.msk [vmem:[%s15035_s9 + $0x18] sm:$0xff] %vm1635_vm12, %v12176_v54  ;;  %v1601_v63 = vpop.f32.mrb[3].mxu1 }
 0x2b2   : > { %1638 = vst.msk [vmem:[%s15035_s9 + $0x10] sm:$0xff] %vm1635_vm12, %v1601_v63 }
 0x2b4   : > { %v12179_v45 = vpop.f32.mrb[4].mxu1 }
 0x2b5   : > { %1641 = vst.msk [vmem:[%s15035_s9 + $0x28] sm:$0xff] %vm1635_vm12, %v12179_v45  ;;  %v1613_v56 = vpop.f32.mrb[5].mxu1 }
 0x2b6   : > { %1640 = vst.msk [vmem:[%s15035_s9 + $0x20] sm:$0xff] %vm1635_vm12, %v1613_v56 }
 0x2b8   : > { %v12182_v48 = vpop.f32.mrb[6].mxu1 }
 0x2b9   : > { %1643 = vst.msk [vmem:[%s15035_s9 + $0x38] sm:$0xff] %vm1635_vm12, %v12182_v48  ;;  %v1625_v38 = vpop.f32.mrb[7].mxu1 }
 0x2ba   : > { %1642 = vst.msk [vmem:[%s15035_s9 + $0x30] sm:$0xff] %vm1635_vm12, %v1625_v38 }
 0x2bc   : > { %v12231_v6 = vpop.f32.mrb[8].mxu1 }
 0x2bd   : > { %v2261_v18 = vpop.f32.mrb[9].mxu1 }
 0x2c0   : > { %v12234_v25 = vpop.f32.mrb[10].mxu1 }
 0x2c1   : > { %v2281_v22 = vpop.f32.mrb[11].mxu1 }
 0x2c8   : > { %v12311_v51 = vpop.f32.mrb[4].mxu0 }
 0x2c9   : > { %v13535_v55 = vadd.f32 %v12311_v51, %v12231_v6  ;;  %v2902_v1 = vpop.f32.mrb[5].mxu0 }
 0x2ca   : > { %v13536_v52 = vadd.f32 %v2902_v1, %v2261_v18 }
 0x2cb   : > { %11065 = vst.msk [vmem:[%s15035_s9 + $0x48] sm:$0xff] %vm1635_vm12, %v13535_v55 }
 0x2cc   : > { %11064 = vst.msk [vmem:[%s15035_s9 + $0x40] sm:$0xff] %vm1635_vm12, %v13536_v52  ;;  %v12253_v23 = vpop.f32.mrb[12].mxu1  ;;  %v12314_v4 = vpop.f32.mrb[6].mxu0 }
 0x2cd   : > { %v13537_v8 = vadd.f32 %v12314_v4, %v12234_v25  ;;  %v2436_v15 = vpop.f32.mrb[13].mxu1  ;;  %v2914_v17 = vpop.f32.mrb[7].mxu0 }
 0x2ce   : > { %v13538_v31 = vadd.f32 %v2914_v17, %v2281_v22 }
 0x2cf   : > { %11067 = vst.msk [vmem:[%s15035_s9 + $0x58] sm:$0xff] %vm1635_vm12, %v13537_v8 }
 0x2d0   : > { %11066 = vst.msk [vmem:[%s15035_s9 + $0x50] sm:$0xff] %vm1635_vm12, %v13538_v31  ;;  %v12256_v28 = vpop.f32.mrb[14].mxu1  ;;  %v12317_v37 = vpop.f32.mrb[8].mxu0 }
 0x2d1   : > { %v13539_v62 = vadd.f32 %v12317_v37, %v12253_v23  ;;  %v2448_v5 = vpop.f32.mrb[15].mxu1  ;;  %v2926_v29 = vpop.f32.mrb[9].mxu0 }
 0x2d2   : > { %v13540_v9 = vadd.f32 %v2926_v29, %v2436_v15 }
 0x2d3   : > { %11069 = vst.msk [vmem:[%s15035_s9 + $0x68] sm:$0xff] %vm1635_vm12, %v13539_v62 }
 0x2d4   : > { %11068 = vst.msk [vmem:[%s15035_s9 + $0x60] sm:$0xff] %vm1635_vm12, %v13540_v9  ;;  %v12320_v40 = vpop.f32.mrb[10].mxu0 }
 0x2d5   : > { %v13541_v54 = vadd.f32 %v12320_v40, %v12256_v28  ;;  %v2938_v63 = vpop.f32.mrb[11].mxu0 }
 0x2d6   : > { %v13542_v45 = vadd.f32 %v2938_v63, %v2448_v5 }
 0x2d7   : > { %11071 = vst.msk [vmem:[%s15035_s9 + $0x78] sm:$0xff] %vm1635_vm12, %v13541_v54 }
 0x2d8   : > { %11070 = vst.msk [vmem:[%s15035_s9 + $0x70] sm:$0xff] %vm1635_vm12, %v13542_v45 }
 0x2fc   : > { %v12362_v56 = vpop.f32.mrb[16].mxu1 }
 0x2fd   : > { %v3505_v48 = vand.u32 4294901760, %v12362_v56  ;;  %v3491_v38 = vpop.f32.mrb[17].mxu1 }
 0x2fe   : > { %v3502_v6 = vand.u32 4294901760, %v3491_v38 }
 0x2ff   : > { %v3657_v18 = vsub.f32 %v12362_v56, %v3505_v48 }
 0x300   : > { %v15069_v25 = vpack.c.bf16 %v3505_v48, %v3502_v6  ;;  %v3650_v22 = vsub.f32 %v3491_v38, %v3502_v6  ;;  %v12500_v51 = vpop.f32.mrb[12].mxu0 }
 0x301   : > { %v3658_v55 = vand.u32 4294901760, %v3657_v18  ;;  %v4818_v1 = vand.u32 4294901760, %v12500_v51  ;;  %v4804_v52 = vpop.f32.mrb[13].mxu0 }
 0x302   : > { %v3651_v23 = vand.u32 4294901760, %v3650_v22  ;;  %v4815_v4 = vand.u32 4294901760, %v4804_v52  ;;  %13270 = vmatprep.subr.bf16.mxu1 %v15069_v25  ;;  %v13277_v8 = vpack.c.bf16 %v3657_v18, %v3650_v22 }
 0x303   : > { %v3659_v15 = vsub.f32 %v3657_v18, %v3658_v55  ;;  %v4970_v17 = vsub.f32 %v12500_v51, %v4818_v1  ;;  %13272 = vmatpush3.bf16.msra.mxu1 %v15069_v25  ;;  %v5586_v51 = vstv %s15134_s20  ;;  %s15500_s20 = sld [smem:[#allocation6 + $0x303]] }
 0x304   : > { %v3652_v31 = vsub.f32 %v3650_v22, %v3651_v23  ;;  %v15073_v28 = vpack.c.bf16 %v4818_v1, %v4815_v4  ;;  %v4963_v37 = vsub.f32 %v4804_v52, %v4815_v4  ;;  %v15075_v62 = vpack.c.bf16 %v3658_v55, %v3651_v23  ;;  %v15156_v22 = vld [vmem:[%s14354_s28] sm:$0xff]  ;;  %v15160_v55 = vld [vmem:[%s14354_s28 + $0x10] sm:$0xff]  ;;  %v15171_v52 = vld [vmem:[%s14354_s28 + $0x8] sm:$0xff] }
 0x305   : > { %v4971_v5 = vand.u32 4294901760, %v4970_v17  ;;  %v3660_v29 = vand.u32 4294901760, %v3659_v15  ;;  %v5592_v1 = vstv %s15136_s19  ;;  %v5587_v23 = vmul.f32 %v5586_v51, %v15156_v22  ;;  %v15180_v15 = vld [vmem:[%s14354_s28 + $0x20] sm:$0xff]  ;;  %s15503_s19 = sld [smem:[#allocation6 + $0x382]] }
 0x306   : > { %v4964_v9 = vand.u32 4294901760, %v4963_v37  ;;  %12368 = vmatmul.mubr.f32.vlgmr.msra.gmra.mrb[18].mxu1 %v14710_v58  ;;  %13318 = vmatprep.subr.bf16.mxu0 %v15073_v28  ;;  %v3653_v40 = vand.u32 4294901760, %v3652_v31  ;;  %v13325_v54 = vpack.c.bf16 %v4970_v17, %v4963_v37  ;;  %v5593_v4 = vmul.f32 %v15160_v55, %v5592_v1 }
 0x307   : > { %v4972_v63 = vsub.f32 %v4970_v17, %v4971_v5  ;;  %13320 = vmatpush3.bf16.msra.mxu0 %v15073_v28  ;;  %12370 = vmatprep.mubr.f32.mxu1 %v14721_v7  ;;  %v5600_v17 = vstv %s15144_s4  ;;  %v5588_v31 = vmul.f32 %v5586_v51, %v15171_v52  ;;  %s15515_s4 = sld [smem:[#allocation6 + $0x383]] }
 0x308   : > { %v4965_v45 = vsub.f32 %v4963_v37, %v4964_v9  ;;  %v13273_v56 = vpack.c.bf16 %v3660_v29, %v3653_v40  ;;  %v15081_v48 = vpack.c.bf16 %v4971_v5, %v4964_v9  ;;  %v6899_v37 = vstv %s15148_s5  ;;  %s15525_s5 = sld [smem:[#allocation7 + $0x6]] }
 0x309   : > { %v4973_v38 = vand.u32 4294901760, %v4972_v63  ;;  %v6905_v5 = vstv %s15150_s10  ;;  %v5595_v9 = vadd.f32 %v5593_v4, %v5587_v23  ;;  %v5601_v40 = vmul.f32 %v15180_v15, %v5600_v17  ;;  %v15200_v63 = vld [vmem:[%s14354_s28 + $0x30] sm:$0xff]  ;;  %s15543_s10 = sld [smem:[#allocation7 + $0x7]] }
 0x30a   : > { %12371 = vmatmul.mubr.f32.gmra.mrb[20].mxu1 %v14729_v21  ;;  %13274 = vmatprep.subr.bf16.mxu1 %v13273_v56  ;;  %v4966_v6 = vand.u32 4294901760, %v4965_v45  ;;  %v5608_v45 = vstv %s15163_s11  ;;  %v6901_v4 = vmul.f32 %v6899_v37, %v15171_v52  ;;  %s11372_s11 = sshll.u32 %s14166_s15, 13  ;;  %s10836_s15 = scalar_lea.sflag [#allocation4], %s14350_s26 }
 0x30b   : > { %12506 = vmatmul.mubr.f32.vlgmr.msra.gmra.mrb[14].mxu0 %v14710_v58  ;;  %13276 = vmatpush3.bf16.msra.mxu1 %v13273_v56  ;;  %v6906_v56 = vmul.f32 %v15160_v55, %v6905_v5  ;;  %v5603_v51 = vadd.f32 %v5601_v40, %v5595_v9  ;;  %v5609_v23 = vmul.f32 %v15200_v63, %v5608_v45  ;;  %v5614_v40 = vstv %s15203_s29 }
 0x30c   : > { %13278 = vmatprep.subr.bf16.mxu1 %v13277_v8  ;;  %12373 = vmatprep.mubr.f32.mxu1 %v14737_v36  ;;  %v13321_v18 = vpack.c.bf16 %v4973_v38, %v4966_v6  ;;  %v6913_v38 = vstv %s15166_s22  ;;  %s10851_s22 = sshll.u32 %s15035_s9, 4  ;;  %s15935_s22 = int_to_ptr.vmem [resolvable:$true] %s10851_s22 }
 0x30d   : > { %12508 = vmatprep.mubr.f32.mxu0 %v14721_v7 }
 0x30e   : > { %12374 = vmatmul.mubr.f32.gmra.mrb[22].mxu1 %v14742_v39  ;;  %13322 = vmatprep.subr.bf16.mxu0 %v13321_v18 }
 0x30f   : > { %12509 = vmatmul.mubr.f32.gmra.mrb[16].mxu0 %v14729_v21  ;;  %12376 = vmatprep.mubr.f32.mxu1 %v14747_v41 }
 0x310   : > { %13324 = vmatpush3.bf16.msra.mxu0 %v13321_v18  ;;  %12511 = vmatprep.mubr.f32.mxu0 %v14737_v36 }
 0x311   : > { %13326 = vmatprep.subr.bf16.mxu0 %v13325_v54 }
 0x312   : > { %12377 = vmatmul.mubr.f32.gmra.mrb[24].mxu1 %v14750_v44 }
 0x313   : > { %12512 = vmatmul.mubr.f32.gmra.mrb[18].mxu0 %v14742_v39  ;;  %12383 = vmatprep.mubr.msk.f32.mxu1 %vm342_vm15, %v14511_v57 }
 0x314   : > { %12514 = vmatprep.mubr.f32.mxu0 %v14747_v41 }
 0x316   : > { %12384 = vmatmul.mubr.msk.f32.vlgmr.msra.gmra.mrb[18].mxu1 %vm342_vm15, %v14520_v59 }
 0x317   : > { %13280 = vmatpush3.bf16.msra.mxu1 %v13277_v8  ;;  %12515 = vmatmul.mubr.f32.gmra.mrb[20].mxu0 %v14750_v44  ;;  %v15177_v8 = vld [vmem:[%s14354_s28 + $0x18] sm:$0xff] }
 0x318   : > { %13282 = vmatprep.subr.bf16.mxu1 %v15069_v25  ;;  %12386 = vmatprep.mubr.msk.f32.mxu1 %vm342_vm15, %v14533_v0  ;;  %v5594_v29 = vmul.f32 %v15177_v8, %v5592_v1  ;;  %v15215_v1 = vld [vmem:[%s14354_s28 + $0x38] sm:$0xff]  ;;  %v6907_v46 = vmul.f32 %v15177_v8, %v6905_v5  ;;  %v5611_v5 = vadd.f32 %v5609_v23, %v5603_v51 }
 0x319   : > { %12521 = vmatprep.mubr.msk.f32.mxu0 %vm342_vm15, %v14511_v57 }
 0x31a   : > { %12387 = vmatmul.mubr.msk.f32.gmra.mrb[20].mxu1 %vm342_vm15, %v14544_v3  ;;  %v5596_v6 = vadd.f32 %v5594_v29, %v5588_v31  ;;  %v6914_v31 = vmul.f32 %v15180_v15, %v6913_v38  ;;  %v6909_v29 = vadd.f32 %v6907_v46, %v6901_v4 }
 0x31b   : > { %12522 = vmatmul.mubr.msk.f32.vlgmr.msra.gmra.mrb[14].mxu0 %vm342_vm15, %v14520_v59  ;;  %12389 = vmatprep.mubr.msk.f32.mxu1 %vm342_vm15, %v14557_v10 }
 0x31c   : > { %13328 = vmatpush3.bf16.msra.mxu0 %v13325_v54  ;;  %12524 = vmatprep.mubr.msk.f32.mxu0 %vm342_vm15, %v14533_v0  ;;  %v15196_v54 = vld [vmem:[%s14354_s28 + $0x28] sm:$0xff]  ;;  %s11268_s28 = sld [smem:[#allocation6 + $0x300]] }
 0x31d   : > { %13330 = vmatprep.subr.bf16.mxu0 %v15073_v28  ;;  %v5602_v18 = vmul.f32 %v15196_v54, %v5600_v17  ;;  %v6921_v17 = vstv %s15187_s27  ;;  %v6915_v9 = vmul.f32 %v15196_v54, %v6913_v38 }
 0x31e   : > { %12390 = vmatmul.mubr.msk.f32.gmra.mrb[22].mxu1 %vm342_vm15, %v14569_v16  ;;  %v6923_v46 = vmul.f32 %v15215_v1, %v6921_v17 }
 0x31f   : > { %12525 = vmatmul.mubr.msk.f32.gmra.mrb[16].mxu0 %vm342_vm15, %v14544_v3  ;;  %12392 = vmatprep.mubr.msk.f32.mxu1 %vm342_vm15, %v14577_v20 }
 0x320   : > { %12527 = vmatprep.mubr.msk.f32.mxu0 %vm342_vm15, %v14557_v10 }
 0x322   : > { %12393 = vmatmul.mubr.msk.f32.gmra.mrb[24].mxu1 %vm342_vm15, %v14581_v12 }
 0x323   : > { %12528 = vmatmul.mubr.msk.f32.gmra.mrb[18].mxu0 %vm342_vm15, %v14569_v16  ;;  %12399 = vmatprep.mubr.f32.mxu1 %v14656_v2 }
 0x324   : > { %12530 = vmatprep.mubr.msk.f32.mxu0 %vm342_vm15, %v14577_v20 }
 0x326   : > { %12400 = vmatmul.mubr.f32.vlgmr.msra.gmra.mrb[18].mxu1 %v14670_v27 }
 0x327   : > { %13284 = vmatpush3.bf16.msra.mxu1 %v15069_v25  ;;  %12531 = vmatmul.mubr.msk.f32.gmra.mrb[20].mxu0 %vm342_vm15, %v14581_v12 }
 0x328   : > { %13286 = vmatprep.subr.bf16.mxu1 %v15075_v62  ;;  %12402 = vmatprep.mubr.f32.mxu1 %v14672_v30 }
 0x329   : > { %12537 = vmatprep.mubr.f32.mxu0 %v14656_v2 }
 0x32a   : > { %12403 = vmatmul.mubr.f32.gmra.mrb[20].mxu1 %v14681_v24 }
 0x32b   : > { %12538 = vmatmul.mubr.f32.vlgmr.msra.gmra.mrb[14].mxu0 %v14670_v27  ;;  %12405 = vmatprep.mubr.f32.mxu1 %v14686_v34 }
 0x32c   : > { %13332 = vmatpush3.bf16.msra.mxu0 %v15073_v28  ;;  %12540 = vmatprep.mubr.f32.mxu0 %v14672_v30 }
 0x32d   : > { %13334 = vmatprep.subr.bf16.mxu0 %v15081_v48 }
 0x32e   : > { %12406 = vmatmul.mubr.f32.gmra.mrb[22].mxu1 %v14699_v47 }
 0x32f   : > { %12541 = vmatmul.mubr.f32.gmra.mrb[16].mxu0 %v14681_v24  ;;  %12408 = vmatprep.mubr.f32.mxu1 %v14704_v50 }
 0x330   : > { %12543 = vmatprep.mubr.f32.mxu0 %v14686_v34 }
 0x332   : > { %12409 = vmatmul.mubr.f32.gmra.mrb[24].mxu1 %v14718_v61 }
 0x333   : > { %12544 = vmatmul.mubr.f32.gmra.mrb[18].mxu0 %v14699_v47  ;;  %12415 = vmatprep.mubr.f32.mxu1 %v14659_v11 }
 0x334   : > { %12546 = vmatprep.mubr.f32.mxu0 %v14704_v50 }
 0x336   : > { %12416 = vmatmul.mubr.f32.vlgmr.msra.gmra.mrb[18].mxu1 %v14679_v13 }
 0x337   : > { %13288 = vmatpush3.bf16.msra.mxu1 %v15075_v62  ;;  %12547 = vmatmul.mubr.f32.gmra.mrb[20].mxu0 %v14718_v61  ;;  %v6900_v62 = vmul.f32 %v6899_v37, %v15156_v22  ;;  %v5610_v37 = vmul.f32 %v15215_v1, %v5608_v45  ;;  %v5615_v45 = vadd.f32 %v5614_v40, %v5611_v5 }
 0x338   : > { %13290 = vmatprep.subr.bf16.mxu1 %v15069_v25  ;;  %12418 = vmatprep.mubr.f32.mxu1 %v14684_v33 }
 0x339   : > { %12553 = vmatprep.mubr.f32.mxu0 %v14659_v11  ;;  %v5617_v23 = vmax.f32 %v5615_v45, 0.0 }
 0x33a   : > { %12419 = vmatmul.mubr.f32.gmra.mrb[20].mxu1 %v14695_v42 }
 0x33b   : > { %12554 = vmatmul.mubr.f32.vlgmr.msra.gmra.mrb[14].mxu0 %v14679_v13  ;;  %12421 = vmatprep.mubr.f32.mxu1 %v14702_v49  ;;  %v6908_v13 = vadd.f32 %v6906_v56, %v6900_v62  ;;  %v6922_v56 = vmul.f32 %v15200_v63, %v6921_v17 }
 0x33c   : > { %13336 = vmatpush3.bf16.msra.mxu0 %v15081_v48  ;;  %12556 = vmatprep.mubr.f32.mxu0 %v14684_v33  ;;  %v5604_v48 = vadd.f32 %v5602_v18, %v5596_v6  ;;  %v6917_v18 = vadd.f32 %v6915_v9, %v6909_v29 }
 0x33d   : > { %13338 = vmatprep.subr.bf16.mxu0 %v15073_v28  ;;  %v6916_v62 = vadd.f32 %v6914_v31, %v6908_v13  ;;  %v6927_v13 = vstv %s15224_s23  ;;  %v16030_v31 = vmov 1.0|1.0   ;;  %s15933_s23 = scalar_lea.hbm %s15991_s3, %s11372_s11 }
 0x33e   : > { %12422 = vmatmul.mubr.f32.gmra.mrb[22].mxu1 %v14716_v60  ;;  %v5612_v6 = vadd.f32 %v5610_v37, %v5604_v48  ;;  %v6925_v4 = vadd.f32 %v6923_v46, %v6917_v18  ;;  %v5620_v48 = vsel %vm342_vm15, %v5617_v23, 0 }
 0x33f   : > { %12557 = vmatmul.mubr.f32.gmra.mrb[16].mxu0 %v14695_v42  ;;  %12424 = vmatprep.mubr.f32.mxu1 %v14726_v14  ;;  %v6924_v51 = vadd.f32 %v6922_v56, %v6916_v62  ;;  %v15271_v29 = vand.u32 4294901760, %v5620_v48 }
 0x340   : > { %12559 = vmatprep.mubr.f32.mxu0 %v14702_v49  ;;  %v5616_v38 = vadd.f32 %v5614_v40, %v5612_v6  ;;  %v6929_v37 = vadd.f32 %v6927_v13, %v6925_v4 }
 0x341   : > { %v6928_v17 = vadd.f32 %v6927_v13, %v6924_v51  ;;  %v5693_v56 = vsub.f32 %v5620_v48, %v15271_v29 }
 0x342   : > { %12425 = vmatmul.mubr.f32.gmra.mrb[24].mxu1 %v14734_v32  ;;  %v6931_v9 = vmax.f32 %v6929_v37, 0.0 }
 0x343   : > { %12560 = vmatmul.mubr.f32.gmra.mrb[18].mxu0 %v14716_v60  ;;  %12431 = vmatprep.mubr.msk.f32.mxu1 %vm342_vm15, %v14511_v57  ;;  %v6930_v5 = vmax.f32 %v6928_v17, 0.0  ;;  %v5694_v46 = vand.u32 4294901760, %v5693_v56 }
 0x344   : > { %12562 = vmatprep.mubr.f32.mxu0 %v14726_v14  ;;  %v6936_v6 = vsel %vm342_vm15, %v6931_v9, 0 }
 0x345   : > { %v6933_v40 = vsel %vm342_vm15, %v6930_v5, 0  ;;  %v15297_v51 = vand.u32 4294901760, %v6936_v6  ;;  %v5695_v23 = vsub.f32 %v5693_v56, %v5694_v46 }
 0x346   : > { %12432 = vmatmul.mubr.msk.f32.vlgmr.msra.gmra.mrb[18].mxu1 %vm342_vm15, %v14520_v59  ;;  %v15288_v45 = vand.u32 4294901760, %v6933_v40 }
 0x347   : > { %13292 = vmatpush3.bf16.msra.mxu1 %v15069_v25  ;;  %12563 = vmatmul.mubr.f32.gmra.mrb[20].mxu0 %v14734_v32  ;;  %v5618_v25 = vmax.f32 %v5616_v38, 0.0  ;;  %v7016_v4 = vsub.f32 %v6936_v6, %v15297_v51  ;;  %v5696_v48 = vand.u32 4294901760, %v5695_v23 }
 0x348   : > { %12434 = vmatprep.mubr.msk.f32.mxu1 %vm342_vm15, %v14533_v0  ;;  %12569 = vmatprep.mubr.msk.f32.mxu0 %vm342_vm15, %v14511_v57  ;;  %v7006_v13 = vsub.f32 %v6933_v40, %v15288_v45 }
 0x349   : > { %13342 = vmatprep.subr.msk.bf16.mxu1 %vm14460_vm6, %v16030_v31  ;;  %v7017_v37 = vand.u32 4294901760, %v7016_v4 }
 0x34a   : > { %12435 = vmatmul.mubr.msk.f32.gmra.mrb[20].mxu1 %vm342_vm15, %v14544_v3  ;;  %v7007_v17 = vand.u32 4294901760, %v7006_v13 }
 0x34b   : > { %12570 = vmatmul.mubr.msk.f32.vlgmr.msra.gmra.mrb[14].mxu0 %vm342_vm15, %v14520_v59  ;;  %12437 = vmatprep.mubr.msk.f32.mxu1 %vm342_vm15, %v14557_v10  ;;  %v7018_v9 = vsub.f32 %v7016_v4, %v7017_v37 }
 0x34c   : > { %13340 = vmatpush3.bf16.msra.mxu0 %v15073_v28  ;;  %12572 = vmatprep.mubr.msk.f32.mxu0 %vm342_vm15, %v14533_v0  ;;  %v5623_v28 = vsel %vm342_vm15, %v5618_v25, 0  ;;  %v7008_v5 = vsub.f32 %v7006_v13, %v7007_v17 }
 0x34d   : > { %13390 = vmatprep.subr.msk.bf16.mxu0 %vm14460_vm6, %v16030_v31  ;;  %v15278_v62 = vand.u32 4294901760, %v5623_v28  ;;  %v7019_v6 = vand.u32 4294901760, %v7018_v9 }
 0x34e   : > { %12438 = vmatmul.mubr.msk.f32.gmra.mrb[22].mxu1 %vm342_vm15, %v14569_v16  ;;  %v7009_v40 = vand.u32 4294901760, %v7008_v5 }
 0x34f   : > { %12573 = vmatmul.mubr.msk.f32.gmra.mrb[16].mxu0 %vm342_vm15, %v14544_v3  ;;  %12440 = vmatprep.mubr.msk.f32.mxu1 %vm342_vm15, %v14577_v20  ;;  %v5703_v18 = vsub.f32 %v5623_v28, %v15278_v62 }
 0x350   : > { %12575 = vmatprep.mubr.msk.f32.mxu0 %vm342_vm15, %v14557_v10 }
 0x351   : > { %v5704_v38 = vand.u32 4294901760, %v5703_v18 }
 0x352   : > { %12441 = vmatmul.mubr.msk.f32.gmra.mrb[24].mxu1 %vm342_vm15, %v14581_v12 }
 0x353   : > { %12576 = vmatmul.mubr.msk.f32.gmra.mrb[18].mxu0 %vm342_vm15, %v14569_v16  ;;  %12447 = vmatprep.mubr.msk.f32.mxu1 %vm342_vm15, %v14511_v57  ;;  %v5705_v25 = vsub.f32 %v5703_v18, %v5704_v38 }
 0x354   : > { %12578 = vmatprep.mubr.msk.f32.mxu0 %vm342_vm15, %v14577_v20 }
 0x355   : > { %v5706_v28 = vand.u32 4294901760, %v5705_v25 }
 0x356   : > { %12448 = vmatmul.mubr.msk.f32.vlgmr.msra.gmra.mrb[18].mxu1 %vm342_vm15, %v14520_v59 }
 0x357   : > { %12579 = vmatmul.mubr.msk.f32.gmra.mrb[20].mxu0 %vm342_vm15, %v14581_v12  ;;  %12450 = vmatprep.mubr.msk.f32.mxu1 %vm342_vm15, %v14533_v0 }
 0x358   : > { %12585 = vmatprep.mubr.msk.f32.mxu0 %vm342_vm15, %v14511_v57  ;;  %13344 = vmatpush3.bf16.msk.msra.mxu1 %vm14460_vm6, %v16030_v31 }
 0x359   : > { %13346 = vmatprep.subr.bf16.mxu1 %v14583_v26 }
 0x35a   : > { %12451 = vmatmul.mubr.msk.f32.gmra.mrb[20].mxu1 %vm342_vm15, %v14544_v3 }
 0x35b   : > { %12586 = vmatmul.mubr.msk.f32.vlgmr.msra.gmra.mrb[14].mxu0 %vm342_vm15, %v14520_v59  ;;  %12453 = vmatprep.mubr.msk.f32.mxu1 %vm342_vm15, %v14557_v10 }
 0x35c   : > { %12588 = vmatprep.mubr.msk.f32.mxu0 %vm342_vm15, %v14533_v0  ;;  %13392 = vmatpush3.bf16.msk.msra.mxu0 %vm14460_vm6, %v16030_v31 }
 0x35d   : > { %13394 = vmatprep.subr.bf16.mxu0 %v14583_v26 }
 0x35e   : > { %12454 = vmatmul.mubr.msk.f32.gmra.mrb[22].mxu1 %vm342_vm15, %v14569_v16 }
 0x35f   : > { %12589 = vmatmul.mubr.msk.f32.gmra.mrb[16].mxu0 %vm342_vm15, %v14544_v3  ;;  %12456 = vmatprep.mubr.msk.f32.mxu1 %vm342_vm15, %v14577_v20 }
 0x360   : > { %12591 = vmatprep.mubr.msk.f32.mxu0 %vm342_vm15, %v14557_v10 }
 0x362   : > { %12457 = vmatmul.mubr.msk.f32.gmra.mrb[24].mxu1 %vm342_vm15, %v14581_v12 }
 0x363   : > { %12592 = vmatmul.mubr.msk.f32.gmra.mrb[18].mxu0 %vm342_vm15, %v14569_v16  ;;  %12601 = vmatprep.mubr.f32.mxu1 %v5696_v48 }
 0x364   : > { %12594 = vmatprep.mubr.msk.f32.mxu0 %vm342_vm15, %v14577_v20 }
 0x366   : > { %12602 = vmatmul.mubr.f32.vlgmr.msra.gmra.mrb[26].mxu1 %v5706_v28 }
 0x367   : > { %12595 = vmatmul.mubr.msk.f32.gmra.mrb[20].mxu0 %vm342_vm15, %v14581_v12  ;;  %13348 = vmatpush3.bf16.msra.mxu1 %v14583_v26 }
 0x368   : > { %12739 = vmatprep.mubr.f32.mxu0 %v7009_v40  ;;  %12608 = vmatprep.mubr.f32.mxu1 %v15271_v29 }
 0x369   : > { %13350 = vmatprep.subr.bf16.mxu1 %v14592_v35 }
 0x36b   : > { %12740 = vmatmul.mubr.f32.vlgmr.msra.gmra.mrb[22].mxu0 %v7019_v6 }
 0x36c   : > { %13396 = vmatpush3.bf16.msra.mxu0 %v14583_v26  ;;  %12746 = vmatprep.mubr.f32.mxu0 %v15288_v45 }
 0x36d   : > { %13398 = vmatprep.subr.bf16.mxu0 %v14592_v35 }
 0x36e   : > { %12609 = vmatmul.mubr.f32.vlgmr.msra.gmra.mrb[26].mxu1 %v15278_v62 }
 0x36f   : > { %13352 = vmatpush3.bf16.msra.mxu1 %v14592_v35  ;;  %12615 = vmatprep.mubr.f32.mxu1 %v5693_v56 }
 0x370   : > { %13354 = vmatprep.subr.msk.bf16.mxu1 %vm14460_vm6, %v16030_v31 }
 0x373   : > { %12747 = vmatmul.mubr.f32.vlgmr.msra.gmra.mrb[22].mxu0 %v15297_v51 }
 0x374   : > { %13400 = vmatpush3.bf16.msra.mxu0 %v14592_v35  ;;  %12753 = vmatprep.mubr.f32.mxu0 %v7006_v13 }
 0x375   : > { %13402 = vmatprep.subr.msk.bf16.mxu0 %vm14460_vm6, %v16030_v31 }
 0x376   : > { %12616 = vmatmul.mubr.f32.vlgmr.msra.gmra.mrb[26].mxu1 %v5703_v18 }
 0x377   : > { %13356 = vmatpush3.bf16.msk.msra.mxu1 %vm14460_vm6, %v16030_v31  ;;  %12622 = vmatprep.mubr.f32.mxu1 %v5694_v46 }
 0x378   : > { %13358 = vmatprep.subr.bf16.mxu1 %v14609_v53 }
 0x37b   : > { %12754 = vmatmul.mubr.f32.vlgmr.msra.gmra.mrb[22].mxu0 %v7016_v4 }
 0x37c   : > { %13404 = vmatpush3.bf16.msk.msra.mxu0 %vm14460_vm6, %v16030_v31  ;;  %12760 = vmatprep.mubr.f32.mxu0 %v7007_v17 }
 0x37d   : > { %13406 = vmatprep.subr.bf16.mxu0 %v14609_v53 }
 0x37e   : > { %12623 = vmatmul.mubr.f32.vlgmr.msra.gmra.mrb[26].mxu1 %v5704_v38 }
 0x37f   : > { %13360 = vmatpush3.bf16.msra.mxu1 %v14609_v53  ;;  %12629 = vmatprep.mubr.f32.mxu1 %v15271_v29 }
 0x380   : > { %13362 = vmatprep.subr.msk.bf16.mxu1 %vm14460_vm6, %v16030_v31 }
 0x383   : > { %12761 = vmatmul.mubr.f32.vlgmr.msra.gmra.mrb[22].mxu0 %v7017_v37 }
 0x384   : > { %13408 = vmatpush3.bf16.msra.mxu0 %v14609_v53  ;;  %12767 = vmatprep.mubr.f32.mxu0 %v15288_v45 }
 0x385   : > { %13410 = vmatprep.subr.msk.bf16.mxu0 %vm14460_vm6, %v16030_v31 }
 0x386   : > { %12630 = vmatmul.mubr.f32.vlgmr.msra.gmra.mrb[26].mxu1 %v15278_v62 }
 0x387   : > { %13364 = vmatpush3.bf16.msk.msra.mxu1 %vm14460_vm6, %v16030_v31  ;;  %12636 = vmatprep.mubr.f32.mxu1 %v15271_v29 }
 0x38b   : > { %12768 = vmatmul.mubr.f32.vlgmr.msra.gmra.mrb[22].mxu0 %v15297_v51 }
 0x38c   : > { %13412 = vmatpush3.bf16.msk.msra.mxu0 %vm14460_vm6, %v16030_v31  ;;  %12774 = vmatprep.mubr.f32.mxu0 %v15288_v45 }
 0x38e   : > { %12637 = vmatmul.mubr.f32.vlgmr.msra.gmra.mrb[26].mxu1 %v15278_v62 }
 0x38f   : > { %12643 = vmatprep.mubr.f32.mxu1 %v14663_v19 }
 0x393   : > { %12775 = vmatmul.mubr.f32.vlgmr.msra.gmra.mrb[22].mxu0 %v15297_v51 }
 0x394   : > { %12781 = vmatprep.mubr.f32.mxu0 %v14663_v19 }
 0x429   : > { %v12449_v29 = vpop.f32.mrb[18].mxu1 }
 0x42a   : > { %11114 = vst.msk [vmem:[%s15035_s9 + $0x88] sm:$0xff] %vm1635_vm12, %v12449_v29  ;;  %v4215_v56 = vpop.f32.mrb[19].mxu1 }
 0x42b   : > { %11113 = vst.msk [vmem:[%s15035_s9 + $0x80] sm:$0xff] %vm1635_vm12, %v4215_v56 }
 0x42d   : > { %v12452_v45 = vpop.f32.mrb[20].mxu1 }
 0x42e   : > { %11116 = vst.msk [vmem:[%s15035_s9 + $0x98] sm:$0xff] %vm1635_vm12, %v12452_v45  ;;  %v12587_v62 = vpop.f32.mrb[14].mxu0  ;;  %v4227_v18 = vpop.f32.mrb[21].mxu1 }
 0x42f   : > { %11163 = vst.msk [vmem:[%s15035_s9 + $0xc8] sm:$0xff] %vm1635_vm12, %v12587_v62  ;;  %11115 = vst.msk [vmem:[%s15035_s9 + $0x90] sm:$0xff] %vm1635_vm12, %v4227_v18  ;;  %v5528_v46 = vpop.f32.mrb[15].mxu0 }
 0x430   : > { %11162 = vst.msk [vmem:[%s15035_s9 + $0xc0] sm:$0xff] %vm1635_vm12, %v5528_v46 }
 0x431   : > { %v12455_v51 = vpop.f32.mrb[22].mxu1 }
 0x432   : > { %11118 = vst.msk [vmem:[%s15035_s9 + $0xa8] sm:$0xff] %vm1635_vm12, %v12455_v51  ;;  %v12590_v13 = vpop.f32.mrb[16].mxu0  ;;  %v4239_v38 = vpop.f32.mrb[23].mxu1 }
 0x433   : > { %11165 = vst.msk [vmem:[%s15035_s9 + $0xd8] sm:$0xff] %vm1635_vm12, %v12590_v13  ;;  %11117 = vst.msk [vmem:[%s15035_s9 + $0xa0] sm:$0xff] %vm1635_vm12, %v4239_v38  ;;  %v5540_v23 = vpop.f32.mrb[17].mxu0 }
 0x434   : > { %11164 = vst.msk [vmem:[%s15035_s9 + $0xd0] sm:$0xff] %vm1635_vm12, %v5540_v23 }
 0x435   : > { %v12458_v4 = vpop.f32.mrb[24].mxu1 }
 0x436   : > { %11120 = vst.msk [vmem:[%s15035_s9 + $0xb8] sm:$0xff] %vm1635_vm12, %v12458_v4  ;;  %v12593_v17 = vpop.f32.mrb[18].mxu0  ;;  %v4251_v25 = vpop.f32.mrb[25].mxu1 }
 0x437   : > { %11167 = vst.msk [vmem:[%s15035_s9 + $0xe8] sm:$0xff] %vm1635_vm12, %v12593_v17  ;;  %11119 = vst.msk [vmem:[%s15035_s9 + $0xb0] sm:$0xff] %vm1635_vm12, %v4251_v25  ;;  %v5552_v48 = vpop.f32.mrb[19].mxu0 }
 0x438   : > { %11166 = vst.msk [vmem:[%s15035_s9 + $0xe0] sm:$0xff] %vm1635_vm12, %v5552_v48 }
 0x43a   : > { %v12596_v37 = vpop.f32.mrb[20].mxu0 }
 0x43b   : > { %11169 = vst.msk [vmem:[%s15035_s9 + $0xf8] sm:$0xff] %vm1635_vm12, %v12596_v37  ;;  %v5564_v5 = vpop.f32.mrb[21].mxu0 }
 0x43c   : > { %11168 = vst.msk [vmem:[%s15035_s9 + $0xf0] sm:$0xff] %vm1635_vm12, %v5564_v5 }
 0x461   : > { %v12638_v28 = vpop.f32.mrb[26].mxu1 }
 0x462   : > { %v6131_v9 = vand.u32 4294901760, %v12638_v28  ;;  %v6117_v40 = vpop.f32.mrb[27].mxu1 }
 0x463   : > { %v6128_v6 = vand.u32 4294901760, %v6117_v40 }
 0x464   : > { %v6283_v29 = vsub.f32 %v12638_v28, %v6131_v9 }
 0x465   : > { %v15415_v56 = vpack.c.bf16 %v6131_v9, %v6128_v6  ;;  %v6276_v45 = vsub.f32 %v6117_v40, %v6128_v6 }
 0x466   : > { %v6284_v62 = vand.u32 4294901760, %v6283_v29  ;;  %v12776_v18 = vpop.f32.mrb[22].mxu0 }
 0x467   : > { %v6277_v46 = vand.u32 4294901760, %v6276_v45  ;;  %v7444_v51 = vand.u32 4294901760, %v12776_v18  ;;  %v7430_v13 = vpop.f32.mrb[23].mxu0  ;;  %13366 = vmatprep.subr.bf16.mxu1 %v15415_v56  ;;  %v13373_v38 = vpack.c.bf16 %v6283_v29, %v6276_v45 }
 0x468   : > { %v6285_v23 = vsub.f32 %v6283_v29, %v6284_v62  ;;  %v7441_v4 = vand.u32 4294901760, %v7430_v13  ;;  %13368 = vmatpush3.bf16.msra.mxu1 %v15415_v56 }
 0x469   : > { %v6278_v17 = vsub.f32 %v6276_v45, %v6277_v46  ;;  %v7596_v25 = vsub.f32 %v12776_v18, %v7444_v51  ;;  %v15419_v48 = vpack.c.bf16 %v6284_v62, %v6277_v46 }
 0x46a   : > { %v15421_v37 = vpack.c.bf16 %v7444_v51, %v7441_v4  ;;  %v7589_v5 = vsub.f32 %v7430_v13, %v7441_v4  ;;  %v6286_v28 = vand.u32 4294901760, %v6285_v23 }
 0x46b   : > { %v7597_v9 = vand.u32 4294901760, %v7596_v25  ;;  %12644 = vmatmul.mubr.f32.vlgmr.msra.gmra.mrb[28].mxu1 %v14710_v58  ;;  %v6279_v40 = vand.u32 4294901760, %v6278_v17  ;;  %v8226_v17 = vstv %s15488_s30 }
 0x46c   : > { %v7590_v6 = vand.u32 4294901760, %v7589_v5  ;;  %13414 = vmatprep.subr.bf16.mxu0 %v15421_v37  ;;  %12646 = vmatprep.mubr.f32.mxu1 %v14721_v7  ;;  %v13421_v29 = vpack.c.bf16 %v7596_v25, %v7589_v5 }
 0x46d   : > { %v7598_v19 = vsub.f32 %v7596_v25, %v7597_v9  ;;  %13416 = vmatpush3.bf16.msra.mxu0 %v15421_v37  ;;  %v13369_v45 = vpack.c.bf16 %v6286_v28, %v6279_v40  ;;  %v16031_v25 = vld [vmem:[#allocation15_spill] sm:$0xff]  ;;  %v9525_v28 = vstv %s15492_s7 }
 0x46e   : > { %v7591_v62 = vsub.f32 %v7589_v5, %v7590_v6  ;;  %v15427_v18 = vpack.c.bf16 %v7597_v9, %v7590_v6  ;;  %v9531_v9 = vstv %s15494_s21 }
 0x46f   : > { %12647 = vmatmul.mubr.f32.gmra.mrb[30].mxu1 %v14729_v21  ;;  %13370 = vmatprep.subr.bf16.mxu1 %v13369_v45  ;;  %v7599_v46 = vand.u32 4294901760, %v7598_v19  ;;  %v8212_v19 = vstv %s11268_s28  ;;  %s14084_s28 = scalar_lea.vmem %s15935_s22, 8192 }
 0x470   : > { %12782 = vmatmul.mubr.f32.vlgmr.msra.gmra.mrb[24].mxu0 %v14710_v58  ;;  %13372 = vmatpush3.bf16.msra.mxu1 %v13369_v45  ;;  %v7592_v51 = vand.u32 4294901760, %v7591_v62  ;;  %v8213_v23 = vmul.f32 %v8212_v19, %v15156_v22  ;;  %v8214_v5 = vmul.f32 %v8212_v19, %v15171_v52  ;;  %v8234_v45 = vstv %s15500_s20  ;;  %p14085_p5 = scmp.ne.s32.totalorder %s15935_s22, %s14084_s28 }
 0x471   : > { %13374 = vmatprep.subr.bf16.mxu1 %v13373_v38  ;;  %12649 = vmatprep.mubr.f32.mxu1 %v14737_v36  ;;  %v9526_v62 = vmul.f32 %v9525_v28, %v15156_v22  ;;  %v8235_v22 = vmul.f32 %v15200_v63, %v8234_v45 }
 0x472   : > { %12784 = vmatprep.mubr.f32.mxu0 %v14721_v7  ;;  %v13417_v13 = vpack.c.bf16 %v7599_v46, %v7592_v51  ;;  %v9539_v46 = vstv %s15503_s19  ;;  %p14086_p1 = pnand %p14085_p5, %p16033_p0 }
 0x473   : > { %12650 = vmatmul.mubr.f32.gmra.mrb[32].mxu1 %v14742_v39 }
 0x474   : > { %12785 = vmatmul.mubr.f32.gmra.mrb[26].mxu0 %v14729_v21  ;;  %13418 = vmatprep.subr.bf16.mxu0 %v13417_v13  ;;  %p14087_p6 = pneg %p14086_p1 }
 0x475   : > { %13420 = vmatpush3.bf16.msra.mxu0 %v13417_v13  ;;  %12652 = vmatprep.mubr.f32.mxu1 %v14747_v41  ;;  %v8228_v13 = vmul.f32 %v15196_v54, %v8226_v17 }
 0x476   : > { %13422 = vmatprep.subr.bf16.mxu0 %v13421_v29  ;;  %12787 = vmatprep.mubr.f32.mxu0 %v14737_v36 }
 0x477   : > { %12653 = vmatmul.mubr.f32.gmra.mrb[34].mxu1 %v14750_v44 }
 0x478   : > { %12788 = vmatmul.mubr.f32.gmra.mrb[28].mxu0 %v14742_v39  ;;  %12659 = vmatprep.mubr.msk.f32.mxu1 %vm342_vm15, %v14511_v57 }
 0x479   : > { %12790 = vmatprep.mubr.f32.mxu0 %v14747_v41 }
 0x47b   : > { %12660 = vmatmul.mubr.msk.f32.vlgmr.msra.gmra.mrb[28].mxu1 %vm342_vm15, %v14520_v59 }
 0x47c   : > { %13376 = vmatpush3.bf16.msra.mxu1 %v13373_v38  ;;  %12791 = vmatmul.mubr.f32.gmra.mrb[30].mxu0 %v14750_v44  ;;  %v8218_v38 = vstv %s15480_s6  ;;  %s14183_s6 = smov [#allocation9]  }
 0x47d   : > { %13378 = vmatprep.subr.bf16.mxu1 %v15415_v56  ;;  %12662 = vmatprep.mubr.msk.f32.mxu1 %vm342_vm15, %v14533_v0  ;;  %v8219_v4 = vmul.f32 %v15160_v55, %v8218_v38  ;;  %v8220_v40 = vmul.f32 %v15177_v8, %v8218_v38  ;;  %v9533_v38 = vmul.f32 %v15177_v8, %v9531_v9  ;;  %s14088_s30 = sshll.u32 %s14183_s6, 4  ;;  %s14089_s30 = int_to_ptr.vmem [resolvable:$false] %s14088_s30 }
 0x47e   : > { %12797 = vmatprep.mubr.msk.f32.mxu0 %vm342_vm15, %v14511_v57  ;;  %s14090_s7 = scalar_lea.vmem %s14089_s30, 16384  ;;  %p14091_p11 = scmp.lt.s32.totalorder %s15935_s22, %s14089_s30 }
 0x47f   : > { %12663 = vmatmul.mubr.msk.f32.gmra.mrb[30].mxu1 %vm342_vm15, %v14544_v3  ;;  %v8221_v6 = vadd.f32 %v8219_v4, %v8213_v23  ;;  %v8222_v51 = vadd.f32 %v8220_v40, %v8214_v5  ;;  %v9540_v4 = vmul.f32 %v15180_v15, %v9539_v46  ;;  %p14092_p7 = scmp.lt.s32.totalorder %s14090_s7, %s14084_s28 }
 0x480   : > { %12798 = vmatmul.mubr.msk.f32.vlgmr.msra.gmra.mrb[24].mxu0 %vm342_vm15, %v14520_v59  ;;  %12665 = vmatprep.mubr.msk.f32.mxu1 %vm342_vm15, %v14557_v10 }
 0x481   : > { %13424 = vmatpush3.bf16.msra.mxu0 %v13421_v29  ;;  %12800 = vmatprep.mubr.msk.f32.mxu0 %vm342_vm15, %v14533_v0  ;;  %v8227_v29 = vmul.f32 %v15180_v15, %v8226_v17  ;;  %v9547_v17 = vstv %s15515_s4  ;;  %v8240_v15 = vstv %s15525_s5  ;;  %p14093_p3 = por %p14092_p7, %p14091_p11 }
 0x482   : > { %13426 = vmatprep.subr.bf16.mxu0 %v15421_v37  ;;  %v9548_v40 = vmul.f32 %v15200_v63, %v9547_v17 }
 0x483   : > { %12666 = vmatmul.mubr.msk.f32.gmra.mrb[32].mxu1 %vm342_vm15, %v14569_v16  ;;  %v8229_v19 = vadd.f32 %v8227_v29, %v8221_v6  ;;  %p14094_p8 = pnand %p14093_p3, %p14087_p6 }
 0x484   : > { %12801 = vmatmul.mubr.msk.f32.gmra.mrb[26].mxu0 %vm342_vm15, %v14544_v3  ;;  %12668 = vmatprep.mubr.msk.f32.mxu1 %vm342_vm15, %v14577_v20 }
 0x485   : > { %12803 = vmatprep.mubr.msk.f32.mxu0 %vm342_vm15, %v14557_v10  ;;  %v8237_v8 = vadd.f32 %v8235_v22, %v8229_v19 }
 0x487   : > { %12669 = vmatmul.mubr.msk.f32.gmra.mrb[34].mxu1 %vm342_vm15, %v14581_v12  ;;  %v8241_v29 = vadd.f32 %v8240_v15, %v8237_v8 }
 0x488   : > { %12804 = vmatmul.mubr.msk.f32.gmra.mrb[28].mxu0 %vm342_vm15, %v14569_v16  ;;  %12675 = vmatprep.mubr.f32.mxu1 %v14656_v2 }
 0x489   : > { %12806 = vmatprep.mubr.msk.f32.mxu0 %vm342_vm15, %v14577_v20 }
 0x48b   : > { %12676 = vmatmul.mubr.f32.vlgmr.msra.gmra.mrb[28].mxu1 %v14670_v27 }
 0x48c   : > { %13380 = vmatpush3.bf16.msra.mxu1 %v15415_v56  ;;  %12807 = vmatmul.mubr.msk.f32.gmra.mrb[30].mxu0 %vm342_vm15, %v14581_v12 }
 0x48d   : > { %13382 = vmatprep.subr.bf16.mxu1 %v15419_v48  ;;  %12678 = vmatprep.mubr.f32.mxu1 %v14672_v30 }
 0x48e   : > { %12813 = vmatprep.mubr.f32.mxu0 %v14656_v2 }
 0x48f   : > { %12679 = vmatmul.mubr.f32.gmra.mrb[30].mxu1 %v14681_v24 }
 0x490   : > { %12814 = vmatmul.mubr.f32.vlgmr.msra.gmra.mrb[24].mxu0 %v14670_v27  ;;  %12681 = vmatprep.mubr.f32.mxu1 %v14686_v34 }
 0x491   : > { %13428 = vmatpush3.bf16.msra.mxu0 %v15421_v37  ;;  %12816 = vmatprep.mubr.f32.mxu0 %v14672_v30 }
 0x492   : > { %13430 = vmatprep.subr.bf16.mxu0 %v15427_v18 }
 0x493   : > { %12682 = vmatmul.mubr.f32.gmra.mrb[32].mxu1 %v14699_v47 }
 0x494   : > { %12817 = vmatmul.mubr.f32.gmra.mrb[26].mxu0 %v14681_v24  ;;  %12684 = vmatprep.mubr.f32.mxu1 %v14704_v50 }
 0x495   : > { %12819 = vmatprep.mubr.f32.mxu0 %v14686_v34 }
 0x497   : > { %12685 = vmatmul.mubr.f32.gmra.mrb[34].mxu1 %v14718_v61 }
 0x498   : > { %12820 = vmatmul.mubr.f32.gmra.mrb[28].mxu0 %v14699_v47  ;;  %12691 = vmatprep.mubr.f32.mxu1 %v14659_v11 }
 0x499   : > { %12822 = vmatprep.mubr.f32.mxu0 %v14704_v50 }
 0x49b   : > { %12692 = vmatmul.mubr.f32.vlgmr.msra.gmra.mrb[28].mxu1 %v16031_v25 }
 0x49c   : > { %13384 = vmatpush3.bf16.msra.mxu1 %v15419_v48  ;;  %12823 = vmatmul.mubr.f32.gmra.mrb[30].mxu0 %v14718_v61  ;;  %v9532_v48 = vmul.f32 %v15160_v55, %v9531_v9  ;;  %v9527_v55 = vmul.f32 %v9525_v28, %v15171_v52  ;;  %v8236_v52 = vmul.f32 %v15215_v1, %v8234_v45 }
 0x49d   : > { %13386 = vmatprep.subr.bf16.mxu1 %v15415_v56  ;;  %12694 = vmatprep.mubr.f32.mxu1 %v14684_v33  ;;  %v9541_v28 = vmul.f32 %v15196_v54, %v9539_v46  ;;  %v9553_v54 = vstv %s15543_s10  ;;  %v8243_v46 = vmax.f32 %v8241_v29, 0.0 }
 0x49e   : > { %12829 = vmatprep.mubr.f32.mxu0 %v14659_v11  ;;  %v9534_v23 = vadd.f32 %v9532_v48, %v9526_v62  ;;  %v9535_v5 = vadd.f32 %v9533_v38, %v9527_v55  ;;  %v9549_v62 = vmul.f32 %v15215_v1, %v9547_v17 }
 0x49f   : > { %12695 = vmatmul.mubr.f32.gmra.mrb[30].mxu1 %v14695_v42 }
 0x4a0   : > { %12830 = vmatmul.mubr.f32.vlgmr.msra.gmra.mrb[24].mxu0 %v16031_v25  ;;  %12697 = vmatprep.mubr.f32.mxu1 %v14702_v49  ;;  %v9542_v9 = vadd.f32 %v9540_v4, %v9534_v23  ;;  %v9543_v45 = vadd.f32 %v9541_v28, %v9535_v5 }
 0x4a1   : > { %13432 = vmatpush3.bf16.msra.mxu0 %v15427_v18  ;;  %12832 = vmatprep.mubr.f32.mxu0 %v14684_v33  ;;  %v8230_v18 = vadd.f32 %v8228_v13, %v8222_v51  ;;  %v8246_v13 = vsel %vm342_vm15, %v8243_v46, 0 }
 0x4a2   : > { %13434 = vmatprep.subr.bf16.mxu0 %v15421_v37  ;;  %v9550_v48 = vadd.f32 %v9548_v40, %v9542_v9  ;;  %v9551_v51 = vadd.f32 %v9549_v62, %v9543_v45  ;;  %v15590_v55 = vand.u32 4294901760, %v8246_v13 }
 0x4a3   : > { %12698 = vmatmul.mubr.f32.gmra.mrb[32].mxu1 %v14716_v60  ;;  %v8238_v6 = vadd.f32 %v8236_v52, %v8230_v18 }
 0x4a4   : > { %12833 = vmatmul.mubr.f32.gmra.mrb[26].mxu0 %v14695_v42  ;;  %12700 = vmatprep.mubr.f32.mxu1 %v14726_v14  ;;  %v9554_v1 = vadd.f32 %v9553_v54, %v9550_v48  ;;  %v9555_v19 = vadd.f32 %v9553_v54, %v9551_v51  ;;  %v8319_v17 = vsub.f32 %v8246_v13, %v15590_v55 }
 0x4a5   : > { %12835 = vmatprep.mubr.f32.mxu0 %v14702_v49  ;;  %v8242_v63 = vadd.f32 %v8240_v15, %v8238_v6 }
 0x4a6   : > { %v9556_v22 = vmax.f32 %v9554_v1, 0.0  ;;  %v9557_v38 = vmax.f32 %v9555_v19, 0.0  ;;  %v8320_v5 = vand.u32 4294901760, %v8319_v17 }
 0x4a7   : > { %12701 = vmatmul.mubr.f32.gmra.mrb[34].mxu1 %v14734_v32 }
 0x4a8   : > { %12836 = vmatmul.mubr.f32.gmra.mrb[28].mxu0 %v14716_v60  ;;  %12707 = vmatprep.mubr.msk.f32.mxu1 %vm342_vm15, %v14511_v57  ;;  %v9559_v23 = vsel %vm342_vm15, %v9556_v22, 0  ;;  %v9562_v18 = vsel %vm342_vm15, %v9557_v38, 0  ;;  %v8321_v40 = vsub.f32 %v8319_v17, %v8320_v5 }
 0x4a9   : > { %12838 = vmatprep.mubr.f32.mxu0 %v14726_v14  ;;  %v15607_v52 = vand.u32 4294901760, %v9559_v23  ;;  %v15616_v28 = vand.u32 4294901760, %v9562_v18 }
 0x4aa   : > { %v8322_v62 = vand.u32 4294901760, %v8321_v40 }
 0x4ab   : > { %12708 = vmatmul.mubr.msk.f32.vlgmr.msra.gmra.mrb[28].mxu1 %vm342_vm15, %v14520_v59  ;;  %v9632_v15 = vsub.f32 %v9559_v23, %v15607_v52  ;;  %v9642_v6 = vsub.f32 %v9562_v18, %v15616_v28 }
 0x4ac   : > { %13388 = vmatpush3.bf16.msra.mxu1 %v15415_v56  ;;  %12839 = vmatmul.mubr.f32.gmra.mrb[30].mxu0 %v14734_v32  ;;  %v8244_v56 = vmax.f32 %v8242_v63, 0.0 }
 0x4ad   : > { %12710 = vmatprep.mubr.msk.f32.mxu1 %vm342_vm15, %v14533_v0  ;;  %12845 = vmatprep.mubr.msk.f32.mxu0 %vm342_vm15, %v14511_v57  ;;  %v9633_v29 = vand.u32 4294901760, %v9632_v15  ;;  %v9643_v48 = vand.u32 4294901760, %v9642_v6 }
 0x4ae   : > { %13438 = vmatprep.subr.msk.bf16.mxu1 %vm14460_vm6, %v16030_v31 }
 0x4af   : > { %12711 = vmatmul.mubr.msk.f32.gmra.mrb[30].mxu1 %vm342_vm15, %v14544_v3  ;;  %v9634_v54 = vsub.f32 %v9632_v15, %v9633_v29  ;;  %v9644_v46 = vsub.f32 %v9642_v6, %v9643_v48 }
 0x4b0   : > { %12846 = vmatmul.mubr.msk.f32.vlgmr.msra.gmra.mrb[24].mxu0 %vm342_vm15, %v14520_v59  ;;  %12713 = vmatprep.mubr.msk.f32.mxu1 %vm342_vm15, %v14557_v10 }
 0x4b1   : > { %13436 = vmatpush3.bf16.msra.mxu0 %v15421_v37  ;;  %12848 = vmatprep.mubr.msk.f32.mxu0 %vm342_vm15, %v14533_v0  ;;  %v8249_v37 = vsel %vm342_vm15, %v8244_v56, 0  ;;  %v9635_v51 = vand.u32 4294901760, %v9634_v54  ;;  %v9645_v1 = vand.u32 4294901760, %v9644_v46 }
 0x4b2   : > { %13486 = vmatprep.subr.msk.bf16.mxu0 %vm14460_vm6, %v16030_v31  ;;  %v15597_v4 = vand.u32 4294901760, %v8249_v37 }
 0x4b3   : > { %12714 = vmatmul.mubr.msk.f32.gmra.mrb[32].mxu1 %vm342_vm15, %v14569_v16 }
 0x4b4   : > { %12849 = vmatmul.mubr.msk.f32.gmra.mrb[26].mxu0 %vm342_vm15, %v14544_v3  ;;  %12716 = vmatprep.mubr.msk.f32.mxu1 %vm342_vm15, %v14577_v20  ;;  %v8329_v8 = vsub.f32 %v8249_v37, %v15597_v4 }
 0x4b5   : > { %12851 = vmatprep.mubr.msk.f32.mxu0 %vm342_vm15, %v14557_v10 }
 0x4b6   : > { %v8330_v9 = vand.u32 4294901760, %v8329_v8 }
 0x4b7   : > { %12717 = vmatmul.mubr.msk.f32.gmra.mrb[34].mxu1 %vm342_vm15, %v14581_v12 }
 0x4b8   : > { %12852 = vmatmul.mubr.msk.f32.gmra.mrb[28].mxu0 %vm342_vm15, %v14569_v16  ;;  %12723 = vmatprep.mubr.msk.f32.mxu1 %vm342_vm15, %v14511_v57  ;;  %v8331_v45 = vsub.f32 %v8329_v8, %v8330_v9 }
 0x4b9   : > { %12854 = vmatprep.mubr.msk.f32.mxu0 %vm342_vm15, %v14577_v20 }
 0x4ba   : > { %v8332_v63 = vand.u32 4294901760, %v8331_v45 }
 0x4bb   : > { %12724 = vmatmul.mubr.msk.f32.vlgmr.msra.gmra.mrb[28].mxu1 %vm342_vm15, %v14520_v59 }
 0x4bc   : > { %12855 = vmatmul.mubr.msk.f32.gmra.mrb[30].mxu0 %vm342_vm15, %v14581_v12  ;;  %12726 = vmatprep.mubr.msk.f32.mxu1 %vm342_vm15, %v14533_v0 }
 0x4bd   : > { %12861 = vmatprep.mubr.msk.f32.mxu0 %vm342_vm15, %v14511_v57  ;;  %13440 = vmatpush3.bf16.msk.msra.mxu1 %vm14460_vm6, %v16030_v31 }
 0x4be   : > { %13442 = vmatprep.subr.bf16.mxu1 %v14583_v26 }
 0x4bf   : > { %12727 = vmatmul.mubr.msk.f32.gmra.mrb[30].mxu1 %vm342_vm15, %v14544_v3 }
 0x4c0   : > { %12862 = vmatmul.mubr.msk.f32.vlgmr.msra.gmra.mrb[24].mxu0 %vm342_vm15, %v14520_v59  ;;  %12729 = vmatprep.mubr.msk.f32.mxu1 %vm342_vm15, %v14557_v10 }
 0x4c1   : > { %12864 = vmatprep.mubr.msk.f32.mxu0 %vm342_vm15, %v14533_v0  ;;  %13488 = vmatpush3.bf16.msk.msra.mxu0 %vm14460_vm6, %v16030_v31 }
 0x4c2   : > { %13490 = vmatprep.subr.bf16.mxu0 %v14583_v26 }
 0x4c3   : > { %12730 = vmatmul.mubr.msk.f32.gmra.mrb[32].mxu1 %vm342_vm15, %v14569_v16 }
 0x4c4   : > { %12865 = vmatmul.mubr.msk.f32.gmra.mrb[26].mxu0 %vm342_vm15, %v14544_v3  ;;  %12732 = vmatprep.mubr.msk.f32.mxu1 %vm342_vm15, %v14577_v20 }
 0x4c5   : > { %12867 = vmatprep.mubr.msk.f32.mxu0 %vm342_vm15, %v14557_v10 }
 0x4c7   : > { %12733 = vmatmul.mubr.msk.f32.gmra.mrb[34].mxu1 %vm342_vm15, %v14581_v12 }
 0x4c8   : > { %12868 = vmatmul.mubr.msk.f32.gmra.mrb[28].mxu0 %vm342_vm15, %v14569_v16  ;;  %12877 = vmatprep.mubr.f32.mxu1 %v8322_v62 }
 0x4c9   : > { %12870 = vmatprep.mubr.msk.f32.mxu0 %vm342_vm15, %v14577_v20 }
 0x4cb   : > { %12878 = vmatmul.mubr.f32.vlgmr.msra.gmra.mrb[36].mxu1 %v8332_v63 }
 0x4cc   : > { %12871 = vmatmul.mubr.msk.f32.gmra.mrb[30].mxu0 %vm342_vm15, %v14581_v12  ;;  %13444 = vmatpush3.bf16.msra.mxu1 %v14583_v26 }
 0x4cd   : > { %13015 = vmatprep.mubr.f32.mxu0 %v9635_v51  ;;  %12884 = vmatprep.mubr.f32.mxu1 %v15590_v55 }
 0x4ce   : > { %13446 = vmatprep.subr.bf16.mxu1 %v14592_v35 }
 0x4d0   : > { %13016 = vmatmul.mubr.f32.vlgmr.msra.gmra.mrb[32].mxu0 %v9645_v1 }
 0x4d1   : > { %13492 = vmatpush3.bf16.msra.mxu0 %v14583_v26  ;;  %13022 = vmatprep.mubr.f32.mxu0 %v15607_v52  ;;  %v16032_v26 = vld [vmem:[#allocation14_spill] sm:$0xff] }
 0x4d2   : > { %13494 = vmatprep.subr.bf16.mxu0 %v14592_v35 }
 0x4d3   : > { %12885 = vmatmul.mubr.f32.vlgmr.msra.gmra.mrb[36].mxu1 %v15597_v4 }
 0x4d4   : > { %13448 = vmatpush3.bf16.msra.mxu1 %v14592_v35  ;;  %12891 = vmatprep.mubr.f32.mxu1 %v8319_v17 }
 0x4d5   : > { %13450 = vmatprep.subr.msk.bf16.mxu1 %vm14460_vm6, %v16030_v31 }
 0x4d8   : > { %13023 = vmatmul.mubr.f32.vlgmr.msra.gmra.mrb[32].mxu0 %v15616_v28 }
 0x4d9   : > { %13496 = vmatpush3.bf16.msra.mxu0 %v14592_v35  ;;  %13029 = vmatprep.mubr.f32.mxu0 %v9632_v15 }
 0x4da   : > { %13498 = vmatprep.subr.msk.bf16.mxu0 %vm14460_vm6, %v16030_v31 }
 0x4db   : > { %12892 = vmatmul.mubr.f32.vlgmr.msra.gmra.mrb[36].mxu1 %v8329_v8 }
 0x4dc   : > { %13452 = vmatpush3.bf16.msk.msra.mxu1 %vm14460_vm6, %v16030_v31  ;;  %12898 = vmatprep.mubr.f32.mxu1 %v8320_v5 }
 0x4dd   : > { %13454 = vmatprep.subr.bf16.mxu1 %v14609_v53 }
 0x4e0   : > { %13030 = vmatmul.mubr.f32.vlgmr.msra.gmra.mrb[32].mxu0 %v9642_v6 }
 0x4e1   : > { %13500 = vmatpush3.bf16.msk.msra.mxu0 %vm14460_vm6, %v16030_v31  ;;  %13036 = vmatprep.mubr.f32.mxu0 %v9633_v29 }
 0x4e2   : > { %13502 = vmatprep.subr.bf16.mxu0 %v14609_v53 }
 0x4e3   : > { %12899 = vmatmul.mubr.f32.vlgmr.msra.gmra.mrb[36].mxu1 %v8330_v9 }
 0x4e4   : > { %13456 = vmatpush3.bf16.msra.mxu1 %v14609_v53  ;;  %12905 = vmatprep.mubr.f32.mxu1 %v15590_v55 }
 0x4e5   : > { %13458 = vmatprep.subr.msk.bf16.mxu1 %vm14460_vm6, %v16030_v31 }
 0x4e8   : > { %13037 = vmatmul.mubr.f32.vlgmr.msra.gmra.mrb[32].mxu0 %v9643_v48 }
 0x4e9   : > { %13504 = vmatpush3.bf16.msra.mxu0 %v14609_v53  ;;  %13043 = vmatprep.mubr.f32.mxu0 %v15607_v52 }
 0x4ea   : > { %13506 = vmatprep.subr.msk.bf16.mxu0 %vm14460_vm6, %v16030_v31 }
 0x4eb   : > { %12906 = vmatmul.mubr.f32.vlgmr.msra.gmra.mrb[36].mxu1 %v15597_v4 }
 0x4ec   : > { %13460 = vmatpush3.bf16.msk.msra.mxu1 %vm14460_vm6, %v16030_v31  ;;  %12912 = vmatprep.mubr.f32.mxu1 %v15590_v55 }
 0x4f0   : > { %13044 = vmatmul.mubr.f32.vlgmr.msra.gmra.mrb[32].mxu0 %v15616_v28 }
 0x4f1   : > { %13508 = vmatpush3.bf16.msk.msra.mxu0 %vm14460_vm6, %v16030_v31  ;;  %13050 = vmatprep.mubr.f32.mxu0 %v15607_v52 }
 0x4f3   : > { %12913 = vmatmul.mubr.f32.vlgmr.msra.gmra.mrb[36].mxu1 %v15597_v4 }
 0x4f4   : > { %12919 = vmatprep.mubr.f32.mxu1 %v16032_v26 }
 0x4f8   : > { %13051 = vmatmul.mubr.f32.vlgmr.msra.gmra.mrb[32].mxu0 %v15616_v28 }
 0x4f9   : > { %13057 = vmatprep.mubr.f32.mxu0 %v16032_v26 }
 0x58e   : > { %v12725_v35 = vpop.f32.mrb[28].mxu1 }
 0x58f   : > { %11212 = vst.msk [vmem:[%s15035_s9 + $0x108] sm:$0xff] %vm1635_vm12, %v12725_v35  ;;  %v6841_v43 = vpop.f32.mrb[29].mxu1 }
 0x590   : > { %11211 = vst.msk [vmem:[%s15035_s9 + $0x100] sm:$0xff] %vm1635_vm12, %v6841_v43 }
 0x592   : > { %v12728_v53 = vpop.f32.mrb[30].mxu1 }
 0x593   : > { %11214 = vst.msk [vmem:[%s15035_s9 + $0x118] sm:$0xff] %vm1635_vm12, %v12728_v53  ;;  %v12863_v31 = vpop.f32.mrb[24].mxu0  ;;  %v6853_v56 = vpop.f32.mrb[31].mxu1 }
 0x594   : > { %11261 = vst.msk [vmem:[%s15035_s9 + $0x148] sm:$0xff] %vm1635_vm12, %v12863_v31  ;;  %11213 = vst.msk [vmem:[%s15035_s9 + $0x110] sm:$0xff] %vm1635_vm12, %v6853_v56  ;;  %v8154_v13 = vpop.f32.mrb[25].mxu0 }
 0x595   : > { %11260 = vst.msk [vmem:[%s15035_s9 + $0x140] sm:$0xff] %vm1635_vm12, %v8154_v13 }
 0x596   : > { %v12731_v19 = vpop.f32.mrb[32].mxu1 }
 0x597   : > { %11216 = vst.msk [vmem:[%s15035_s9 + $0x128] sm:$0xff] %vm1635_vm12, %v12731_v19  ;;  %v12866_v22 = vpop.f32.mrb[26].mxu0  ;;  %v6865_v37 = vpop.f32.mrb[33].mxu1 }
 0x598   : > { %11263 = vst.msk [vmem:[%s15035_s9 + $0x158] sm:$0xff] %vm1635_vm12, %v12866_v22  ;;  %11215 = vst.msk [vmem:[%s15035_s9 + $0x120] sm:$0xff] %vm1635_vm12, %v6865_v37  ;;  %v8166_v55 = vpop.f32.mrb[27].mxu0 }
 0x599   : > { %11262 = vst.msk [vmem:[%s15035_s9 + $0x150] sm:$0xff] %vm1635_vm12, %v8166_v55 }
 0x59a   : > { %v12734_v38 = vpop.f32.mrb[34].mxu1 }
 0x59b   : > { %11218 = vst.msk [vmem:[%s15035_s9 + $0x138] sm:$0xff] %vm1635_vm12, %v12734_v38  ;;  %v12869_v23 = vpop.f32.mrb[28].mxu0  ;;  %v6877_v4 = vpop.f32.mrb[35].mxu1 }
 0x59c   : > { %11265 = vst.msk [vmem:[%s15035_s9 + $0x168] sm:$0xff] %vm1635_vm12, %v12869_v23  ;;  %11217 = vst.msk [vmem:[%s15035_s9 + $0x130] sm:$0xff] %vm1635_vm12, %v6877_v4  ;;  %v8178_v17 = vpop.f32.mrb[29].mxu0 }
 0x59d   : > { %11264 = vst.msk [vmem:[%s15035_s9 + $0x160] sm:$0xff] %vm1635_vm12, %v8178_v17 }
 0x59f   : > { %v12872_v18 = vpop.f32.mrb[30].mxu0 }
 0x5a0   : > { %11267 = vst.msk [vmem:[%s15035_s9 + $0x178] sm:$0xff] %vm1635_vm12, %v12872_v18  ;;  %v8190_v52 = vpop.f32.mrb[31].mxu0 }
 0x5a1   : > { %11266 = vst.msk [vmem:[%s15035_s9 + $0x170] sm:$0xff] %vm1635_vm12, %v8190_v52 }
 0x5c6   : > { %v12914_v8 = vpop.f32.mrb[36].mxu1 }
 0x5c7   : > { %v8757_v5 = vand.u32 4294901760, %v12914_v8  ;;  %v8743_v28 = vpop.f32.mrb[37].mxu1 }
 0x5c8   : > { %v8754_v15 = vand.u32 4294901760, %v8743_v28 }
 0x5c9   : > { %v8909_v9 = vsub.f32 %v12914_v8, %v8757_v5 }
 0x5ca   : > { %v15734_v40 = vpack.c.bf16 %v8757_v5, %v8754_v15  ;;  %v8902_v6 = vsub.f32 %v8743_v28, %v8754_v15 }
 0x5cb   : > { %v8910_v29 = vand.u32 4294901760, %v8909_v9  ;;  %v13052_v45 = vpop.f32.mrb[32].mxu0 }
 0x5cc   : > { %v8903_v62 = vand.u32 4294901760, %v8902_v6  ;;  %v10070_v48 = vand.u32 4294901760, %v13052_v45  ;;  %v10056_v54 = vpop.f32.mrb[33].mxu0  ;;  %13462 = vmatprep.subr.bf16.mxu1 %v15734_v40  ;;  %v13469_v63 = vpack.c.bf16 %v8909_v9, %v8902_v6 }
 0x5cd   : > { %v8911_v46 = vsub.f32 %v8909_v9, %v8910_v29  ;;  %v10067_v51 = vand.u32 4294901760, %v10056_v54  ;;  %13464 = vmatpush3.bf16.msra.mxu1 %v15734_v40 }
 0x5ce   : > { %v8904_v1 = vsub.f32 %v8902_v6, %v8903_v62  ;;  %v10222_v26 = vsub.f32 %v13052_v45, %v10070_v48  ;;  %v15738_v35 = vpack.c.bf16 %v8910_v29, %v8903_v62 }
 0x5cf   : > { %v15740_v43 = vpack.c.bf16 %v10070_v48, %v10067_v51  ;;  %v10215_v53 = vsub.f32 %v10056_v54, %v10067_v51  ;;  %v8912_v31 = vand.u32 4294901760, %v8911_v46 }
 0x5d0   : > { %v10223_v56 = vand.u32 4294901760, %v10222_v26  ;;  %12920 = vmatmul.mubr.f32.vlgmr.msra.gmra.mrb[38].mxu1 %v14710_v58  ;;  %v8905_v13 = vand.u32 4294901760, %v8904_v1 }
 0x5d1   : > { %v10216_v19 = vand.u32 4294901760, %v10215_v53  ;;  %13510 = vmatprep.subr.bf16.mxu0 %v15740_v43  ;;  %12922 = vmatprep.mubr.f32.mxu1 %v14721_v7  ;;  %v13517_v22 = vpack.c.bf16 %v10222_v26, %v10215_v53 }
 0x5d2   : > { %v10224_v37 = vsub.f32 %v10222_v26, %v10223_v56  ;;  %13512 = vmatpush3.bf16.msra.mxu0 %v15740_v43  ;;  %v13465_v55 = vpack.c.bf16 %v8912_v31, %v8905_v13 }
 0x5d3   : > { %v10217_v38 = vsub.f32 %v10215_v53, %v10216_v19  ;;  %v15746_v23 = vpack.c.bf16 %v10223_v56, %v10216_v19 }
 0x5d4   : > { %12923 = vmatmul.mubr.f32.gmra.mrb[40].mxu1 %v14729_v21  ;;  %13466 = vmatprep.subr.bf16.mxu1 %v13465_v55  ;;  %v10225_v4 = vand.u32 4294901760, %v10224_v37 }
 0x5d5   : > { %13058 = vmatmul.mubr.f32.vlgmr.msra.gmra.mrb[34].mxu0 %v14710_v58  ;;  %13468 = vmatpush3.bf16.msra.mxu1 %v13465_v55  ;;  %v10218_v17 = vand.u32 4294901760, %v10217_v38 }
 0x5d6   : > { %13470 = vmatprep.subr.bf16.mxu1 %v13469_v63  ;;  %12925 = vmatprep.mubr.f32.mxu1 %v14737_v36 }
 0x5d7   : > { %13060 = vmatprep.mubr.f32.mxu0 %v14721_v7  ;;  %v13513_v18 = vpack.c.bf16 %v10225_v4, %v10218_v17 }
 0x5d8   : > { %12926 = vmatmul.mubr.f32.gmra.mrb[42].mxu1 %v14742_v39 }
 0x5d9   : > { %13061 = vmatmul.mubr.f32.gmra.mrb[36].mxu0 %v14729_v21  ;;  %13514 = vmatprep.subr.bf16.mxu0 %v13513_v18 }
 0x5da   : > { %13516 = vmatpush3.bf16.msra.mxu0 %v13513_v18  ;;  %12928 = vmatprep.mubr.f32.mxu1 %v14747_v41 }
 0x5db   : > { %13518 = vmatprep.subr.bf16.mxu0 %v13517_v22  ;;  %13063 = vmatprep.mubr.f32.mxu0 %v14737_v36 }
 0x5dc   : > { %12929 = vmatmul.mubr.f32.gmra.mrb[44].mxu1 %v14750_v44 }
 0x5dd   : > { %13064 = vmatmul.mubr.f32.gmra.mrb[38].mxu0 %v14742_v39  ;;  %12935 = vmatprep.mubr.msk.f32.mxu1 %vm342_vm15, %v14511_v57 }
 0x5de   : > { %13066 = vmatprep.mubr.f32.mxu0 %v14747_v41 }
 0x5e0   : > { %12936 = vmatmul.mubr.msk.f32.vlgmr.msra.gmra.mrb[38].mxu1 %vm342_vm15, %v14520_v59 }
 0x5e1   : > { %13472 = vmatpush3.bf16.msra.mxu1 %v13469_v63  ;;  %13067 = vmatmul.mubr.f32.gmra.mrb[40].mxu0 %v14750_v44 }
 0x5e2   : > { %13474 = vmatprep.subr.bf16.mxu1 %v15734_v40  ;;  %12938 = vmatprep.mubr.msk.f32.mxu1 %vm342_vm15, %v14533_v0 }
 0x5e3   : > { %13073 = vmatprep.mubr.msk.f32.mxu0 %vm342_vm15, %v14511_v57 }
 0x5e4   : > { %12939 = vmatmul.mubr.msk.f32.gmra.mrb[40].mxu1 %vm342_vm15, %v14544_v3 }
 0x5e5   : > { %13074 = vmatmul.mubr.msk.f32.vlgmr.msra.gmra.mrb[34].mxu0 %vm342_vm15, %v14520_v59  ;;  %12941 = vmatprep.mubr.msk.f32.mxu1 %vm342_vm15, %v14557_v10 }
 0x5e6   : > { %13520 = vmatpush3.bf16.msra.mxu0 %v13517_v22  ;;  %13076 = vmatprep.mubr.msk.f32.mxu0 %vm342_vm15, %v14533_v0 }
 0x5e7   : > { %13522 = vmatprep.subr.bf16.mxu0 %v15740_v43 }
 0x5e8   : > { %12942 = vmatmul.mubr.msk.f32.gmra.mrb[42].mxu1 %vm342_vm15, %v14569_v16 }
 0x5e9   : > { %13077 = vmatmul.mubr.msk.f32.gmra.mrb[36].mxu0 %vm342_vm15, %v14544_v3  ;;  %12944 = vmatprep.mubr.msk.f32.mxu1 %vm342_vm15, %v14577_v20 }
 0x5ea   : > { %13079 = vmatprep.mubr.msk.f32.mxu0 %vm342_vm15, %v14557_v10 }
 0x5ec   : > { %12945 = vmatmul.mubr.msk.f32.gmra.mrb[44].mxu1 %vm342_vm15, %v14581_v12 }
 0x5ed   : > { %13080 = vmatmul.mubr.msk.f32.gmra.mrb[38].mxu0 %vm342_vm15, %v14569_v16  ;;  %12951 = vmatprep.mubr.f32.mxu1 %v14656_v2 }
 0x5ee   : > { %13082 = vmatprep.mubr.msk.f32.mxu0 %vm342_vm15, %v14577_v20 }
 0x5f0   : > { %12952 = vmatmul.mubr.f32.vlgmr.msra.gmra.mrb[38].mxu1 %v14670_v27 }
 0x5f1   : > { %13476 = vmatpush3.bf16.msra.mxu1 %v15734_v40  ;;  %13083 = vmatmul.mubr.msk.f32.gmra.mrb[40].mxu0 %vm342_vm15, %v14581_v12 }
 0x5f2   : > { %13478 = vmatprep.subr.bf16.mxu1 %v15738_v35  ;;  %12954 = vmatprep.mubr.f32.mxu1 %v14672_v30 }
 0x5f3   : > { %13089 = vmatprep.mubr.f32.mxu0 %v14656_v2 }
 0x5f4   : > { %12955 = vmatmul.mubr.f32.gmra.mrb[40].mxu1 %v14681_v24 }
 0x5f5   : > { %13090 = vmatmul.mubr.f32.vlgmr.msra.gmra.mrb[34].mxu0 %v14670_v27  ;;  %12957 = vmatprep.mubr.f32.mxu1 %v14686_v34 }
 0x5f6   : > { %13524 = vmatpush3.bf16.msra.mxu0 %v15740_v43  ;;  %13092 = vmatprep.mubr.f32.mxu0 %v14672_v30 }
 0x5f7   : > { %13526 = vmatprep.subr.bf16.mxu0 %v15746_v23 }
 0x5f8   : > { %12958 = vmatmul.mubr.f32.gmra.mrb[42].mxu1 %v14699_v47 }
 0x5f9   : > { %13093 = vmatmul.mubr.f32.gmra.mrb[36].mxu0 %v14681_v24  ;;  %12960 = vmatprep.mubr.f32.mxu1 %v14704_v50 }
 0x5fa   : > { %13095 = vmatprep.mubr.f32.mxu0 %v14686_v34 }
 0x5fc   : > { %12961 = vmatmul.mubr.f32.gmra.mrb[44].mxu1 %v14718_v61 }
 0x5fd   : > { %13096 = vmatmul.mubr.f32.gmra.mrb[38].mxu0 %v14699_v47  ;;  %12967 = vmatprep.mubr.f32.mxu1 %v14659_v11 }
 0x5fe   : > { %13098 = vmatprep.mubr.f32.mxu0 %v14704_v50 }
 0x600   : > { %12968 = vmatmul.mubr.f32.vlgmr.msra.gmra.mrb[38].mxu1 %v16031_v25 }
 0x601   : > { %13480 = vmatpush3.bf16.msra.mxu1 %v15738_v35  ;;  %13099 = vmatmul.mubr.f32.gmra.mrb[40].mxu0 %v14718_v61 }
 0x602   : > { %13482 = vmatprep.subr.bf16.mxu1 %v15734_v40  ;;  %12970 = vmatprep.mubr.f32.mxu1 %v14684_v33 }
 0x603   : > { %13105 = vmatprep.mubr.f32.mxu0 %v14659_v11 }
 0x604   : > { %12971 = vmatmul.mubr.f32.gmra.mrb[40].mxu1 %v14695_v42 }
 0x605   : > { %13106 = vmatmul.mubr.f32.vlgmr.msra.gmra.mrb[34].mxu0 %v16031_v25  ;;  %12973 = vmatprep.mubr.f32.mxu1 %v14702_v49 }
 0x606   : > { %13528 = vmatpush3.bf16.msra.mxu0 %v15746_v23  ;;  %13108 = vmatprep.mubr.f32.mxu0 %v14684_v33 }
 0x607   : > { %13530 = vmatprep.subr.bf16.mxu0 %v15740_v43 }
 0x608   : > { %12974 = vmatmul.mubr.f32.gmra.mrb[42].mxu1 %v14716_v60 }
 0x609   : > { %13109 = vmatmul.mubr.f32.gmra.mrb[36].mxu0 %v14695_v42  ;;  %12976 = vmatprep.mubr.f32.mxu1 %v14726_v14 }
 0x60a   : > { %13111 = vmatprep.mubr.f32.mxu0 %v14702_v49 }
 0x60c   : > { %12977 = vmatmul.mubr.f32.gmra.mrb[44].mxu1 %v14734_v32 }
 0x60d   : > { %13112 = vmatmul.mubr.f32.gmra.mrb[38].mxu0 %v14716_v60  ;;  %12983 = vmatprep.mubr.msk.f32.mxu1 %vm342_vm15, %v14511_v57 }
 0x60e   : > { %13114 = vmatprep.mubr.f32.mxu0 %v14726_v14 }
 0x610   : > { %12984 = vmatmul.mubr.msk.f32.vlgmr.msra.gmra.mrb[38].mxu1 %vm342_vm15, %v14520_v59 }
 0x611   : > { %13484 = vmatpush3.bf16.msra.mxu1 %v15734_v40  ;;  %13115 = vmatmul.mubr.f32.gmra.mrb[40].mxu0 %v14734_v32 }
 0x612   : > { %12986 = vmatprep.mubr.msk.f32.mxu1 %vm342_vm15, %v14533_v0  ;;  %13121 = vmatprep.mubr.msk.f32.mxu0 %vm342_vm15, %v14511_v57 }
 0x614   : > { %12987 = vmatmul.mubr.msk.f32.gmra.mrb[40].mxu1 %vm342_vm15, %v14544_v3 }
 0x615   : > { %13122 = vmatmul.mubr.msk.f32.vlgmr.msra.gmra.mrb[34].mxu0 %vm342_vm15, %v14520_v59  ;;  %12989 = vmatprep.mubr.msk.f32.mxu1 %vm342_vm15, %v14557_v10 }
 0x616   : > { %13532 = vmatpush3.bf16.msra.mxu0 %v15740_v43  ;;  %13124 = vmatprep.mubr.msk.f32.mxu0 %vm342_vm15, %v14533_v0 }
 0x618   : > { %12990 = vmatmul.mubr.msk.f32.gmra.mrb[42].mxu1 %vm342_vm15, %v14569_v16 }
 0x619   : > { %13125 = vmatmul.mubr.msk.f32.gmra.mrb[36].mxu0 %vm342_vm15, %v14544_v3  ;;  %12992 = vmatprep.mubr.msk.f32.mxu1 %vm342_vm15, %v14577_v20 }
 0x61a   : > { %13127 = vmatprep.mubr.msk.f32.mxu0 %vm342_vm15, %v14557_v10 }
 0x61c   : > { %12993 = vmatmul.mubr.msk.f32.gmra.mrb[44].mxu1 %vm342_vm15, %v14581_v12 }
 0x61d   : > { %13128 = vmatmul.mubr.msk.f32.gmra.mrb[38].mxu0 %vm342_vm15, %v14569_v16  ;;  %12999 = vmatprep.mubr.msk.f32.mxu1 %vm342_vm15, %v14511_v57 }
 0x61e   : > { %13130 = vmatprep.mubr.msk.f32.mxu0 %vm342_vm15, %v14577_v20 }
 0x620   : > { %13000 = vmatmul.mubr.msk.f32.vlgmr.msra.gmra.mrb[38].mxu1 %vm342_vm15, %v14520_v59 }
 0x621   : > { %13131 = vmatmul.mubr.msk.f32.gmra.mrb[40].mxu0 %vm342_vm15, %v14581_v12  ;;  %13002 = vmatprep.mubr.msk.f32.mxu1 %vm342_vm15, %v14533_v0 }
 0x622   : > { %13137 = vmatprep.mubr.msk.f32.mxu0 %vm342_vm15, %v14511_v57 }
 0x624   : > { %13003 = vmatmul.mubr.msk.f32.gmra.mrb[40].mxu1 %vm342_vm15, %v14544_v3 }
 0x625   : > { %13138 = vmatmul.mubr.msk.f32.vlgmr.msra.gmra.mrb[34].mxu0 %vm342_vm15, %v14520_v59  ;;  %13005 = vmatprep.mubr.msk.f32.mxu1 %vm342_vm15, %v14557_v10 }
 0x626   : > { %13140 = vmatprep.mubr.msk.f32.mxu0 %vm342_vm15, %v14533_v0 }
 0x628   : > { %13006 = vmatmul.mubr.msk.f32.gmra.mrb[42].mxu1 %vm342_vm15, %v14569_v16 }
 0x629   : > { %13141 = vmatmul.mubr.msk.f32.gmra.mrb[36].mxu0 %vm342_vm15, %v14544_v3  ;;  %13008 = vmatprep.mubr.msk.f32.mxu1 %vm342_vm15, %v14577_v20 }
 0x62a   : > { %13143 = vmatprep.mubr.msk.f32.mxu0 %vm342_vm15, %v14557_v10 }
 0x62c   : > { %13009 = vmatmul.mubr.msk.f32.gmra.mrb[44].mxu1 %vm342_vm15, %v14581_v12 }
 0x62d   : > { %13144 = vmatmul.mubr.msk.f32.gmra.mrb[38].mxu0 %vm342_vm15, %v14569_v16 }
 0x62e   : > { %13146 = vmatprep.mubr.msk.f32.mxu0 %vm342_vm15, %v14577_v20 }
 0x631   : > { %13147 = vmatmul.mubr.msk.f32.gmra.mrb[40].mxu0 %vm342_vm15, %v14581_v12 }
 0x6f3   : > { %v13001_v57 = vpop.f32.mrb[38].mxu1 }
 0x6f4   : > { %11310 = vst.msk [vmem:[%s15035_s9 + $0x188] sm:$0xff] %vm1635_vm12, %v13001_v57  ;;  %v9467_v59 = vpop.f32.mrb[39].mxu1 }
 0x6f5   : > { %11309 = vst.msk [vmem:[%s15035_s9 + $0x180] sm:$0xff] %vm1635_vm12, %v9467_v59 }
 0x6f7   : > { %v13004_v0 = vpop.f32.mrb[40].mxu1 }
 0x6f8   : > { %11312 = vst.msk [vmem:[%s15035_s9 + $0x198] sm:$0xff] %vm1635_vm12, %v13004_v0  ;;  %v13139_v3 = vpop.f32.mrb[34].mxu0  ;;  %v9479_v10 = vpop.f32.mrb[41].mxu1 }
 0x6f9   : > { %11359 = vst.msk [vmem:[%s15035_s9 + $0x1c8] sm:$0xff] %vm1635_vm12, %v13139_v3  ;;  %11311 = vst.msk [vmem:[%s15035_s9 + $0x190] sm:$0xff] %vm1635_vm12, %v9479_v10  ;;  %v10780_v16 = vpop.f32.mrb[35].mxu0 }
 0x6fa   : > { %11358 = vst.msk [vmem:[%s15035_s9 + $0x1c0] sm:$0xff] %vm1635_vm12, %v10780_v16 }
 0x6fb   : > { %v13007_v20 = vpop.f32.mrb[42].mxu1 }
 0x6fc   : > { %11314 = vst.msk [vmem:[%s15035_s9 + $0x1a8] sm:$0xff] %vm1635_vm12, %v13007_v20  ;;  %v13142_v12 = vpop.f32.mrb[36].mxu0  ;;  %v9491_v2 = vpop.f32.mrb[43].mxu1 }
 0x6fd   : > { %11361 = vst.msk [vmem:[%s15035_s9 + $0x1d8] sm:$0xff] %vm1635_vm12, %v13142_v12  ;;  %11313 = vst.msk [vmem:[%s15035_s9 + $0x1a0] sm:$0xff] %vm1635_vm12, %v9491_v2  ;;  %v10792_v11 = vpop.f32.mrb[37].mxu0 }
 0x6fe   : > { %11360 = vst.msk [vmem:[%s15035_s9 + $0x1d0] sm:$0xff] %vm1635_vm12, %v10792_v11 }
 0x6ff   : > { %v13010_v27 = vpop.f32.mrb[44].mxu1 }
 0x700   : > { %11316 = vst.msk [vmem:[%s15035_s9 + $0x1b8] sm:$0xff] %vm1635_vm12, %v13010_v27  ;;  %v13145_v30 = vpop.f32.mrb[38].mxu0  ;;  %v9503_v24 = vpop.f32.mrb[45].mxu1 }
 0x701   : > { %11363 = vst.msk [vmem:[%s15035_s9 + $0x1e8] sm:$0xff] %vm1635_vm12, %v13145_v30  ;;  %11315 = vst.msk [vmem:[%s15035_s9 + $0x1b0] sm:$0xff] %vm1635_vm12, %v9503_v24  ;;  %v10804_v33 = vpop.f32.mrb[39].mxu0 }
 0x702   : > { %11362 = vst.msk [vmem:[%s15035_s9 + $0x1e0] sm:$0xff] %vm1635_vm12, %v10804_v33 }
 0x704   : > { %v13148_v34 = vpop.f32.mrb[40].mxu0 }
 0x705   : > { %11365 = vst.msk [vmem:[%s15035_s9 + $0x1f8] sm:$0xff] %vm1635_vm12, %v13148_v34  ;;  %v10816_v42 = vpop.f32.mrb[41].mxu0 }
 0x706   : > { %11364 = vst.msk [vmem:[%s15035_s9 + $0x1f0] sm:$0xff] %vm1635_vm12, %v10816_v42 }
 0x707   : > { %14097 = shalt.err (!%p14094_p8)
}
 0x708   : > { %s14098_s9 = scalar_lea.hbm %s15933_s23, 8192  ;;  %s14102_s19 = scalar_lea.hbm %s15991_s3, 16384 }
 0x709   : > { %p14099_p13 = scmp.ne.s32.totalorder %s15933_s23, %s14098_s9  ;;  %p14103_p12 = scmp.lt.u32.totalorder %s15933_s23, %s15991_s3 }
 0x70a   : > { %p14104_p2 = scmp.lt.u32.totalorder %s14102_s19, %s14098_s9  ;;  %p14106_p5 = scmp.lt.u32.totalorder %s14098_s9, %s15933_s23 }
 0x70b   : > { %p14100_p4 = pnand %p14099_p13, %p16033_p0 }
 0x70c   : > { %p14105_p9 = por %p14104_p2, %p14103_p12 }
 0x70d   : > { %p14101_p10 = pneg %p14100_p4 }
 0x70e   : > { %p14107_p1 = por %p14106_p5, %p14105_p9 }
 0x710   : > { %p14108_p6 = pnand %p14107_p1, %p14101_p10 }
 0x712   : > { %14111 = shalt.err (!%p14108_p6)
}
 0x713   : > { %s14184_s10 = smov 128   ;;  %s14185_s11 = smov 8  }
 0x714   : > { %13945 = dma.vmem_to_hbm [thread:$0]  (%p16033_p0), %s15935_s22, 8192, %s15933_s23, %s10836_s15, %s14184_s10, %s14184_s10, %s14185_s11  }
 0x715 PF: > { %s10866_s27 = sand.u32 1, %s14154_s12   ;;  %p16034_p11 = scmp.ne.s32.totalorder %s16008_s25, 0 }
 0x716   : > { %p16035_p7 = scmp.ge.s32.totalorder %s14174_s17, 2  ;;  %s10867_s29 = scalar_lea.sflag [#allocation4], %s10866_s27 }
 0x718   : > { %p13959_p3 = pnand %p16035_p7, %p16034_p11 }
 0x71a   : > { %14149 = dma.done.wait (!%p13959_p3), %s10867_s29, 8192  }
 0x71b   : > { %14151 = vsyncadd (!%p13959_p3), %s10867_s29, 4294959104  ;;  %s21_s17 = sadd.s32 1, %s14174_s17   ;;  %s16036_s12 = smov %s14158_s13 }
 0x71c   : > { %p18_p8 = scmp.ge.s32.totalorder %s21_s17, 4   ;;  %s16037_s13 = smov %s14162_s14 }
 0x71d   : > { %s16038_s14 = smov %s14317_s8  ;;  %s16039_s15 = smov %s14170_s16 }
 0x71e   : > { %s16040_s16 = smov %s16042_s18  ;;  %20 = sbr.rel (!%p18_p8) target bundleno = 8 (0x8), region = 96 }
 0x725   :  { %10872 = vsyncpa [#allocation3], 1 }
 0x726   :  { %10874 = vsyncpa [#allocation3 + $0x1], 1 }
 0x727   :  { %10875 = vsyncpa [#allocation4], 1 }
 0x728   :  { %10877 = vsyncpa [#allocation4 + $0x1], 1 }
 0x729   :  { %10878 = vsyncpa [#allocation5], 1 }
 0x72a   :  { %10880 = vsyncpa [#allocation5 + $0x1], 1 }
 0x72b   :  { %10881 = vsyncpa [#allocation8], 1 }

</bundles_post_ra>
